<compile_context>
chip_gen: v7x
topology: tpu7x:2x2x1
jax: 0.10.0
libtpu: 0.0.40
codegen_flags: <defaults>
</compile_context>

<pallas_src>
import math
import functools

import jax
import jax.numpy as jnp
from jax import lax
from jax.experimental import pallas as pl
from jax.experimental.pallas import tpu as pltpu


# MXU operand dtype (accumulation is always f32 via preferred_element_type).
# Set to jnp.float32 for bit-faithful numerics at ~2x HBM traffic / MXU time.
MM_DTYPE = jnp.bfloat16


def _round_up(x, m):
    return ((x + m - 1) // m) * m


def _pick_tile(n, cap):
    """Largest multiple-of-8 divisor of n (n a multiple of 8) that is <= cap."""
    t = max(8, min(cap, n))
    t -= t % 8
    while n % t:
        t -= 8
    return t


def _tpu_vmem_capacity_bytes():
    try:
        return int(pltpu.get_tpu_info().vmem_capacity_bytes)
    except Exception:
        return 64 * 1024 * 1024          # conservative (v7x-sized) fallback


_VMEM_CAP = _tpu_vmem_capacity_bytes()
# Scoped-VMEM request: ~half of per-core physical VMEM (64 MiB on v5e/v6e, 32 MiB on
# v7x / unknown) -- comfortably above the worst-case live set of the kernels below.
VMEM_LIMIT_BYTES = int(min(max(_VMEM_CAP // 2, 32 * 1024 * 1024), 96 * 1024 * 1024))
# Attention tiling: dst tile fixed at 128 rows; src tile sized to the VMEM budget.
ATTN_TILE_DST = 128
ATTN_TILE_SRC = 512 if _VMEM_CAP >= 96 * 1024 * 1024 else 256


# --------------------------------------------------------------------------
# Generic tiled linear (encoders, fused QKV projection, E2, output head)
# --------------------------------------------------------------------------
def _linear_kernel(x_ref, w_ref, b_ref, o_ref, *, activation):
    y = jnp.dot(x_ref[...].astype(MM_DTYPE), w_ref[...],
                preferred_element_type=jnp.float32) + b_ref[...]
    if activation == "relu":
        y = jnp.maximum(y, 0.0)
    o_ref[...] = y.astype(o_ref.dtype)


def linear(x, w, b=None, activation=None, tile_m=2048):
    """y = act(x @ w + b), row-tiled; weights stream as bf16, f32 accumulation."""
    M, K = x.shape
    F = w.shape[1]
    M8 = _round_up(M, 8)
    TM = _pick_tile(M8, tile_m)
    xp = jnp.pad(x, ((0, M8 - M), (0, 0))) if M8 != M else x
    if b is None:
        b = jnp.zeros((F,), jnp.float32)
    out = pl.pallas_call(
        functools.partial(_linear_kernel, activation=activation),
        out_shape=jax.ShapeDtypeStruct((M8, F), jnp.float32),
        grid=(M8 // TM,),
        in_specs=[
            pl.BlockSpec((TM, K), lambda i: (i, 0)),
            pl.BlockSpec((K, F), lambda i: (0, 0)),
            pl.BlockSpec((1, F), lambda i: (0, 0)),
        ],
        out_specs=pl.BlockSpec((TM, F), lambda i: (i, 0)),
        compiler_params=pltpu.CompilerParams(
            dimension_semantics=("parallel",),
            vmem_limit_bytes=VMEM_LIMIT_BYTES),
    )(xp, w.astype(MM_DTYPE), b.reshape(1, F).astype(jnp.float32))
    return out[:M] if M8 != M else out


# --------------------------------------------------------------------------
# Fused FFN block: relu(x@W1+b1) @ W2 + b2, + residual, + LayerNorm
# --------------------------------------------------------------------------
def _ffn_kernel(x_ref, w1_ref, b1_ref, w2_ref, vecs_ref, o_ref):
    x = x_ref[...]
    y = jnp.dot(x.astype(MM_DTYPE), w1_ref[...],
                preferred_element_type=jnp.float32) + b1_ref[...]
    y = jnp.maximum(y, 0.0)
    vecs = vecs_ref[...]                                   # [3, H]: b2, ln_g, ln_b
    y = jnp.dot(y.astype(MM_DTYPE), w2_ref[...],
                preferred_element_type=jnp.float32) + vecs[0:1, :]
    y = x + y                                              # residual (dropout=0, eval)
    mean = jnp.mean(y, axis=-1, keepdims=True)
    yc = y - mean
    var = jnp.mean(yc * yc, axis=-1, keepdims=True)
    o_ref[...] = (yc * lax.rsqrt(var + 1e-5)) * vecs[1:2, :] + vecs[2:3, :]


def ffn_block(x, w1, b1, w2, vecs, *, tile_rows):
    Np, H = x.shape
    F = w1.shape[1]
    return pl.pallas_call(
        _ffn_kernel,
        out_shape=jax.ShapeDtypeStruct((Np, H), jnp.float32),
        grid=(Np // tile_rows,),
        in_specs=[
            pl.BlockSpec((tile_rows, H), lambda t: (t, 0)),
            pl.BlockSpec((H, F), lambda t: (0, 0)),
            pl.BlockSpec((1, F), lambda t: (0, 0)),
            pl.BlockSpec((F, H), lambda t: (0, 0)),
            pl.BlockSpec((3, H), lambda t: (0, 0)),
        ],
        out_specs=pl.BlockSpec((tile_rows, H), lambda t: (t, 0)),
        compiler_params=pltpu.CompilerParams(
            dimension_semantics=("parallel",),
            vmem_limit_bytes=VMEM_LIMIT_BYTES),
    )(x, w1.astype(MM_DTYPE), b1.reshape(1, F).astype(jnp.float32),
      w2.astype(MM_DTYPE), vecs)


# --------------------------------------------------------------------------
# Fused SAN multi-head attention block, tiled over (dst tile, src tile):
#   in-kernel We edge projection (MXU) + real/fake scores + joint normalization
#   (VMEM accumulators across source tiles) + Wo projection + residual + LayerNorm.
# --------------------------------------------------------------------------
def _san_attn_kernel(q_ref, kT_ref, q2e_ref, k2T_ref, v_ref, edge_ref, weT_ref,
                     rm_ref, valid_ref, hin_ref, wo_ref, vecs_ref,
                     o_ref, acc_ref, z_ref,
                     *, nheads, dh, gamma, tile_dst, tile_src):
    H = nheads * dh
    inv_sqrt_d = 1.0 / math.sqrt(dh)
    t = pl.program_id(0)
    s = pl.program_id(1)
    ns = pl.num_programs(1)

    @pl.when(s == 0)
    def _init():
        acc_ref[...] = jnp.zeros_like(acc_ref)
        z_ref[...] = jnp.zeros_like(z_ref)

    # masks for this (dst tile, src tile) block; fake-edge mask recomputed from iota
    rm = rm_ref[...].astype(jnp.float32)                                  # [TD, TS]
    dst_ids = t * tile_dst + lax.broadcasted_iota(jnp.int32, (tile_dst, tile_src), 0)
    src_ids = s * tile_src + lax.broadcasted_iota(jnp.int32, (tile_dst, tile_src), 1)
    eye = (dst_ids == src_ids).astype(jnp.float32)
    fm = jnp.clip(valid_ref[...] - rm - eye, 0.0, 1.0)                    # [TD, TS]

    # in-kernel We projection of the dense real-edge features (MXU; src lane-minor)
    weT = weT_ref[...]                                                    # [H, H] bf16
    weT_b = jnp.broadcast_to(weT[None], (tile_dst, H, H))
    eP = lax.dot_general(weT_b, edge_ref[...],
                         dimension_numbers=(((2,), (1,)), ((0,), (0,))),
                         preferred_element_type=jnp.float32)              # [TD, H, TS]

    # fake-edge scores for all heads in one batched MXU call: (Q2*E2) @ K2^T
    s_f = lax.dot_general(q2e_ref[...], k2T_ref[...],
                          dimension_numbers=(((2,), (1,)), ((0,), (0,))),
                          preferred_element_type=jnp.float32) * inv_sqrt_d  # [nh, TD, TS]

    q = q_ref[...]                                                        # [TD, H]
    kT = kT_ref[...]                                                      # [H, TS]
    wr_scale = 1.0 / (gamma + 1.0)
    wf_scale = gamma / (gamma + 1.0)

    z_cols = []
    wv_cols = []
    for h in range(nheads):                             # unrolled; per-head [TD,TS] slabs
        hs = h * dh
        # real-edge scores: sum_d Q[t,d] * K[s,d] * E_proj[t,d,s] / sqrt(dh)
        s_r = jnp.sum(q[:, hs:hs + dh, None] * kT[None, hs:hs + dh, :]
                      * eP[:, hs:hs + dh, :], axis=1) * inv_sqrt_d        # [TD, TS]
        w = (jnp.exp(jnp.clip(s_r, -5.0, 5.0)) * rm * wr_scale
             + jnp.exp(jnp.clip(s_f[h], -5.0, 5.0)) * fm * wf_scale)      # [TD, TS]
        z_cols.append(jnp.sum(w, axis=-1, keepdims=True))                 # [TD, 1]
        wv_cols.append(jnp.dot(w.astype(MM_DTYPE), v_ref[h],
                               preferred_element_type=jnp.float32))       # [TD, dh]

    # two lane-contiguous accumulator updates per step (no dh-wide masked stores)
    z_ref[...] += jnp.concatenate(z_cols, axis=-1)                        # [TD, nheads]
    acc_ref[...] += jnp.concatenate(wv_cols, axis=-1)                     # [TD, H]

    # fused epilogue at the last source step: normalization + Wo + residual + LayerNorm
    @pl.when(s == ns - 1)
    def _epilogue():
        inv_z = 1.0 / (z_ref[...] + 1e-6)                                 # [TD, nheads]
        h_attn = jnp.concatenate(
            [acc_ref[:, hh * dh:(hh + 1) * dh] * inv_z[:, hh:hh + 1]
             for hh in range(nheads)], axis=-1)                           # [TD, H]
        vecs = vecs_ref[...]                                              # [3, H]: b_O, ln_g, ln_b
        y = jnp.dot(h_attn.astype(MM_DTYPE), wo_ref[...],
                    preferred_element_type=jnp.float32) + vecs[0:1, :]
        y = hin_ref[...] + y                                              # residual (dropout=0)
        mean = jnp.mean(y, axis=-1, keepdims=True)
        yc = y - mean
        var = jnp.mean(yc * yc, axis=-1, keepdims=True)
        o_ref[...] = (yc * lax.rsqrt(var + 1e-5)) * vecs[1:2, :] + vecs[2:3, :]


def san_attention_block(q, kT, q2e_hm, k2T_hm, v_hm, edge_dense, weT, rmask, valid,
                        h_in, wo, vecs, *, nheads, gamma, tile_dst, tile_src):
    Np, H = h_in.shape
    dh = H // nheads
    kernel = functools.partial(_san_attn_kernel, nheads=nheads, dh=dh,
                               gamma=float(gamma), tile_dst=tile_dst,
                               tile_src=tile_src)
    return pl.pallas_call(
        kernel,
        out_shape=jax.ShapeDtypeStruct((Np, H), jnp.float32),
        grid=(Np // tile_dst, Np // tile_src),
        in_specs=[
            pl.BlockSpec((tile_dst, H), lambda t, s: (t, 0)),               # Q (dst tile)
            pl.BlockSpec((H, tile_src), lambda t, s: (0, s)),               # K^T (src tile)
            pl.BlockSpec((nheads, tile_dst, dh), lambda t, s: (0, t, 0)),   # Q2*E2, head-major
            pl.BlockSpec((nheads, dh, tile_src), lambda t, s: (0, 0, s)),   # K2^T, head-major
            pl.BlockSpec((nheads, tile_src, dh), lambda t, s: (0, s, 0)),   # V, head-major
            pl.BlockSpec((tile_dst, H, tile_src), lambda t, s: (t, 0, s)),  # dense edge feats
            pl.BlockSpec((H, H), lambda t, s: (0, 0)),                      # We^T
            pl.BlockSpec((tile_dst, tile_src), lambda t, s: (t, s)),        # real-edge mask
            pl.BlockSpec((1, tile_src), lambda t, s: (0, s)),               # node-valid mask
            pl.BlockSpec((tile_dst, H), lambda t, s: (t, 0)),               # residual input
            pl.BlockSpec((H, H), lambda t, s: (0, 0)),                      # W_O
            pl.BlockSpec((3, H), lambda t, s: (0, 0)),                      # b_O, ln_g, ln_b
        ],
        out_specs=pl.BlockSpec((tile_dst, H), lambda t, s: (t, 0)),
        scratch_shapes=[pltpu.VMEM((tile_dst, H), jnp.float32),
                        pltpu.VMEM((tile_dst, nheads), jnp.float32)],
        compiler_params=pltpu.CompilerParams(
            dimension_semantics=("parallel", "arbitrary"),
            vmem_limit_bytes=VMEM_LIMIT_BYTES),
    )(q, kT, q2e_hm, k2T_hm, v_hm.astype(MM_DTYPE), edge_dense,
      weT.astype(MM_DTYPE), rmask, valid, h_in, wo.astype(MM_DTYPE), vecs)


# --------------------------------------------------------------------------
# Parameter construction (deterministic, synthetic)
# --------------------------------------------------------------------------
def init_params(key, dim_in, dim_edge, hidden, nheads, nlayers, dim_out):
    keys = jax.random.split(key, 8 + nlayers)

    def lin(k, fi, fo):
        return jax.random.normal(k, (fi, fo), jnp.float32) * (1.0 / math.sqrt(fi))

    params = {
        "enc_w": lin(keys[0], dim_in, hidden),         # FeatureEncoder node encoder
        "enc_b": jnp.zeros((hidden,), jnp.float32),
        "edge_enc_w": lin(keys[1], dim_edge, hidden),  # FeatureEncoder edge encoder
        "edge_enc_b": jnp.zeros((hidden,), jnp.float32),
        "fake_edge_emb": jax.random.normal(keys[2], (1, hidden), jnp.float32),
        "head_w": lin(keys[3], hidden, dim_out),       # GNN node head (1 post-mp layer)
        "head_b": jnp.zeros((dim_out,), jnp.float32),
        "layers": [],
    }
    for li in range(nlayers):
        lk = jax.random.split(keys[8 + li], 12)
        params["layers"].append({
            # MultiHeadAttentionLayer (use_bias=False)
            "Wq": lin(lk[0], hidden, hidden), "Wk": lin(lk[1], hidden, hidden),
            "Wq2": lin(lk[2], hidden, hidden), "Wk2": lin(lk[3], hidden, hidden),
            "Wv": lin(lk[4], hidden, hidden),
            "We": lin(lk[5], hidden, hidden), "We2": lin(lk[6], hidden, hidden),
            # output projection + FFN (bias=True)
            "Wo": lin(lk[7], hidden, hidden), "bo": jnp.zeros((hidden,), jnp.float32),
            "Wff1": lin(lk[8], hidden, 2 * hidden), "bff1": jnp.zeros((2 * hidden,), jnp.float32),
            "Wff2": lin(lk[9], 2 * hidden, hidden), "bff2": jnp.zeros((hidden,), jnp.float32),
            # layer norms
            "ln1_g": jnp.ones((hidden,), jnp.float32), "ln1_b": jnp.zeros((hidden,), jnp.float32),
            "ln2_g": jnp.ones((hidden,), jnp.float32), "ln2_b": jnp.zeros((hidden,), jnp.float32),
        })
    return params


# --------------------------------------------------------------------------
# Forward pass (mirrors SANTransformer.forward with the config above)
# --------------------------------------------------------------------------
def san_transformer_forward(x, edge_attr_raw, src, dst, params, *, nheads, gamma):
    N = x.shape[0]
    H = params["enc_w"].shape[1]
    dh = H // nheads

    # attention tiling (TD | TS | Np by construction; src tile is generation-aware)
    r8 = _round_up(N, 8)
    if r8 <= ATTN_TILE_DST:
        TD = TS = Np = r8
    elif r8 <= ATTN_TILE_SRC:
        TD = ATTN_TILE_DST
        Np = _round_up(N, ATTN_TILE_DST)
        TS = Np
    else:
        TD = ATTN_TILE_DST
        TS = ATTN_TILE_SRC
        Np = _round_up(N, ATTN_TILE_SRC)

    xf = x.astype(jnp.float32)
    xp = jnp.pad(xf, ((0, Np - N), (0, 0))) if Np != N else xf
    valid = (jnp.arange(Np) < N).astype(jnp.float32).reshape(1, Np)

    # FeatureEncoder: linear node / edge encoders
    # TODO(synk): FeatureEncoder assumed to use simple Linear node/edge encoders.
    h = linear(xp, params["enc_w"], params["enc_b"])                            # [Np, H]
    e_enc = linear(edge_attr_raw, params["edge_enc_w"], params["edge_enc_b"])   # [E, H]

    # TODO(synk): cfg.gnn.layers_pre_mp = 0, so GNNPreMP is not instantiated.

    # Dense real-edge features in [dst, feat, src] layout, built directly in bf16
    # (src stays lane-minor inside the attention kernel); real-edge mask in bf16.
    # TODO(synk): duplicate (dst, src) edges overwrite instead of accumulating;
    #             single-graph batch assumed (negate_edge_index is per-graph).
    # TODO(synk): for sparse graphs an edge-list (CSR + scalar-prefetch) kernel would
    #             replace this O(N^2*H) dense stream; dense full-graph path kept here.
    edge_dense = jnp.zeros((Np, H, Np), MM_DTYPE).at[dst, :, src].set(
        e_enc.astype(MM_DTYPE))
    rmask = jnp.zeros((Np, Np), MM_DTYPE).at[dst, src].set(1.0)

    # E_2 projection of the shared fake-edge embedding for ALL layers in one call.
    we2_cat = jnp.concatenate([lp["We2"] for lp in params["layers"]], axis=1)
    e2_all = linear(params["fake_edge_emb"], we2_cat)                           # [1, L*H]

    ffn_tile = _pick_tile(Np, 2048)

    for li, lp in enumerate(params["layers"]):
        # fused Q / Q2 / K / K2 / V projection: one [H, 5H] MXU pass (bias-free)
        w_all = jnp.concatenate(
            [lp["Wq"], lp["Wq2"], lp["Wk"], lp["Wk2"], lp["Wv"]], axis=1)
        qkv = linear(h, w_all)                                                  # [Np, 5H]
        q = qkv[:, :H]
        q2e = qkv[:, H:2 * H] * e2_all[:, li * H:(li + 1) * H]                  # Q2 * E2
        kT = qkv[:, 2 * H:3 * H].T                                              # [H, Np]
        k2T_hm = qkv[:, 3 * H:4 * H].T.reshape(nheads, dh, Np)                  # [nh, dh, Np]
        v = qkv[:, 4 * H:]

        q2e_hm = q2e.reshape(Np, nheads, dh).transpose(1, 0, 2)                 # [nh, Np, dh]
        v_hm = v.reshape(Np, nheads, dh).transpose(1, 0, 2)                     # [nh, Np, dh]

        vecs1 = jnp.stack([lp["bo"], lp["ln1_g"], lp["ln1_b"]])                 # [3, H]
        vecs2 = jnp.stack([lp["bff2"], lp["ln2_g"], lp["ln2_b"]])               # [3, H]

        # attention + W_O + residual + LayerNorm (one kernel; dst x src tiled grid)
        h = san_attention_block(q, kT, q2e_hm, k2T_hm, v_hm, edge_dense,
                                lp["We"].T, rmask, valid, h, lp["Wo"], vecs1,
                                nheads=nheads, gamma=gamma,
                                tile_dst=TD, tile_src=TS)
        # FFN + residual + LayerNorm (one kernel, large row tile)
        h = ffn_block(h, lp["Wff1"], lp["bff1"], lp["Wff2"], vecs2,
                      tile_rows=ffn_tile)

    # post_mp: GNN node head = single Linear(dim_inner, dim_out)
    out = linear(h, params["head_w"], params["head_b"])
    return out[:N]


# --------------------------------------------------------------------------
if __name__ == "__main__":
    N, DIM_IN, DIM_EDGE = 8, 4, 4
    HIDDEN, NHEADS, NLAYERS, DIM_OUT = 32, 4, 2, 3
    GAMMA = 0.1

    key = jax.random.PRNGKey(0)
    k_x, k_e, k_p = jax.random.split(key, 3)

    x = jax.random.normal(k_x, (N, DIM_IN), jnp.float32)
    # deterministic edge_index (src -> dst): ring + skip-3 edges
    src = jnp.array([i for i in range(N)] + [i for i in range(N)], jnp.int32)
    dst = jnp.array([(i + 1) % N for i in range(N)] + [(i + 3) % N for i in range(N)],
                    jnp.int32)
    edge_attr_raw = jax.random.normal(k_e, (src.shape[0], DIM_EDGE), jnp.float32)

    params = init_params(k_p, DIM_IN, DIM_EDGE, HIDDEN, NHEADS, NLAYERS, DIM_OUT)

    fwd = jax.jit(functools.partial(san_transformer_forward,
                                    nheads=NHEADS, gamma=GAMMA))
    out = jax.block_until_ready(fwd(x, edge_attr_raw, src, dst, params))
    assert out.shape == (N, DIM_OUT)
    assert bool(jnp.all(jnp.isfinite(out)))
    print("KERNEL_OK")
</pallas_src>

<mosaic_0001>
module attributes {stable_mosaic.version = 11 : i64} {
  func.func @_linear_kernel(%arg0: i32, %arg1: memref<8x4xf32, #tpu.memory_space<vmem>>, %arg2: memref<4x32xbf16, #tpu.memory_space<vmem>>, %arg3: memref<1x32xf32, #tpu.memory_space<vmem>>, %arg4: memref<8x32xf32, #tpu.memory_space<vmem>>) attributes {dimension_semantics = [#tpu.dimension_semantics<parallel>], iteration_bounds = array<i64: 1>, scalar_prefetch = 0 : i64, scratch_operands = 0 : i64, tpu.core_type = #tpu.core_type<tc>, window_params = [{transform_indices = @transform_0, window_bounds = array<i64: 8, 4>}, {pipeline_mode = #tpu.pipeline_mode<synchronous>, transform_indices = @transform_1, window_bounds = array<i64: 4, 32>}, {pipeline_mode = #tpu.pipeline_mode<synchronous>, transform_indices = @transform_2, window_bounds = array<i64: 1, 32>}, {transform_indices = @transform_3, window_bounds = array<i64: 8, 32>}]} {
    %c0 = arith.constant 0 : index
    %c0_0 = arith.constant 0 : index
    %0 = vector.load %arg1[%c0, %c0_0] : memref<8x4xf32, #tpu.memory_space<vmem>>, vector<8x4xf32>
    %1 = arith.truncf %0 : vector<8x4xf32> to vector<8x4xbf16>
    %c0_1 = arith.constant 0 : index
    %c0_2 = arith.constant 0 : index
    %2 = vector.load %arg2[%c0_1, %c0_2] : memref<4x32xbf16, #tpu.memory_space<vmem>>, vector<4x32xbf16>
    %cst = arith.constant dense<0.000000e+00> : vector<8x32xf32>
    %3 = tpu.matmul %1, %2, %cst {dimension_numbers = #tpu.dot_dimension_numbers<[1], [0], [0], [1], [0, 0, 1, 1], [], []>} : vector<8x4xbf16>, vector<4x32xbf16>, vector<8x32xf32> -> vector<8x32xf32>
    %c0_3 = arith.constant 0 : index
    %c0_4 = arith.constant 0 : index
    %4 = vector.load %arg3[%c0_3, %c0_4] : memref<1x32xf32, #tpu.memory_space<vmem>>, vector<1x32xf32>
    %5 = vector.broadcast %4 : vector<1x32xf32> to vector<8x32xf32>
    %6 = arith.addf %3, %5 : vector<8x32xf32>
    %c0_5 = arith.constant 0 : index
    %c0_6 = arith.constant 0 : index
    %7 = vector.load %arg4[%c0_5, %c0_6] : memref<8x32xf32, #tpu.memory_space<vmem>>, vector<8x32xf32>
    tpu.vector_store %arg4[%c0_5, %c0_6], %6 {strides = array<i32>} : memref<8x32xf32, #tpu.memory_space<vmem>>, vector<8x32xf32>,
    return
  }
  func.func @transform_0(%arg0: i32) -> (i32, i32) {
    %c0_i32 = arith.constant 0 : i32
    %c0_i32_0 = arith.constant 0 : i32
    return %arg0, %c0_i32 : i32, i32
  }
  func.func @transform_1(%arg0: i32) -> (i32, i32) {
    %c0_i32 = arith.constant 0 : i32
    %c0_i32_0 = arith.constant 0 : i32
    %c0_i32_1 = arith.constant 0 : i32
    return %c0_i32, %c0_i32_0 : i32, i32
  }
  func.func @transform_2(%arg0: i32) -> (i32, i32) {
    %c0_i32 = arith.constant 0 : i32
    %c0_i32_0 = arith.constant 0 : i32
    %c0_i32_1 = arith.constant 0 : i32
    return %c0_i32, %c0_i32_0 : i32, i32
  }
  func.func @transform_3(%arg0: i32) -> (i32, i32) {
    %c0_i32 = arith.constant 0 : i32
    %c0_i32_0 = arith.constant 0 : i32
    return %arg0, %c0_i32 : i32, i32
  }
}

module attributes {stable_mosaic.version = 11 : i64} {
  func.func @_linear_kernel(%arg0: i32, %arg1: memref<8x32xf32, #tpu.memory_space<vmem>>, %arg2: memref<32x160xbf16, #tpu.memory_space<vmem>>, %arg3: memref<1x160xf32, #tpu.memory_space<vmem>>, %arg4: memref<8x160xf32, #tpu.memory_space<vmem>>) attributes {dimension_semantics = [#tpu.dimension_semantics<parallel>], iteration_bounds = array<i64: 1>, scalar_prefetch = 0 : i64, scratch_operands = 0 : i64, tpu.core_type = #tpu.core_type<tc>, window_params = [{transform_indices = @transform_0, window_bounds = array<i64: 8, 32>}, {pipeline_mode = #tpu.pipeline_mode<synchronous>, transform_indices = @transform_1, window_bounds = array<i64: 32, 160>}, {pipeline_mode = #tpu.pipeline_mode<synchronous>, transform_indices = @transform_2, window_bounds = array<i64: 1, 160>}, {transform_indices = @transform_3, window_bounds = array<i64: 8, 160>}]} {
    %c0 = arith.constant 0 : index
    %c0_0 = arith.constant 0 : index
    %0 = vector.load %arg1[%c0, %c0_0] : memref<8x32xf32, #tpu.memory_space<vmem>>, vector<8x32xf32>
    %1 = arith.truncf %0 : vector<8x32xf32> to vector<8x32xbf16>
    %c0_1 = arith.constant 0 : index
    %c0_2 = arith.constant 0 : index
    %2 = vector.load %arg2[%c0_1, %c0_2] : memref<32x160xbf16, #tpu.memory_space<vmem>>, vector<32x160xbf16>
    %cst = arith.constant dense<0.000000e+00> : vector<8x160xf32>
    %3 = tpu.matmul %1, %2, %cst {dimension_numbers = #tpu.dot_dimension_numbers<[1], [0], [0], [1], [0, 0, 1, 1], [], []>} : vector<8x32xbf16>, vector<32x160xbf16>, vector<8x160xf32> -> vector<8x160xf32>
    %c0_3 = arith.constant 0 : index
    %c0_4 = arith.constant 0 : index
    %4 = vector.load %arg3[%c0_3, %c0_4] : memref<1x160xf32, #tpu.memory_space<vmem>>, vector<1x160xf32>
    %5 = vector.broadcast %4 : vector<1x160xf32> to vector<8x160xf32>
    %6 = arith.addf %3, %5 : vector<8x160xf32>
    %c0_5 = arith.constant 0 : index
    %c0_6 = arith.constant 0 : index
    %7 = vector.load %arg4[%c0_5, %c0_6] : memref<8x160xf32, #tpu.memory_space<vmem>>, vector<8x160xf32>
    tpu.vector_store %arg4[%c0_5, %c0_6], %6 {strides = array<i32>} : memref<8x160xf32, #tpu.memory_space<vmem>>, vector<8x160xf32>,
    return
  }
  func.func @transform_0(%arg0: i32) -> (i32, i32) {
    %c0_i32 = arith.constant 0 : i32
    %c0_i32_0 = arith.constant 0 : i32
    return %arg0, %c0_i32 : i32, i32
  }
  func.func @transform_1(%arg0: i32) -> (i32, i32) {
    %c0_i32 = arith.constant 0 : i32
    %c0_i32_0 = arith.constant 0 : i32
    %c0_i32_1 = arith.constant 0 : i32
    return %c0_i32, %c0_i32_0 : i32, i32
  }
  func.func @transform_2(%arg0: i32) -> (i32, i32) {
    %c0_i32 = arith.constant 0 : i32
    %c0_i32_0 = arith.constant 0 : i32
    %c0_i32_1 = arith.constant 0 : i32
    return %c0_i32, %c0_i32_0 : i32, i32
  }
  func.func @transform_3(%arg0: i32) -> (i32, i32) {
    %c0_i32 = arith.constant 0 : i32
    %c0_i32_0 = arith.constant 0 : i32
    return %arg0, %c0_i32 : i32, i32
  }
}

module attributes {stable_mosaic.version = 11 : i64} {
  func.func @_linear_kernel(%arg0: i32, %arg1: memref<8x32xf32, #tpu.memory_space<vmem>>, %arg2: memref<32x64xbf16, #tpu.memory_space<vmem>>, %arg3: memref<1x64xf32, #tpu.memory_space<vmem>>, %arg4: memref<8x64xf32, #tpu.memory_space<vmem>>) attributes {dimension_semantics = [#tpu.dimension_semantics<parallel>], iteration_bounds = array<i64: 1>, scalar_prefetch = 0 : i64, scratch_operands = 0 : i64, tpu.core_type = #tpu.core_type<tc>, window_params = [{transform_indices = @transform_0, window_bounds = array<i64: 8, 32>}, {pipeline_mode = #tpu.pipeline_mode<synchronous>, transform_indices = @transform_1, window_bounds = array<i64: 32, 64>}, {pipeline_mode = #tpu.pipeline_mode<synchronous>, transform_indices = @transform_2, window_bounds = array<i64: 1, 64>}, {transform_indices = @transform_3, window_bounds = array<i64: 8, 64>}]} {
    %c0 = arith.constant 0 : index
    %c0_0 = arith.constant 0 : index
    %0 = vector.load %arg1[%c0, %c0_0] : memref<8x32xf32, #tpu.memory_space<vmem>>, vector<8x32xf32>
    %1 = arith.truncf %0 : vector<8x32xf32> to vector<8x32xbf16>
    %c0_1 = arith.constant 0 : index
    %c0_2 = arith.constant 0 : index
    %2 = vector.load %arg2[%c0_1, %c0_2] : memref<32x64xbf16, #tpu.memory_space<vmem>>, vector<32x64xbf16>
    %cst = arith.constant dense<0.000000e+00> : vector<8x64xf32>
    %3 = tpu.matmul %1, %2, %cst {dimension_numbers = #tpu.dot_dimension_numbers<[1], [0], [0], [1], [0, 0, 1, 1], [], []>} : vector<8x32xbf16>, vector<32x64xbf16>, vector<8x64xf32> -> vector<8x64xf32>
    %c0_3 = arith.constant 0 : index
    %c0_4 = arith.constant 0 : index
    %4 = vector.load %arg3[%c0_3, %c0_4] : memref<1x64xf32, #tpu.memory_space<vmem>>, vector<1x64xf32>
    %5 = vector.broadcast %4 : vector<1x64xf32> to vector<8x64xf32>
    %6 = arith.addf %3, %5 : vector<8x64xf32>
    %c0_5 = arith.constant 0 : index
    %c0_6 = arith.constant 0 : index
    %7 = vector.load %arg4[%c0_5, %c0_6] : memref<8x64xf32, #tpu.memory_space<vmem>>, vector<8x64xf32>
    tpu.vector_store %arg4[%c0_5, %c0_6], %6 {strides = array<i32>} : memref<8x64xf32, #tpu.memory_space<vmem>>, vector<8x64xf32>,
    return
  }
  func.func @transform_0(%arg0: i32) -> (i32, i32) {
    %c0_i32 = arith.constant 0 : i32
    %c0_i32_0 = arith.constant 0 : i32
    return %arg0, %c0_i32 : i32, i32
  }
  func.func @transform_1(%arg0: i32) -> (i32, i32) {
    %c0_i32 = arith.constant 0 : i32
    %c0_i32_0 = arith.constant 0 : i32
    %c0_i32_1 = arith.constant 0 : i32
    return %c0_i32, %c0_i32_0 : i32, i32
  }
  func.func @transform_2(%arg0: i32) -> (i32, i32) {
    %c0_i32 = arith.constant 0 : i32
    %c0_i32_0 = arith.constant 0 : i32
    %c0_i32_1 = arith.constant 0 : i32
    return %c0_i32, %c0_i32_0 : i32, i32
  }
  func.func @transform_3(%arg0: i32) -> (i32, i32) {
    %c0_i32 = arith.constant 0 : i32
    %c0_i32_0 = arith.constant 0 : i32
    return %arg0, %c0_i32 : i32, i32
  }
}

module attributes {stable_mosaic.version = 11 : i64} {
  func.func @_linear_kernel(%arg0: i32, %arg1: memref<16x4xf32, #tpu.memory_space<vmem>>, %arg2: memref<4x32xbf16, #tpu.memory_space<vmem>>, %arg3: memref<1x32xf32, #tpu.memory_space<vmem>>, %arg4: memref<16x32xf32, #tpu.memory_space<vmem>>) attributes {dimension_semantics = [#tpu.dimension_semantics<parallel>], iteration_bounds = array<i64: 1>, scalar_prefetch = 0 : i64, scratch_operands = 0 : i64, tpu.core_type = #tpu.core_type<tc>, window_params = [{transform_indices = @transform_0, window_bounds = array<i64: 16, 4>}, {pipeline_mode = #tpu.pipeline_mode<synchronous>, transform_indices = @transform_1, window_bounds = array<i64: 4, 32>}, {pipeline_mode = #tpu.pipeline_mode<synchronous>, transform_indices = @transform_2, window_bounds = array<i64: 1, 32>}, {transform_indices = @transform_3, window_bounds = array<i64: 16, 32>}]} {
    %c0 = arith.constant 0 : index
    %c0_0 = arith.constant 0 : index
    %0 = vector.load %arg1[%c0, %c0_0] : memref<16x4xf32, #tpu.memory_space<vmem>>, vector<16x4xf32>
    %1 = arith.truncf %0 : vector<16x4xf32> to vector<16x4xbf16>
    %c0_1 = arith.constant 0 : index
    %c0_2 = arith.constant 0 : index
    %2 = vector.load %arg2[%c0_1, %c0_2] : memref<4x32xbf16, #tpu.memory_space<vmem>>, vector<4x32xbf16>
    %cst = arith.constant dense<0.000000e+00> : vector<16x32xf32>
    %3 = tpu.matmul %1, %2, %cst {dimension_numbers = #tpu.dot_dimension_numbers<[1], [0], [0], [1], [0, 0, 1, 1], [], []>} : vector<16x4xbf16>, vector<4x32xbf16>, vector<16x32xf32> -> vector<16x32xf32>
    %c0_3 = arith.constant 0 : index
    %c0_4 = arith.constant 0 : index
    %4 = vector.load %arg3[%c0_3, %c0_4] : memref<1x32xf32, #tpu.memory_space<vmem>>, vector<1x32xf32>
    %5 = vector.broadcast %4 : vector<1x32xf32> to vector<16x32xf32>
    %6 = arith.addf %3, %5 : vector<16x32xf32>
    %c0_5 = arith.constant 0 : index
    %c0_6 = arith.constant 0 : index
    %7 = vector.load %arg4[%c0_5, %c0_6] : memref<16x32xf32, #tpu.memory_space<vmem>>, vector<16x32xf32>
    tpu.vector_store %arg4[%c0_5, %c0_6], %6 {strides = array<i32>} : memref<16x32xf32, #tpu.memory_space<vmem>>, vector<16x32xf32>,
    return
  }
  func.func @transform_0(%arg0: i32) -> (i32, i32) {
    %c0_i32 = arith.constant 0 : i32
    %c0_i32_0 = arith.constant 0 : i32
    return %arg0, %c0_i32 : i32, i32
  }
  func.func @transform_1(%arg0: i32) -> (i32, i32) {
    %c0_i32 = arith.constant 0 : i32
    %c0_i32_0 = arith.constant 0 : i32
    %c0_i32_1 = arith.constant 0 : i32
    return %c0_i32, %c0_i32_0 : i32, i32
  }
  func.func @transform_2(%arg0: i32) -> (i32, i32) {
    %c0_i32 = arith.constant 0 : i32
    %c0_i32_0 = arith.constant 0 : i32
    %c0_i32_1 = arith.constant 0 : i32
    return %c0_i32, %c0_i32_0 : i32, i32
  }
  func.func @transform_3(%arg0: i32) -> (i32, i32) {
    %c0_i32 = arith.constant 0 : i32
    %c0_i32_0 = arith.constant 0 : i32
    return %arg0, %c0_i32 : i32, i32
  }
}

module attributes {stable_mosaic.version = 11 : i64} {
  func.func @_san_attn_kernel(%arg0: i32, %arg1: i32, %arg2: memref<8x32xf32, #tpu.memory_space<vmem>>, %arg3: memref<32x8xf32, #tpu.memory_space<vmem>>, %arg4: memref<4x8x8xf32, #tpu.memory_space<vmem>>, %arg5: memref<4x8x8xf32, #tpu.memory_space<vmem>>, %arg6: memref<4x8x8xbf16, #tpu.memory_space<vmem>>, %arg7: memref<8x32x8xbf16, #tpu.memory_space<vmem>>, %arg8: memref<32x32xbf16, #tpu.memory_space<vmem>>, %arg9: memref<8x8xbf16, #tpu.memory_space<vmem>>, %arg10: memref<1x8xf32, #tpu.memory_space<vmem>>, %arg11: memref<8x32xf32, #tpu.memory_space<vmem>>, %arg12: memref<32x32xbf16, #tpu.memory_space<vmem>>, %arg13: memref<3x32xf32, #tpu.memory_space<vmem>>, %arg14: memref<8x32xf32, #tpu.memory_space<vmem>>, %arg15: memref<8x32xf32, #tpu.memory_space<vmem>>, %arg16: memref<8x4xf32, #tpu.memory_space<vmem>>) attributes {dimension_semantics = [#tpu.dimension_semantics<parallel>, #tpu.dimension_semantics<arbitrary>], iteration_bounds = array<i64: 1, 1>, scalar_prefetch = 0 : i64, scratch_operands = 2 : i64, tpu.core_type = #tpu.core_type<tc>, window_params = [{transform_indices = @transform_0, window_bounds = array<i64: 8, 32>}, {transform_indices = @transform_1, window_bounds = array<i64: 32, 8>}, {transform_indices = @transform_2, window_bounds = array<i64: 4, 8, 8>}, {transform_indices = @transform_3, window_bounds = array<i64: 4, 8, 8>}, {transform_indices = @transform_4, window_bounds = array<i64: 4, 8, 8>}, {transform_indices = @transform_5, window_bounds = array<i64: 8, 32, 8>}, {pipeline_mode = #tpu.pipeline_mode<synchronous>, transform_indices = @transform_6, window_bounds = array<i64: 32, 32>}, {transform_indices = @transform_7, window_bounds = array<i64: 8, 8>}, {transform_indices = @transform_8, window_bounds = array<i64: 1, 8>}, {transform_indices = @transform_9, window_bounds = array<i64: 8, 32>}, {pipeline_mode = #tpu.pipeline_mode<synchronous>, transform_indices = @transform_10, window_bounds = array<i64: 32, 32>}, {pipeline_mode = #tpu.pipeline_mode<synchronous>, transform_indices = @transform_11, window_bounds = array<i64: 3, 32>}, {transform_indices = @transform_12, window_bounds = array<i64: 8, 32>}]} {
    %c0_i32 = arith.constant 0 : i32
    %0 = arith.cmpi eq, %arg1, %c0_i32 : i32
    %1 = arith.extui %0 : i1 to i32
    %c0_i32_0 = arith.constant 0 : i32
    %2 = arith.cmpi ne, %1, %c0_i32_0 : i32
    scf.if %2 {
      %cst_83 = arith.constant 0.000000e+00 : f32
      %196 = vector.broadcast %cst_83 : f32 to vector<8x32xf32>
      %c0_84 = arith.constant 0 : index
      %c0_85 = arith.constant 0 : index
      %197 = vector.load %arg15[%c0_84, %c0_85] : memref<8x32xf32, #tpu.memory_space<vmem>>, vector<8x32xf32>
      tpu.vector_store %arg15[%c0_84, %c0_85], %196 {strides = array<i32>} : memref<8x32xf32, #tpu.memory_space<vmem>>, vector<8x32xf32>,
      %cst_86 = arith.constant 0.000000e+00 : f32
      %198 = vector.broadcast %cst_86 : f32 to vector<8x4xf32>
      %c0_87 = arith.constant 0 : index
      %c0_88 = arith.constant 0 : index
      %199 = vector.load %arg16[%c0_87, %c0_88] : memref<8x4xf32, #tpu.memory_space<vmem>>, vector<8x4xf32>
      tpu.vector_store %arg16[%c0_87, %c0_88], %198 {strides = array<i32>} : memref<8x4xf32, #tpu.memory_space<vmem>>, vector<8x4xf32>,
    } else {
    }
    %c0 = arith.constant 0 : index
    %c0_1 = arith.constant 0 : index
    %3 = vector.load %arg9[%c0, %c0_1] : memref<8x8xbf16, #tpu.memory_space<vmem>>, vector<8x8xbf16>
    %4 = arith.extf %3 : vector<8x8xbf16> to vector<8x8xf32>
    %c8_i32 = arith.constant 8 : i32
    %5 = arith.muli %arg0, %c8_i32 : i32
    %6 = tpu.iota {dimensions = array<i32: 0>} : vector<8x8xi32>
    %7 = vector.broadcast %5 : i32 to vector<8x8xi32>
    %8 = arith.addi %7, %6 : vector<8x8xi32>
    %c8_i32_2 = arith.constant 8 : i32
    %9 = arith.muli %arg1, %c8_i32_2 : i32
    %10 = tpu.iota {dimensions = array<i32: 1>} : vector<8x8xi32>
    %11 = vector.broadcast %9 : i32 to vector<8x8xi32>
    %12 = arith.addi %11, %10 : vector<8x8xi32>
    %13 = arith.cmpi eq, %8, %12 : vector<8x8xi32>
    %14 = arith.extui %13 : vector<8x8xi1> to vector<8x8xi32>
    %15 = arith.sitofp %14 : vector<8x8xi32> to vector<8x8xf32>
    %c0_3 = arith.constant 0 : index
    %c0_4 = arith.constant 0 : index
    %16 = vector.load %arg10[%c0_3, %c0_4] : memref<1x8xf32, #tpu.memory_space<vmem>>, vector<1x8xf32>
    %17 = vector.broadcast %16 : vector<1x8xf32> to vector<8x8xf32>
    %18 = arith.subf %17, %4 : vector<8x8xf32>
    %19 = arith.subf %18, %15 : vector<8x8xf32>
    %cst = arith.constant 0.000000e+00 : f32
    %cst_5 = arith.constant 1.000000e+00 : f32
    %20 = vector.broadcast %cst : f32 to vector<8x8xf32>
    %21 = arith.maximumf %20, %19 : vector<8x8xf32>
    %22 = vector.broadcast %cst_5 : f32 to vector<8x8xf32>
    %23 = arith.minimumf %22, %21 : vector<8x8xf32>
    %c0_6 = arith.constant 0 : index
    %c0_7 = arith.constant 0 : index
    %24 = vector.load %arg8[%c0_6, %c0_7] : memref<32x32xbf16, #tpu.memory_space<vmem>>, vector<32x32xbf16>
    %25 = vector.shape_cast %24 : vector<32x32xbf16> to vector<1x32x32xbf16>
    %26 = vector.shape_cast %25 : vector<1x32x32xbf16> to vector<1x32x32xbf16>
    %27 = vector.broadcast %26 : vector<1x32x32xbf16> to vector<8x32x32xbf16>
    %c0_8 = arith.constant 0 : index
    %c0_9 = arith.constant 0 : index
    %c0_10 = arith.constant 0 : index
    %28 = vector.load %arg7[%c0_8, %c0_9, %c0_10] : memref<8x32x8xbf16, #tpu.memory_space<vmem>>, vector<8x32x8xbf16>
    %cst_11 = arith.constant dense<0.000000e+00> : vector<8x32x8xf32>
    %29 = tpu.matmul %27, %28, %cst_11 {dimension_numbers = #tpu.dot_dimension_numbers<[2], [1], [1], [2], [0, 0, 0, 1, 1, 2], [0], [0]>} : vector<8x32x32xbf16>, vector<8x32x8xbf16>, vector<8x32x8xf32> -> vector<8x32x8xf32>
    %c0_12 = arith.constant 0 : index
    %c0_13 = arith.constant 0 : index
    %c0_14 = arith.constant 0 : index
    %30 = vector.load %arg4[%c0_12, %c0_13, %c0_14] : memref<4x8x8xf32, #tpu.memory_space<vmem>>, vector<4x8x8xf32>
    %c0_15 = arith.constant 0 : index
    %c0_16 = arith.constant 0 : index
    %c0_17 = arith.constant 0 : index
    %31 = vector.load %arg5[%c0_15, %c0_16, %c0_17] : memref<4x8x8xf32, #tpu.memory_space<vmem>>, vector<4x8x8xf32>
    %cst_18 = arith.constant dense<0.000000e+00> : vector<4x8x8xf32>
    %32 = tpu.matmul %30, %31, %cst_18 {dimension_numbers = #tpu.dot_dimension_numbers<[2], [1], [1], [2], [0, 0, 0, 1, 1, 2], [0], [0]>} : vector<4x8x8xf32>, vector<4x8x8xf32>, vector<4x8x8xf32> -> vector<4x8x8xf32>
    %cst_19 = arith.constant 0.353553385 : f32
    %33 = vector.broadcast %cst_19 : f32 to vector<4x8x8xf32>
    %34 = arith.mulf %32, %33 : vector<4x8x8xf32>
    %c0_20 = arith.constant 0 : index
    %c0_21 = arith.constant 0 : index
    %35 = vector.load %arg2[%c0_20, %c0_21] : memref<8x32xf32, #tpu.memory_space<vmem>>, vector<8x32xf32>
    %c0_22 = arith.constant 0 : index
    %c0_23 = arith.constant 0 : index
    %36 = vector.load %arg3[%c0_22, %c0_23] : memref<32x8xf32, #tpu.memory_space<vmem>>, vector<32x8xf32>
    %37 = vector.extract_strided_slice %35 {offsets = [0, 0], sizes = [8, 8], strides = [1, 1]} : vector<8x32xf32> to vector<8x8xf32>
    %38 = vector.shape_cast %37 : vector<8x8xf32> to vector<8x8x1xf32>
    %39 = vector.extract_strided_slice %36 {offsets = [0, 0], sizes = [8, 8], strides = [1, 1]} : vector<32x8xf32> to vector<8x8xf32>
    %40 = vector.shape_cast %39 : vector<8x8xf32> to vector<1x8x8xf32>
    %41 = vector.broadcast %38 : vector<8x8x1xf32> to vector<8x8x8xf32>
    %42 = vector.broadcast %40 : vector<1x8x8xf32> to vector<8x8x8xf32>
    %43 = arith.mulf %41, %42 : vector<8x8x8xf32>
    %44 = vector.extract_strided_slice %29 {offsets = [0, 0, 0], sizes = [8, 8, 8], strides = [1, 1, 1]} : vector<8x32x8xf32> to vector<8x8x8xf32>
    %45 = arith.mulf %43, %44 : vector<8x8x8xf32>
    %cst_24 = arith.constant dense<0.000000e+00> : vector<8x8xf32>
    %46 = vector.multi_reduction <add>, %45, %cst_24 [1] : vector<8x8x8xf32> to vector<8x8xf32>
    %cst_25 = arith.constant 0.353553385 : f32
    %47 = vector.broadcast %cst_25 : f32 to vector<8x8xf32>
    %48 = arith.mulf %46, %47 : vector<8x8xf32>
    %cst_26 = arith.constant -5.000000e+00 : f32
    %cst_27 = arith.constant 5.000000e+00 : f32
    %49 = vector.broadcast %cst_26 : f32 to vector<8x8xf32>
    %50 = arith.maximumf %49, %48 : vector<8x8xf32>
    %51 = vector.broadcast %cst_27 : f32 to vector<8x8xf32>
    %52 = arith.minimumf %51, %50 : vector<8x8xf32>
    %53 = math.exp %52 : vector<8x8xf32>
    %54 = arith.mulf %53, %4 : vector<8x8xf32>
    %cst_28 = arith.constant 0.909090936 : f32
    %55 = vector.broadcast %cst_28 : f32 to vector<8x8xf32>
    %56 = arith.mulf %54, %55 : vector<8x8xf32>
    %57 = vector.extract_strided_slice %34 {offsets = [0, 0, 0], sizes = [1, 8, 8], strides = [1, 1, 1]} : vector<4x8x8xf32> to vector<1x8x8xf32>
    %58 = vector.shape_cast %57 : vector<1x8x8xf32> to vector<8x8xf32>
    %cst_29 = arith.constant -5.000000e+00 : f32
    %cst_30 = arith.constant 5.000000e+00 : f32
    %59 = vector.broadcast %cst_29 : f32 to vector<8x8xf32>
    %60 = arith.maximumf %59, %58 : vector<8x8xf32>
    %61 = vector.broadcast %cst_30 : f32 to vector<8x8xf32>
    %62 = arith.minimumf %61, %60 : vector<8x8xf32>
    %63 = math.exp %62 : vector<8x8xf32>
    %64 = arith.mulf %63, %23 : vector<8x8xf32>
    %cst_31 = arith.constant 0.0909090936 : f32
    %65 = vector.broadcast %cst_31 : f32 to vector<8x8xf32>
    %66 = arith.mulf %64, %65 : vector<8x8xf32>
    %67 = arith.addf %56, %66 : vector<8x8xf32>
    %cst_32 = arith.constant dense<0.000000e+00> : vector<8xf32>
    %68 = vector.multi_reduction <add>, %67, %cst_32 [1] : vector<8x8xf32> to vector<8xf32>
    %69 = vector.shape_cast %68 : vector<8xf32> to vector<8x1xf32>
    %70 = arith.truncf %67 : vector<8x8xf32> to vector<8x8xbf16>
    %c0_33 = arith.constant 0 : index
    %c0_34 = arith.constant 0 : index
    %c0_35 = arith.constant 0 : index
    %71 = vector.load %arg6[%c0_33, %c0_34, %c0_35] : memref<4x8x8xbf16, #tpu.memory_space<vmem>>, vector<1x8x8xbf16>
    %72 = vector.shape_cast %71 : vector<1x8x8xbf16> to vector<8x8xbf16>
    %cst_36 = arith.constant dense<0.000000e+00> : vector<8x8xf32>
    %73 = tpu.matmul %70, %72, %cst_36 {dimension_numbers = #tpu.dot_dimension_numbers<[1], [0], [0], [1], [0, 0, 1, 1], [], []>} : vector<8x8xbf16>, vector<8x8xbf16>, vector<8x8xf32> -> vector<8x8xf32>
    %74 = vector.extract_strided_slice %35 {offsets = [0, 8], sizes = [8, 8], strides = [1, 1]} : vector<8x32xf32> to vector<8x8xf32>
    %75 = vector.shape_cast %74 : vector<8x8xf32> to vector<8x8x1xf32>
    %76 = vector.extract_strided_slice %36 {offsets = [8, 0], sizes = [8, 8], strides = [1, 1]} : vector<32x8xf32> to vector<8x8xf32>
    %77 = vector.shape_cast %76 : vector<8x8xf32> to vector<1x8x8xf32>
    %78 = vector.broadcast %75 : vector<8x8x1xf32> to vector<8x8x8xf32>
    %79 = vector.broadcast %77 : vector<1x8x8xf32> to vector<8x8x8xf32>
    %80 = arith.mulf %78, %79 : vector<8x8x8xf32>
    %81 = vector.extract_strided_slice %29 {offsets = [0, 8, 0], sizes = [8, 8, 8], strides = [1, 1, 1]} : vector<8x32x8xf32> to vector<8x8x8xf32>
    %82 = arith.mulf %80, %81 : vector<8x8x8xf32>
    %cst_37 = arith.constant dense<0.000000e+00> : vector<8x8xf32>
    %83 = vector.multi_reduction <add>, %82, %cst_37 [1] : vector<8x8x8xf32> to vector<8x8xf32>
    %cst_38 = arith.constant 0.353553385 : f32
    %84 = vector.broadcast %cst_38 : f32 to vector<8x8xf32>
    %85 = arith.mulf %83, %84 : vector<8x8xf32>
    %cst_39 = arith.constant -5.000000e+00 : f32
    %cst_40 = arith.constant 5.000000e+00 : f32
    %86 = vector.broadcast %cst_39 : f32 to vector<8x8xf32>
    %87 = arith.maximumf %86, %85 : vector<8x8xf32>
    %88 = vector.broadcast %cst_40 : f32 to vector<8x8xf32>
    %89 = arith.minimumf %88, %87 : vector<8x8xf32>
    %90 = math.exp %89 : vector<8x8xf32>
    %91 = arith.mulf %90, %4 : vector<8x8xf32>
    %cst_41 = arith.constant 0.909090936 : f32
    %92 = vector.broadcast %cst_41 : f32 to vector<8x8xf32>
    %93 = arith.mulf %91, %92 : vector<8x8xf32>
    %94 = vector.extract_strided_slice %34 {offsets = [1, 0, 0], sizes = [1, 8, 8], strides = [1, 1, 1]} : vector<4x8x8xf32> to vector<1x8x8xf32>
    %95 = vector.shape_cast %94 : vector<1x8x8xf32> to vector<8x8xf32>
    %cst_42 = arith.constant -5.000000e+00 : f32
    %cst_43 = arith.constant 5.000000e+00 : f32
    %96 = vector.broadcast %cst_42 : f32 to vector<8x8xf32>
    %97 = arith.maximumf %96, %95 : vector<8x8xf32>
    %98 = vector.broadcast %cst_43 : f32 to vector<8x8xf32>
    %99 = arith.minimumf %98, %97 : vector<8x8xf32>
    %100 = math.exp %99 : vector<8x8xf32>
    %101 = arith.mulf %100, %23 : vector<8x8xf32>
    %cst_44 = arith.constant 0.0909090936 : f32
    %102 = vector.broadcast %cst_44 : f32 to vector<8x8xf32>
    %103 = arith.mulf %101, %102 : vector<8x8xf32>
    %104 = arith.addf %93, %103 : vector<8x8xf32>
    %cst_45 = arith.constant dense<0.000000e+00> : vector<8xf32>
    %105 = vector.multi_reduction <add>, %104, %cst_45 [1] : vector<8x8xf32> to vector<8xf32>
    %106 = vector.shape_cast %105 : vector<8xf32> to vector<8x1xf32>
    %107 = arith.truncf %104 : vector<8x8xf32> to vector<8x8xbf16>
    %c1 = arith.constant 1 : index
    %c0_46 = arith.constant 0 : index
    %c0_47 = arith.constant 0 : index
    %108 = vector.load %arg6[%c1, %c0_46, %c0_47] : memref<4x8x8xbf16, #tpu.memory_space<vmem>>, vector<1x8x8xbf16>
    %109 = vector.shape_cast %108 : vector<1x8x8xbf16> to vector<8x8xbf16>
    %cst_48 = arith.constant dense<0.000000e+00> : vector<8x8xf32>
    %110 = tpu.matmul %107, %109, %cst_48 {dimension_numbers = #tpu.dot_dimension_numbers<[1], [0], [0], [1], [0, 0, 1, 1], [], []>} : vector<8x8xbf16>, vector<8x8xbf16>, vector<8x8xf32> -> vector<8x8xf32>
    %111 = vector.extract_strided_slice %35 {offsets = [0, 16], sizes = [8, 8], strides = [1, 1]} : vector<8x32xf32> to vector<8x8xf32>
    %112 = vector.shape_cast %111 : vector<8x8xf32> to vector<8x8x1xf32>
    %113 = vector.extract_strided_slice %36 {offsets = [16, 0], sizes = [8, 8], strides = [1, 1]} : vector<32x8xf32> to vector<8x8xf32>
    %114 = vector.shape_cast %113 : vector<8x8xf32> to vector<1x8x8xf32>
    %115 = vector.broadcast %112 : vector<8x8x1xf32> to vector<8x8x8xf32>
    %116 = vector.broadcast %114 : vector<1x8x8xf32> to vector<8x8x8xf32>
    %117 = arith.mulf %115, %116 : vector<8x8x8xf32>
    %118 = vector.extract_strided_slice %29 {offsets = [0, 16, 0], sizes = [8, 8, 8], strides = [1, 1, 1]} : vector<8x32x8xf32> to vector<8x8x8xf32>
    %119 = arith.mulf %117, %118 : vector<8x8x8xf32>
    %cst_49 = arith.constant dense<0.000000e+00> : vector<8x8xf32>
    %120 = vector.multi_reduction <add>, %119, %cst_49 [1] : vector<8x8x8xf32> to vector<8x8xf32>
    %cst_50 = arith.constant 0.353553385 : f32
    %121 = vector.broadcast %cst_50 : f32 to vector<8x8xf32>
    %122 = arith.mulf %120, %121 : vector<8x8xf32>
    %cst_51 = arith.constant -5.000000e+00 : f32
    %cst_52 = arith.constant 5.000000e+00 : f32
    %123 = vector.broadcast %cst_51 : f32 to vector<8x8xf32>
    %124 = arith.maximumf %123, %122 : vector<8x8xf32>
    %125 = vector.broadcast %cst_52 : f32 to vector<8x8xf32>
    %126 = arith.minimumf %125, %124 : vector<8x8xf32>
    %127 = math.exp %126 : vector<8x8xf32>
    %128 = arith.mulf %127, %4 : vector<8x8xf32>
    %cst_53 = arith.constant 0.909090936 : f32
    %129 = vector.broadcast %cst_53 : f32 to vector<8x8xf32>
    %130 = arith.mulf %128, %129 : vector<8x8xf32>
    %131 = vector.extract_strided_slice %34 {offsets = [2, 0, 0], sizes = [1, 8, 8], strides = [1, 1, 1]} : vector<4x8x8xf32> to vector<1x8x8xf32>
    %132 = vector.shape_cast %131 : vector<1x8x8xf32> to vector<8x8xf32>
    %cst_54 = arith.constant -5.000000e+00 : f32
    %cst_55 = arith.constant 5.000000e+00 : f32
    %133 = vector.broadcast %cst_54 : f32 to vector<8x8xf32>
    %134 = arith.maximumf %133, %132 : vector<8x8xf32>
    %135 = vector.broadcast %cst_55 : f32 to vector<8x8xf32>
    %136 = arith.minimumf %135, %134 : vector<8x8xf32>
    %137 = math.exp %136 : vector<8x8xf32>
    %138 = arith.mulf %137, %23 : vector<8x8xf32>
    %cst_56 = arith.constant 0.0909090936 : f32
    %139 = vector.broadcast %cst_56 : f32 to vector<8x8xf32>
    %140 = arith.mulf %138, %139 : vector<8x8xf32>
    %141 = arith.addf %130, %140 : vector<8x8xf32>
    %cst_57 = arith.constant dense<0.000000e+00> : vector<8xf32>
    %142 = vector.multi_reduction <add>, %141, %cst_57 [1] : vector<8x8xf32> to vector<8xf32>
    %143 = vector.shape_cast %142 : vector<8xf32> to vector<8x1xf32>
    %144 = arith.truncf %141 : vector<8x8xf32> to vector<8x8xbf16>
    %c2 = arith.constant 2 : index
    %c0_58 = arith.constant 0 : index
    %c0_59 = arith.constant 0 : index
    %145 = vector.load %arg6[%c2, %c0_58, %c0_59] : memref<4x8x8xbf16, #tpu.memory_space<vmem>>, vector<1x8x8xbf16>
    %146 = vector.shape_cast %145 : vector<1x8x8xbf16> to vector<8x8xbf16>
    %cst_60 = arith.constant dense<0.000000e+00> : vector<8x8xf32>
    %147 = tpu.matmul %144, %146, %cst_60 {dimension_numbers = #tpu.dot_dimension_numbers<[1], [0], [0], [1], [0, 0, 1, 1], [], []>} : vector<8x8xbf16>, vector<8x8xbf16>, vector<8x8xf32> -> vector<8x8xf32>
    %148 = vector.extract_strided_slice %35 {offsets = [0, 24], sizes = [8, 8], strides = [1, 1]} : vector<8x32xf32> to vector<8x8xf32>
    %149 = vector.shape_cast %148 : vector<8x8xf32> to vector<8x8x1xf32>
    %150 = vector.extract_strided_slice %36 {offsets = [24, 0], sizes = [8, 8], strides = [1, 1]} : vector<32x8xf32> to vector<8x8xf32>
    %151 = vector.shape_cast %150 : vector<8x8xf32> to vector<1x8x8xf32>
    %152 = vector.broadcast %149 : vector<8x8x1xf32> to vector<8x8x8xf32>
    %153 = vector.broadcast %151 : vector<1x8x8xf32> to vector<8x8x8xf32>
    %154 = arith.mulf %152, %153 : vector<8x8x8xf32>
    %155 = vector.extract_strided_slice %29 {offsets = [0, 24, 0], sizes = [8, 8, 8], strides = [1, 1, 1]} : vector<8x32x8xf32> to vector<8x8x8xf32>
    %156 = arith.mulf %154, %155 : vector<8x8x8xf32>
    %cst_61 = arith.constant dense<0.000000e+00> : vector<8x8xf32>
    %157 = vector.multi_reduction <add>, %156, %cst_61 [1] : vector<8x8x8xf32> to vector<8x8xf32>
    %cst_62 = arith.constant 0.353553385 : f32
    %158 = vector.broadcast %cst_62 : f32 to vector<8x8xf32>
    %159 = arith.mulf %157, %158 : vector<8x8xf32>
    %cst_63 = arith.constant -5.000000e+00 : f32
    %cst_64 = arith.constant 5.000000e+00 : f32
    %160 = vector.broadcast %cst_63 : f32 to vector<8x8xf32>
    %161 = arith.maximumf %160, %159 : vector<8x8xf32>
    %162 = vector.broadcast %cst_64 : f32 to vector<8x8xf32>
    %163 = arith.minimumf %162, %161 : vector<8x8xf32>
    %164 = math.exp %163 : vector<8x8xf32>
    %165 = arith.mulf %164, %4 : vector<8x8xf32>
    %cst_65 = arith.constant 0.909090936 : f32
    %166 = vector.broadcast %cst_65 : f32 to vector<8x8xf32>
    %167 = arith.mulf %165, %166 : vector<8x8xf32>
    %168 = vector.extract_strided_slice %34 {offsets = [3, 0, 0], sizes = [1, 8, 8], strides = [1, 1, 1]} : vector<4x8x8xf32> to vector<1x8x8xf32>
    %169 = vector.shape_cast %168 : vector<1x8x8xf32> to vector<8x8xf32>
    %cst_66 = arith.constant -5.000000e+00 : f32
    %cst_67 = arith.constant 5.000000e+00 : f32
    %170 = vector.broadcast %cst_66 : f32 to vector<8x8xf32>
    %171 = arith.maximumf %170, %169 : vector<8x8xf32>
    %172 = vector.broadcast %cst_67 : f32 to vector<8x8xf32>
    %173 = arith.minimumf %172, %171 : vector<8x8xf32>
    %174 = math.exp %173 : vector<8x8xf32>
    %175 = arith.mulf %174, %23 : vector<8x8xf32>
    %cst_68 = arith.constant 0.0909090936 : f32
    %176 = vector.broadcast %cst_68 : f32 to vector<8x8xf32>
    %177 = arith.mulf %175, %176 : vector<8x8xf32>
    %178 = arith.addf %167, %177 : vector<8x8xf32>
    %cst_69 = arith.constant dense<0.000000e+00> : vector<8xf32>
    %179 = vector.multi_reduction <add>, %178, %cst_69 [1] : vector<8x8xf32> to vector<8xf32>
    %180 = vector.shape_cast %179 : vector<8xf32> to vector<8x1xf32>
    %181 = arith.truncf %178 : vector<8x8xf32> to vector<8x8xbf16>
    %c3 = arith.constant 3 : index
    %c0_70 = arith.constant 0 : index
    %c0_71 = arith.constant 0 : index
    %182 = vector.load %arg6[%c3, %c0_70, %c0_71] : memref<4x8x8xbf16, #tpu.memory_space<vmem>>, vector<1x8x8xbf16>
    %183 = vector.shape_cast %182 : vector<1x8x8xbf16> to vector<8x8xbf16>
    %cst_72 = arith.constant dense<0.000000e+00> : vector<8x8xf32>
    %184 = tpu.matmul %181, %183, %cst_72 {dimension_numbers = #tpu.dot_dimension_numbers<[1], [0], [0], [1], [0, 0, 1, 1], [], []>} : vector<8x8xbf16>, vector<8x8xbf16>, vector<8x8xf32> -> vector<8x8xf32>
    %c0_73 = arith.constant 0 : index
    %c0_74 = arith.constant 0 : index
    %185 = vector.load %arg16[%c0_73, %c0_74] : memref<8x4xf32, #tpu.memory_space<vmem>>, vector<8x4xf32>
    %186 = tpu.concatenate %69, %106, %143, %180 in 1 : vector<8x1xf32>, vector<8x1xf32>, vector<8x1xf32>, vector<8x1xf32> -> vector<8x4xf32>
    %187 = arith.addf %185, %186 : vector<8x4xf32>
    %c0_75 = arith.constant 0 : index
    %c0_76 = arith.constant 0 : index
    %188 = vector.load %arg16[%c0_75, %c0_76] : memref<8x4xf32, #tpu.memory_space<vmem>>, vector<8x4xf32>
    tpu.vector_store %arg16[%c0_75, %c0_76], %187 {strides = array<i32>} : memref<8x4xf32, #tpu.memory_space<vmem>>, vector<8x4xf32>,
    %c0_77 = arith.constant 0 : index
    %c0_78 = arith.constant 0 : index
    %189 = vector.load %arg15[%c0_77, %c0_78] : memref<8x32xf32, #tpu.memory_space<vmem>>, vector<8x32xf32>
    %190 = tpu.concatenate %73, %110, %147, %184 in 1 : vector<8x8xf32>, vector<8x8xf32>, vector<8x8xf32>, vector<8x8xf32> -> vector<8x32xf32>
    %191 = arith.addf %189, %190 : vector<8x32xf32>
    %c0_79 = arith.constant 0 : index
    %c0_80 = arith.constant 0 : index
    %192 = vector.load %arg15[%c0_79, %c0_80] : memref<8x32xf32, #tpu.memory_space<vmem>>, vector<8x32xf32>
    tpu.vector_store %arg15[%c0_79, %c0_80], %191 {strides = array<i32>} : memref<8x32xf32, #tpu.memory_space<vmem>>, vector<8x32xf32>,
    %c0_i32_81 = arith.constant 0 : i32
    %193 = arith.cmpi eq, %arg1, %c0_i32_81 : i32
    %194 = arith.extui %193 : i1 to i32
    %c0_i32_82 = arith.constant 0 : i32
    %195 = arith.cmpi ne, %194, %c0_i32_82 : i32
    scf.if %195 {
      %c0_83 = arith.constant 0 : index
      %c0_84 = arith.constant 0 : index
      %196 = vector.load %arg16[%c0_83, %c0_84] : memref<8x4xf32, #tpu.memory_space<vmem>>, vector<8x4xf32>
      %cst_85 = arith.constant 9.99999997E-7 : f32
      %197 = vector.broadcast %cst_85 : f32 to vector<8x4xf32>
      %198 = arith.addf %196, %197 : vector<8x4xf32>
      %cst_86 = arith.constant 1.000000e+00 : f32
      %199 = vector.broadcast %cst_86 : f32 to vector<8x4xf32>
      %200 = arith.divf %199, %198 : vector<8x4xf32>
      %c0_87 = arith.constant 0 : index
      %c0_88 = arith.constant 0 : index
      %201 = vector.load %arg15[%c0_87, %c0_88] : memref<8x32xf32, #tpu.memory_space<vmem>>, vector<8x8xf32>
      %202 = vector.extract_strided_slice %200 {offsets = [0, 0], sizes = [8, 1], strides = [1, 1]} : vector<8x4xf32> to vector<8x1xf32>
      %203 = vector.broadcast %202 : vector<8x1xf32> to vector<8x8xf32>
      %204 = arith.mulf %201, %203 : vector<8x8xf32>
      %c0_89 = arith.constant 0 : index
      %c8 = arith.constant 8 : index
      %205 = vector.load %arg15[%c0_89, %c8] : memref<8x32xf32, #tpu.memory_space<vmem>>, vector<8x8xf32>
      %206 = vector.extract_strided_slice %200 {offsets = [0, 1], sizes = [8, 1], strides = [1, 1]} : vector<8x4xf32> to vector<8x1xf32>
      %207 = vector.broadcast %206 : vector<8x1xf32> to vector<8x8xf32>
      %208 = arith.mulf %205, %207 : vector<8x8xf32>
      %c0_90 = arith.constant 0 : index
      %c16 = arith.constant 16 : index
      %209 = vector.load %arg15[%c0_90, %c16] : memref<8x32xf32, #tpu.memory_space<vmem>>, vector<8x8xf32>
      %210 = vector.extract_strided_slice %200 {offsets = [0, 2], sizes = [8, 1], strides = [1, 1]} : vector<8x4xf32> to vector<8x1xf32>
      %211 = vector.broadcast %210 : vector<8x1xf32> to vector<8x8xf32>
      %212 = arith.mulf %209, %211 : vector<8x8xf32>
      %c0_91 = arith.constant 0 : index
      %c24 = arith.constant 24 : index
      %213 = vector.load %arg15[%c0_91, %c24] : memref<8x32xf32, #tpu.memory_space<vmem>>, vector<8x8xf32>
      %214 = vector.extract_strided_slice %200 {offsets = [0, 3], sizes = [8, 1], strides = [1, 1]} : vector<8x4xf32> to vector<8x1xf32>
      %215 = vector.broadcast %214 : vector<8x1xf32> to vector<8x8xf32>
      %216 = arith.mulf %213, %215 : vector<8x8xf32>
      %217 = tpu.concatenate %204, %208, %212, %216 in 1 : vector<8x8xf32>, vector<8x8xf32>, vector<8x8xf32>, vector<8x8xf32> -> vector<8x32xf32>
      %c0_92 = arith.constant 0 : index
      %c0_93 = arith.constant 0 : index
      %218 = vector.load %arg13[%c0_92, %c0_93] : memref<3x32xf32, #tpu.memory_space<vmem>>, vector<3x32xf32>
      %219 = arith.truncf %217 : vector<8x32xf32> to vector<8x32xbf16>
      %c0_94 = arith.constant 0 : index
      %c0_95 = arith.constant 0 : index
      %220 = vector.load %arg12[%c0_94, %c0_95] : memref<32x32xbf16, #tpu.memory_space<vmem>>, vector<32x32xbf16>
      %cst_96 = arith.constant dense<0.000000e+00> : vector<8x32xf32>
      %221 = tpu.matmul %219, %220, %cst_96 {dimension_numbers = #tpu.dot_dimension_numbers<[1], [0], [0], [1], [0, 0, 1, 1], [], []>} : vector<8x32xbf16>, vector<32x32xbf16>, vector<8x32xf32> -> vector<8x32xf32>
      %222 = vector.extract_strided_slice %218 {offsets = [0, 0], sizes = [1, 32], strides = [1, 1]} : vector<3x32xf32> to vector<1x32xf32>
      %223 = vector.broadcast %222 : vector<1x32xf32> to vector<8x32xf32>
      %224 = arith.addf %221, %223 : vector<8x32xf32>
      %c0_97 = arith.constant 0 : index
      %c0_98 = arith.constant 0 : index
      %225 = vector.load %arg11[%c0_97, %c0_98] : memref<8x32xf32, #tpu.memory_space<vmem>>, vector<8x32xf32>
      %226 = arith.addf %225, %224 : vector<8x32xf32>
      %cst_99 = arith.constant dense<0.000000e+00> : vector<8xf32>
      %227 = vector.multi_reduction <add>, %226, %cst_99 [1] : vector<8x32xf32> to vector<8xf32>
      %228 = vector.shape_cast %227 : vector<8xf32> to vector<8x1xf32>
      %cst_100 = arith.constant 3.200000e+01 : f32
      %229 = vector.broadcast %cst_100 : f32 to vector<8x1xf32>
      %230 = arith.divf %228, %229 : vector<8x1xf32>
      %231 = vector.broadcast %230 : vector<8x1xf32> to vector<8x32xf32>
      %232 = arith.subf %226, %231 : vector<8x32xf32>
      %233 = arith.mulf %232, %232 : vector<8x32xf32>
      %cst_101 = arith.constant dense<0.000000e+00> : vector<8xf32>
      %234 = vector.multi_reduction <add>, %233, %cst_101 [1] : vector<8x32xf32> to vector<8xf32>
      %235 = vector.shape_cast %234 : vector<8xf32> to vector<8x1xf32>
      %cst_102 = arith.constant 3.200000e+01 : f32
      %236 = vector.broadcast %cst_102 : f32 to vector<8x1xf32>
      %237 = arith.divf %235, %236 : vector<8x1xf32>
      %cst_103 = arith.constant 9.99999974E-6 : f32
      %238 = vector.broadcast %cst_103 : f32 to vector<8x1xf32>
      %239 = arith.addf %237, %238 : vector<8x1xf32>
      %240 = math.rsqrt %239 : vector<8x1xf32>
      %241 = vector.broadcast %240 : vector<8x1xf32> to vector<8x32xf32>
      %242 = arith.mulf %232, %241 : vector<8x32xf32>
      %243 = vector.extract_strided_slice %218 {offsets = [1, 0], sizes = [1, 32], strides = [1, 1]} : vector<3x32xf32> to vector<1x32xf32>
      %244 = vector.broadcast %243 : vector<1x32xf32> to vector<8x32xf32>
      %245 = arith.mulf %242, %244 : vector<8x32xf32>
      %246 = vector.extract_strided_slice %218 {offsets = [2, 0], sizes = [1, 32], strides = [1, 1]} : vector<3x32xf32> to vector<1x32xf32>
      %247 = vector.broadcast %246 : vector<1x32xf32> to vector<8x32xf32>
      %248 = arith.addf %245, %247 : vector<8x32xf32>
      %c0_104 = arith.constant 0 : index
      %c0_105 = arith.constant 0 : index
      %249 = vector.load %arg14[%c0_104, %c0_105] : memref<8x32xf32, #tpu.memory_space<vmem>>, vector<8x32xf32>
      tpu.vector_store %arg14[%c0_104, %c0_105], %248 {strides = array<i32>} : memref<8x32xf32, #tpu.memory_space<vmem>>, vector<8x32xf32>,
    } else {
    }
    return
  }
  func.func @transform_0(%arg0: i32, %arg1: i32) -> (i32, i32) {
    %c0_i32 = arith.constant 0 : i32
    %c0_i32_0 = arith.constant 0 : i32
    return %arg0, %c0_i32 : i32, i32
  }
  func.func @transform_1(%arg0: i32, %arg1: i32) -> (i32, i32) {
    %c0_i32 = arith.constant 0 : i32
    %c0_i32_0 = arith.constant 0 : i32
    return %c0_i32, %arg1 : i32, i32
  }
  func.func @transform_2(%arg0: i32, %arg1: i32) -> (i32, i32, i32) {
    %c0_i32 = arith.constant 0 : i32
    %c0_i32_0 = arith.constant 0 : i32
    %c0_i32_1 = arith.constant 0 : i32
    return %c0_i32, %arg0, %c0_i32_0 : i32, i32, i32
  }
  func.func @transform_3(%arg0: i32, %arg1: i32) -> (i32, i32, i32) {
    %c0_i32 = arith.constant 0 : i32
    %c0_i32_0 = arith.constant 0 : i32
    %c0_i32_1 = arith.constant 0 : i32
    return %c0_i32, %c0_i32_0, %arg1 : i32, i32, i32
  }
  func.func @transform_4(%arg0: i32, %arg1: i32) -> (i32, i32, i32) {
    %c0_i32 = arith.constant 0 : i32
    %c0_i32_0 = arith.constant 0 : i32
    %c0_i32_1 = arith.constant 0 : i32
    return %c0_i32, %arg1, %c0_i32_0 : i32, i32, i32
  }
  func.func @transform_5(%arg0: i32, %arg1: i32) -> (i32, i32, i32) {
    %c0_i32 = arith.constant 0 : i32
    %c0_i32_0 = arith.constant 0 : i32
    return %arg0, %c0_i32, %arg1 : i32, i32, i32
  }
  func.func @transform_6(%arg0: i32, %arg1: i32) -> (i32, i32) {
    %c0_i32 = arith.constant 0 : i32
    %c0_i32_0 = arith.constant 0 : i32
    %c0_i32_1 = arith.constant 0 : i32
    return %c0_i32, %c0_i32_0 : i32, i32
  }
  func.func @transform_7(%arg0: i32, %arg1: i32) -> (i32, i32) {
    %c0_i32 = arith.constant 0 : i32
    return %arg0, %arg1 : i32, i32
  }
  func.func @transform_8(%arg0: i32, %arg1: i32) -> (i32, i32) {
    %c0_i32 = arith.constant 0 : i32
    %c0_i32_0 = arith.constant 0 : i32
    return %c0_i32, %arg1 : i32, i32
  }
  func.func @transform_9(%arg0: i32, %arg1: i32) -> (i32, i32) {
    %c0_i32 = arith.constant 0 : i32
    %c0_i32_0 = arith.constant 0 : i32
    return %arg0, %c0_i32 : i32, i32
  }
  func.func @transform_10(%arg0: i32, %arg1: i32) -> (i32, i32) {
    %c0_i32 = arith.constant 0 : i32
    %c0_i32_0 = arith.constant 0 : i32
    %c0_i32_1 = arith.constant 0 : i32
    return %c0_i32, %c0_i32_0 : i32, i32
  }
  func.func @transform_11(%arg0: i32, %arg1: i32) -> (i32, i32) {
    %c0_i32 = arith.constant 0 : i32
    %c0_i32_0 = arith.constant 0 : i32
    %c0_i32_1 = arith.constant 0 : i32
    return %c0_i32, %c0_i32_0 : i32, i32
  }
  func.func @transform_12(%arg0: i32, %arg1: i32) -> (i32, i32) {
    %c0_i32 = arith.constant 0 : i32
    %c0_i32_0 = arith.constant 0 : i32
    return %arg0, %c0_i32 : i32, i32
  }
}

module attributes {stable_mosaic.version = 11 : i64} {
  func.func @_ffn_kernel(%arg0: i32, %arg1: memref<8x32xf32, #tpu.memory_space<vmem>>, %arg2: memref<32x64xbf16, #tpu.memory_space<vmem>>, %arg3: memref<1x64xf32, #tpu.memory_space<vmem>>, %arg4: memref<64x32xbf16, #tpu.memory_space<vmem>>, %arg5: memref<3x32xf32, #tpu.memory_space<vmem>>, %arg6: memref<8x32xf32, #tpu.memory_space<vmem>>) attributes {dimension_semantics = [#tpu.dimension_semantics<parallel>], iteration_bounds = array<i64: 1>, scalar_prefetch = 0 : i64, scratch_operands = 0 : i64, tpu.core_type = #tpu.core_type<tc>, window_params = [{transform_indices = @transform_0, window_bounds = array<i64: 8, 32>}, {pipeline_mode = #tpu.pipeline_mode<synchronous>, transform_indices = @transform_1, window_bounds = array<i64: 32, 64>}, {pipeline_mode = #tpu.pipeline_mode<synchronous>, transform_indices = @transform_2, window_bounds = array<i64: 1, 64>}, {pipeline_mode = #tpu.pipeline_mode<synchronous>, transform_indices = @transform_3, window_bounds = array<i64: 64, 32>}, {pipeline_mode = #tpu.pipeline_mode<synchronous>, transform_indices = @transform_4, window_bounds = array<i64: 3, 32>}, {transform_indices = @transform_5, window_bounds = array<i64: 8, 32>}]} {
    %c0 = arith.constant 0 : index
    %c0_0 = arith.constant 0 : index
    %0 = vector.load %arg1[%c0, %c0_0] : memref<8x32xf32, #tpu.memory_space<vmem>>, vector<8x32xf32>
    %1 = arith.truncf %0 : vector<8x32xf32> to vector<8x32xbf16>
    %c0_1 = arith.constant 0 : index
    %c0_2 = arith.constant 0 : index
    %2 = vector.load %arg2[%c0_1, %c0_2] : memref<32x64xbf16, #tpu.memory_space<vmem>>, vector<32x64xbf16>
    %cst = arith.constant dense<0.000000e+00> : vector<8x64xf32>
    %3 = tpu.matmul %1, %2, %cst {dimension_numbers = #tpu.dot_dimension_numbers<[1], [0], [0], [1], [0, 0, 1, 1], [], []>} : vector<8x32xbf16>, vector<32x64xbf16>, vector<8x64xf32> -> vector<8x64xf32>
    %c0_3 = arith.constant 0 : index
    %c0_4 = arith.constant 0 : index
    %4 = vector.load %arg3[%c0_3, %c0_4] : memref<1x64xf32, #tpu.memory_space<vmem>>, vector<1x64xf32>
    %5 = vector.broadcast %4 : vector<1x64xf32> to vector<8x64xf32>
    %6 = arith.addf %3, %5 : vector<8x64xf32>
    %cst_5 = arith.constant 0.000000e+00 : f32
    %7 = vector.broadcast %cst_5 : f32 to vector<8x64xf32>
    %8 = arith.maximumf %6, %7 : vector<8x64xf32>
    %c0_6 = arith.constant 0 : index
    %c0_7 = arith.constant 0 : index
    %9 = vector.load %arg5[%c0_6, %c0_7] : memref<3x32xf32, #tpu.memory_space<vmem>>, vector<3x32xf32>
    %10 = arith.truncf %8 : vector<8x64xf32> to vector<8x64xbf16>
    %c0_8 = arith.constant 0 : index
    %c0_9 = arith.constant 0 : index
    %11 = vector.load %arg4[%c0_8, %c0_9] : memref<64x32xbf16, #tpu.memory_space<vmem>>, vector<64x32xbf16>
    %cst_10 = arith.constant dense<0.000000e+00> : vector<8x32xf32>
    %12 = tpu.matmul %10, %11, %cst_10 {dimension_numbers = #tpu.dot_dimension_numbers<[1], [0], [0], [1], [0, 0, 1, 1], [], []>} : vector<8x64xbf16>, vector<64x32xbf16>, vector<8x32xf32> -> vector<8x32xf32>
    %13 = vector.extract_strided_slice %9 {offsets = [0, 0], sizes = [1, 32], strides = [1, 1]} : vector<3x32xf32> to vector<1x32xf32>
    %14 = vector.broadcast %13 : vector<1x32xf32> to vector<8x32xf32>
    %15 = arith.addf %12, %14 : vector<8x32xf32>
    %16 = arith.addf %0, %15 : vector<8x32xf32>
    %cst_11 = arith.constant dense<0.000000e+00> : vector<8xf32>
    %17 = vector.multi_reduction <add>, %16, %cst_11 [1] : vector<8x32xf32> to vector<8xf32>
    %18 = vector.shape_cast %17 : vector<8xf32> to vector<8x1xf32>
    %cst_12 = arith.constant 3.200000e+01 : f32
    %19 = vector.broadcast %cst_12 : f32 to vector<8x1xf32>
    %20 = arith.divf %18, %19 : vector<8x1xf32>
    %21 = vector.broadcast %20 : vector<8x1xf32> to vector<8x32xf32>
    %22 = arith.subf %16, %21 : vector<8x32xf32>
    %23 = arith.mulf %22, %22 : vector<8x32xf32>
    %cst_13 = arith.constant dense<0.000000e+00> : vector<8xf32>
    %24 = vector.multi_reduction <add>, %23, %cst_13 [1] : vector<8x32xf32> to vector<8xf32>
    %25 = vector.shape_cast %24 : vector<8xf32> to vector<8x1xf32>
    %cst_14 = arith.constant 3.200000e+01 : f32
    %26 = vector.broadcast %cst_14 : f32 to vector<8x1xf32>
    %27 = arith.divf %25, %26 : vector<8x1xf32>
    %cst_15 = arith.constant 9.99999974E-6 : f32
    %28 = vector.broadcast %cst_15 : f32 to vector<8x1xf32>
    %29 = arith.addf %27, %28 : vector<8x1xf32>
    %30 = math.rsqrt %29 : vector<8x1xf32>
    %31 = vector.broadcast %30 : vector<8x1xf32> to vector<8x32xf32>
    %32 = arith.mulf %22, %31 : vector<8x32xf32>
    %33 = vector.extract_strided_slice %9 {offsets = [1, 0], sizes = [1, 32], strides = [1, 1]} : vector<3x32xf32> to vector<1x32xf32>
    %34 = vector.broadcast %33 : vector<1x32xf32> to vector<8x32xf32>
    %35 = arith.mulf %32, %34 : vector<8x32xf32>
    %36 = vector.extract_strided_slice %9 {offsets = [2, 0], sizes = [1, 32], strides = [1, 1]} : vector<3x32xf32> to vector<1x32xf32>
    %37 = vector.broadcast %36 : vector<1x32xf32> to vector<8x32xf32>
    %38 = arith.addf %35, %37 : vector<8x32xf32>
    %c0_16 = arith.constant 0 : index
    %c0_17 = arith.constant 0 : index
    %39 = vector.load %arg6[%c0_16, %c0_17] : memref<8x32xf32, #tpu.memory_space<vmem>>, vector<8x32xf32>
    tpu.vector_store %arg6[%c0_16, %c0_17], %38 {strides = array<i32>} : memref<8x32xf32, #tpu.memory_space<vmem>>, vector<8x32xf32>,
    return
  }
  func.func @transform_0(%arg0: i32) -> (i32, i32) {
    %c0_i32 = arith.constant 0 : i32
    %c0_i32_0 = arith.constant 0 : i32
    return %arg0, %c0_i32 : i32, i32
  }
  func.func @transform_1(%arg0: i32) -> (i32, i32) {
    %c0_i32 = arith.constant 0 : i32
    %c0_i32_0 = arith.constant 0 : i32
    %c0_i32_1 = arith.constant 0 : i32
    return %c0_i32, %c0_i32_0 : i32, i32
  }
  func.func @transform_2(%arg0: i32) -> (i32, i32) {
    %c0_i32 = arith.constant 0 : i32
    %c0_i32_0 = arith.constant 0 : i32
    %c0_i32_1 = arith.constant 0 : i32
    return %c0_i32, %c0_i32_0 : i32, i32
  }
  func.func @transform_3(%arg0: i32) -> (i32, i32) {
    %c0_i32 = arith.constant 0 : i32
    %c0_i32_0 = arith.constant 0 : i32
    %c0_i32_1 = arith.constant 0 : i32
    return %c0_i32, %c0_i32_0 : i32, i32
  }
  func.func @transform_4(%arg0: i32) -> (i32, i32) {
    %c0_i32 = arith.constant 0 : i32
    %c0_i32_0 = arith.constant 0 : i32
    %c0_i32_1 = arith.constant 0 : i32
    return %c0_i32, %c0_i32_0 : i32, i32
  }
  func.func @transform_5(%arg0: i32) -> (i32, i32) {
    %c0_i32 = arith.constant 0 : i32
    %c0_i32_0 = arith.constant 0 : i32
    return %arg0, %c0_i32 : i32, i32
  }
}

module attributes {stable_mosaic.version = 11 : i64} {
  func.func @_linear_kernel(%arg0: i32, %arg1: memref<8x32xf32, #tpu.memory_space<vmem>>, %arg2: memref<32x3xbf16, #tpu.memory_space<vmem>>, %arg3: memref<1x3xf32, #tpu.memory_space<vmem>>, %arg4: memref<8x3xf32, #tpu.memory_space<vmem>>) attributes {dimension_semantics = [#tpu.dimension_semantics<parallel>], iteration_bounds = array<i64: 1>, scalar_prefetch = 0 : i64, scratch_operands = 0 : i64, tpu.core_type = #tpu.core_type<tc>, window_params = [{transform_indices = @transform_0, window_bounds = array<i64: 8, 32>}, {pipeline_mode = #tpu.pipeline_mode<synchronous>, transform_indices = @transform_1, window_bounds = array<i64: 32, 3>}, {pipeline_mode = #tpu.pipeline_mode<synchronous>, transform_indices = @transform_2, window_bounds = array<i64: 1, 3>}, {transform_indices = @transform_3, window_bounds = array<i64: 8, 3>}]} {
    %c0 = arith.constant 0 : index
    %c0_0 = arith.constant 0 : index
    %0 = vector.load %arg1[%c0, %c0_0] : memref<8x32xf32, #tpu.memory_space<vmem>>, vector<8x32xf32>
    %1 = arith.truncf %0 : vector<8x32xf32> to vector<8x32xbf16>
    %c0_1 = arith.constant 0 : index
    %c0_2 = arith.constant 0 : index
    %2 = vector.load %arg2[%c0_1, %c0_2] : memref<32x3xbf16, #tpu.memory_space<vmem>>, vector<32x3xbf16>
    %cst = arith.constant dense<0.000000e+00> : vector<8x3xf32>
    %3 = tpu.matmul %1, %2, %cst {dimension_numbers = #tpu.dot_dimension_numbers<[1], [0], [0], [1], [0, 0, 1, 1], [], []>} : vector<8x32xbf16>, vector<32x3xbf16>, vector<8x3xf32> -> vector<8x3xf32>
    %c0_3 = arith.constant 0 : index
    %c0_4 = arith.constant 0 : index
    %4 = vector.load %arg3[%c0_3, %c0_4] : memref<1x3xf32, #tpu.memory_space<vmem>>, vector<1x3xf32>
    %5 = vector.broadcast %4 : vector<1x3xf32> to vector<8x3xf32>
    %6 = arith.addf %3, %5 : vector<8x3xf32>
    %c0_5 = arith.constant 0 : index
    %c0_6 = arith.constant 0 : index
    %7 = vector.load %arg4[%c0_5, %c0_6] : memref<8x3xf32, #tpu.memory_space<vmem>>, vector<8x3xf32>
    tpu.vector_store %arg4[%c0_5, %c0_6], %6 {strides = array<i32>} : memref<8x3xf32, #tpu.memory_space<vmem>>, vector<8x3xf32>,
    return
  }
  func.func @transform_0(%arg0: i32) -> (i32, i32) {
    %c0_i32 = arith.constant 0 : i32
    %c0_i32_0 = arith.constant 0 : i32
    return %arg0, %c0_i32 : i32, i32
  }
  func.func @transform_1(%arg0: i32) -> (i32, i32) {
    %c0_i32 = arith.constant 0 : i32
    %c0_i32_0 = arith.constant 0 : i32
    %c0_i32_1 = arith.constant 0 : i32
    return %c0_i32, %c0_i32_0 : i32, i32
  }
  func.func @transform_2(%arg0: i32) -> (i32, i32) {
    %c0_i32 = arith.constant 0 : i32
    %c0_i32_0 = arith.constant 0 : i32
    %c0_i32_1 = arith.constant 0 : i32
    return %c0_i32, %c0_i32_0 : i32, i32
  }
  func.func @transform_3(%arg0: i32) -> (i32, i32) {
    %c0_i32 = arith.constant 0 : i32
    %c0_i32_0 = arith.constant 0 : i32
    return %arg0, %c0_i32 : i32, i32
  }
}

</mosaic_0001>

<bundles_post_ra>
// kernel: san_transformer_forward.10
= control target key start
LH: loop header
LB: loop body
LE: loop exit
PB: predicated region body
PF: predicated region fallthrough
CT: control target
= control target key end

     0   :  { %vm29_vm0 = vcmask 1041408   ;;  %v91_v0 = vmov 0.0   ;;  %vm92_vm1 = vmmov 0   ;;  %vm25_vm2 = vcmask 31744   ;;  %s125_s1 = inlined_call_operand.vmem [shape: bf16[4,32], index: 1, kind: input, shape index: {}]   ;;  %s126_s0 = inlined_call_operand.vmem [shape: f32[8,4], index: 0, kind: input, shape index: {}]   ;;  %s127_s2 = inlined_call_operand.vmem [shape: f32[1,32], index: 2, kind: input, shape index: {}]   ;;  %s128_s3 = inlined_call_operand.vmem [shape: f32[8,32], index: 3, kind: output, shape index: {}]  }
   0x1   :  { %83 = vmatprep.subr.bf16.mxu0 %v91_v0  ;;  %v17_v1 = vld [vmem:[%s125_s1] sm:$0x3]  ;;  %85 = vmatprep.mubr.msk.bf16.mxu0 %vm92_vm1, %v91_v0  ;;  %vm73_vm3 = vcmask 261120  }
   0x2   :  { %v15_v2 = vld [vmem:[%s126_s0] sm:$0xff]  ;;  %v31_v3 = vsel %vm29_vm0, %v17_v1, 0 }
   0x3   :  { %v16_v4 = vpack.c.bf16 %v15_v2, %v15_v2  ;;  %84 = vmatpush3.bf16.msra.mxu0 %v31_v3  ;;  %v79_v5 = vld [vmem:[%s127_s2] ss:$0 sm:$0xff] }
   0x6   :  { %86 = vmatmul.mubr.msk.bf16.vlgmr.msra.gmra.mrb[0].mxu0 %vm25_vm2, %v16_v4 }
  0xd9   :  { %v67_v6 = vpop.f32.mrb[0].mxu0 }
  0xda   :  { %v68_v7 = vadd.f32 %v79_v5, %v67_v6  ;;  %v87_v8 = vpop.f32.mrb[1].mxu0 }
  0xdb   :  { %v70_v9 = vpop.f32.mrb[2].mxu0 }
  0xdc   :  { %74 = vst.msk [vmem:[%s128_s3] sm:$0xff] %vm73_vm3, %v68_v7  ;;  %v88_v10 = vpop.f32.mrb[3].mxu0 }

// kernel: san_transformer_forward.13
= control target key start
LH: loop header
LB: loop body
LE: loop exit
PB: predicated region body
PF: predicated region fallthrough
CT: control target
= control target key end

     0   :  { %v116_v1 = vmov 0   ;;  %vm53_vm0 = vcmask 261120   ;;  %v23_v7 = vlaneseq  ;;  %s163_s1 = inlined_call_operand.vmem [shape: bf16[32,160], index: 1, kind: input, shape index: {}]   ;;  %s164_s0 = inlined_call_operand.vmem [shape: f32[8,32], index: 0, kind: input, shape index: {}]   ;;  %s165_s2 = inlined_call_operand.vmem [shape: f32[1,160], index: 2, kind: input, shape index: {}]   ;;  %s166_s3 = inlined_call_operand.vmem [shape: f32[8,160], index: 3, kind: output, shape index: {}]  }
   0x1   :  { %v110_v0 = vld [vmem:[%s163_s1 + $0x4] ss:$8 sps:$4 sm:$0xff]   ;;  %89 = vmatprep.mubr.bf16.mxu0 %v116_v1  ;;  %v112_v2 = vld [vmem:[%s163_s1] ss:$8 sps:$4 sm:$0xff]   ;;  %v113_v3 = vld [vmem:[%s163_s1 + $0x14] ss:$8 sps:$4 sm:$0xff]  }
   0x2   :  { %57 = vmatprep.subr.bf16.mxu0 %v110_v0  ;;  %v115_v4 = vld [vmem:[%s163_s1 + $0x10] ss:$8 sps:$4 sm:$0xff]   ;;  %v15_v5 = vld [vmem:[%s164_s0] sm:$0xff]  ;;  %v24_v8 = vshrl.u32 %v23_v7, 7 }
   0x3   :  { %58 = vmatpush1.bf16.msra.mxu0 %v112_v2  ;;  %v16_v6 = vpack.c.bf16 %v15_v5, %v15_v5  ;;  %v21_v10 = vld [vmem:[%s165_s2] sm:$0x3] }
   0x4   :  { %59 = vmatprep.subr.bf16.mxu0 %v113_v3  ;;  %v25_v9 = vsub.s32 0, %v24_v8  ;;  %v29_v11 = vsub.s32 1, %v24_v8 }
   0x6   :  { %v26_v12 = vrot.slane %v21_v10, %v25_v9  ;;  %v30_v13 = vrot.slane %v21_v10, %v29_v11 }
   0x7   :  { %60 = vmatpush1.bf16.msra.mxu0 %v115_v4 }
   0xa   :  { %108 = vmatmul.mubr.msk.bf16.vlgmr.msra.gmra.mrb[0].mxu0 %vm53_vm0, %v16_v6 }
  0xdd   :  { %v91_v14 = vpop.f32.mrb[0].mxu0 }
  0xde   :  { %v92_v15 = vadd.f32 %v91_v14, %v26_v12  ;;  %v93_v16 = vpop.f32.mrb[1].mxu0 }
  0xdf   :  { %v94_v17 = vadd.f32 %v93_v16, %v30_v13  ;;  %v95_v18 = vpop.f32.mrb[2].mxu0 }
  0xe0   :  { %98 = vst [vmem:[%s166_s3] sm:$0xff] %v92_v15  ;;  %v96_v19 = vpop.f32.mrb[3].mxu0 }
  0xe1   :  { %99 = vst.msk [vmem:[%s166_s3 + $0x8] sm:$0xff] %vm53_vm0, %v94_v17 }

// kernel: san_transformer_forward.12
= control target key start
LH: loop header
LB: loop body
LE: loop exit
PB: predicated region body
PF: predicated region fallthrough
CT: control target
= control target key end

     0   :  { %v109_v0 = vmov 0.0   ;;  %vm110_vm0 = vmmov 0   ;;  %vm40_vm1 = vcmask 261120   ;;  %vm84_vm2 = vcmask 523264   ;;  %s146_s1 = inlined_call_operand.vmem [shape: bf16[32,64], index: 1, kind: input, shape index: {}]   ;;  %s147_s0 = inlined_call_operand.vmem [shape: f32[8,32], index: 0, kind: input, shape index: {}]   ;;  %s148_s2 = inlined_call_operand.vmem [shape: f32[1,64], index: 2, kind: input, shape index: {}]   ;;  %s149_s3 = inlined_call_operand.vmem [shape: f32[8,64], index: 3, kind: output, shape index: {}]  }
   0x1   :  { %97 = vmatprep.subr.bf16.mxu0 %v109_v0  ;;  %v107_v1 = vld [vmem:[%s146_s1] sm:$0xff]   ;;  %101 = vmatprep.mubr.msk.bf16.mxu0 %vm110_vm0, %v109_v0  ;;  %v108_v2 = vld [vmem:[%s146_s1 + $0x8] sm:$0xff]  }
   0x2   :  { %98 = vmatpush3.bf16.msra.mxu0 %v107_v1  ;;  %v15_v3 = vld [vmem:[%s147_s0] sm:$0xff] }
   0x3   :  { %99 = vmatprep.subr.bf16.mxu0 %v109_v0  ;;  %v16_v4 = vpack.c.bf16 %v15_v3, %v15_v3  ;;  %v90_v5 = vld [vmem:[%s148_s2] ss:$0 sm:$0xff] }
   0x6   :  { %100 = vmatpush3.bf16.msra.mxu0 %v108_v2 }
   0x9   :  { %102 = vmatmul.mubr.msk.bf16.vlgmr.msra.gmra.mrb[0].mxu0 %vm40_vm1, %v16_v4 }
  0xdc   :  { %v78_v6 = vpop.f32.mrb[0].mxu0 }
  0xdd   :  { %v79_v7 = vadd.f32 %v90_v5, %v78_v6  ;;  %v103_v8 = vpop.f32.mrb[1].mxu0 }
  0xde   :  { %v81_v9 = vpop.f32.mrb[2].mxu0 }
  0xdf   :  { %85 = vst.msk [vmem:[%s149_s3] sm:$0xff] %vm84_vm2, %v79_v7  ;;  %v104_v10 = vpop.f32.mrb[3].mxu0 }

// kernel: san_transformer_forward.11
= control target key start
LH: loop header
LB: loop body
LE: loop exit
PB: predicated region body
PF: predicated region fallthrough
CT: control target
= control target key end

     0   :  { %vm30_vm0 = vcmask 1041408   ;;  %v94_v0 = vmov 0.0   ;;  %vm95_vm1 = vmmov 0   ;;  %vm26_vm2 = vcmask 31744   ;;  %s134_s1 = inlined_call_operand.vmem [shape: bf16[4,32], index: 1, kind: input, shape index: {}]   ;;  %s135_s0 = inlined_call_operand.vmem [shape: f32[16,4], index: 0, kind: input, shape index: {}]   ;;  %s136_s2 = inlined_call_operand.vmem [shape: f32[1,32], index: 2, kind: input, shape index: {}]   ;;  %s137_s3 = inlined_call_operand.vmem [shape: f32[16,32], index: 3, kind: output, shape index: {}]  }
   0x1   :  { %86 = vmatprep.subr.bf16.mxu0 %v94_v0  ;;  %v18_v1 = vld [vmem:[%s134_s1] sm:$0x3]  ;;  %88 = vmatprep.mubr.msk.bf16.mxu0 %vm95_vm1, %v94_v0  ;;  %v16_v3 = vld [vmem:[%s135_s0 + $0x8] sm:$0xff]  ;;  %vm75_vm3 = vcmask 261120  }
   0x2   :  { %v15_v2 = vld [vmem:[%s135_s0] sm:$0xff]  ;;  %v32_v4 = vsel %vm30_vm0, %v18_v1, 0 }
   0x3   :  { %v17_v5 = vpack.c.bf16 %v16_v3, %v15_v2  ;;  %87 = vmatpush3.bf16.msra.mxu0 %v32_v4  ;;  %v82_v6 = vld [vmem:[%s136_s2] ss:$0 sm:$0xff] }
   0x6   :  { %89 = vmatmul.mubr.msk.bf16.vlgmr.msra.gmra.mrb[0].mxu0 %vm26_vm2, %v17_v5 }
  0xd9   :  { %v68_v7 = vpop.f32.mrb[0].mxu0 }
  0xda   :  { %v69_v8 = vadd.f32 %v82_v6, %v68_v7  ;;  %v90_v9 = vpop.f32.mrb[1].mxu0 }
  0xdb   :  { %v71_v10 = vpop.f32.mrb[2].mxu0 }
  0xdc   :  { %76 = vst.msk [vmem:[%s137_s3] sm:$0xff] %vm75_vm3, %v69_v8  ;;  %v72_v11 = vadd.f32 %v82_v6, %v71_v10  ;;  %v91_v12 = vpop.f32.mrb[3].mxu0 }
  0xde   :  { %77 = vst.msk [vmem:[%s137_s3 + $0x8] sm:$0xff] %vm75_vm3, %v72_v11 }

// kernel: san_transformer_forward.15
= control target key start
LH: loop header
LB: loop body
LE: loop exit
PB: predicated region body
PF: predicated region fallthrough
CT: control target
= control target key end

     0   :  { %v250_v0 = vmov 0.0   ;;  %vm251_vm0 = vmmov 0   ;;  %vm46_vm1 = vcmask 261120   ;;  %vm129_vm2 = vcmask 523264   ;;  %s316_s1 = inlined_call_operand.vmem [shape: bf16[32,64], index: 1, kind: input, shape index: {}]   ;;  %s317_s0 = inlined_call_operand.vmem [shape: f32[8,32], index: 0, kind: input, shape index: {}]   ;;  %s318_s3 = inlined_call_operand.vmem [shape: bf16[64,32], index: 3, kind: input, shape index: {}]   ;;  %s319_s2 = inlined_call_operand.vmem [shape: f32[1,64], index: 2, kind: input, shape index: {}]   ;;  %s320_s4 = inlined_call_operand.vmem [shape: f32[3,32], index: 4, kind: input, shape index: {}]   ;;  %s321_s5 = inlined_call_operand.vmem [shape: f32[8,32], index: 5, kind: output, shape index: {}]  }
   0x1   :  { %220 = vmatprep.subr.bf16.mxu0 %v250_v0  ;;  %v242_v1 = vld [vmem:[%s316_s1] sm:$0xff]   ;;  %224 = vmatprep.mubr.msk.bf16.mxu0 %vm251_vm0, %v250_v0  ;;  %v243_v2 = vld [vmem:[%s316_s1 + $0x8] sm:$0xff]   ;;  %v246_v7 = vld [vmem:[%s318_s3 + $0x10] sm:$0xff]   ;;  %v101_v17 = vlaneseq }
   0x2   :  { %228 = vmatprep.subr.bf16.mxu1 %v250_v0  ;;  %236 = vmatprep.mubr.msk.bf16.mxu1 %vm251_vm0, %v250_v0  ;;  %v21_v3 = vld [vmem:[%s317_s0] sm:$0xff]  ;;  %v245_v5 = vld [vmem:[%s318_s3 + $0x8] sm:$0xff]   ;;  %v247_v8 = vld [vmem:[%s318_s3 + $0x18] sm:$0xff]  }
   0x3   :  { %221 = vmatpush3.bf16.msra.mxu0 %v242_v1  ;;  %v244_v4 = vld [vmem:[%s318_s3] sm:$0xff]   ;;  %v22_v6 = vpack.c.bf16 %v21_v3, %v21_v3  ;;  %v102_v18 = vshrl.u32 %v101_v17, 7 }
   0x4   :  { %222 = vmatprep.subr.bf16.mxu0 %v250_v0  ;;  %229 = vmatpush3.bf16.msra.mxu1 %v244_v4  ;;  %v203_v9 = vld [vmem:[%s319_s2] ss:$0 sm:$0xff] }
   0x5   :  { %230 = vmatprep.subr.bf16.mxu1 %v250_v0  ;;  %v103_v19 = vsub.s32 0, %v102_v18  ;;  %v91_v20 = vld [vmem:[%s320_s4] sm:$0x7]  ;;  %v190_v37 = vsub.s32 1, %v102_v18  ;;  %v195_v38 = vsub.s32 2, %v102_v18 }
   0x7   :  { %223 = vmatpush3.bf16.msra.mxu0 %v243_v2  ;;  %v104_v21 = vrot.slane %v91_v20, %v103_v19  ;;  %v191_v39 = vrot.slane %v91_v20, %v190_v37  ;;  %v196_v41 = vrot.slane %v91_v20, %v195_v38 }
   0x8   :  { %231 = vmatpush3.bf16.msra.mxu1 %v245_v5 }
   0x9   :  { %232 = vmatprep.subr.bf16.mxu1 %v250_v0 }
   0xa   :  { %225 = vmatmul.mubr.msk.bf16.vlgmr.msra.gmra.mrb[0].mxu0 %vm46_vm1, %v22_v6 }
   0xc   :  { %233 = vmatpush3.bf16.msra.mxu1 %v246_v7 }
   0xd   :  { %234 = vmatprep.subr.bf16.mxu1 %v250_v0 }
  0x10   :  { %235 = vmatpush3.bf16.msra.mxu1 %v247_v8 }
  0xdd   :  { %v84_v10 = vpop.f32.mrb[0].mxu0 }
  0xde   :  { %v85_v11 = vadd.f32 %v203_v9, %v84_v10  ;;  %v226_v12 = vpop.f32.mrb[1].mxu0 }
  0xdf   :  { %v87_v13 = vpop.f32.mrb[2].mxu0 }
  0xe0   :  { %v90_v14 = vmax.f32 %v85_v11, 0.0  ;;  %v227_v15 = vpop.f32.mrb[3].mxu0 }
  0xe2   :  { %v92_v16 = vpack.c.bf16 %v90_v14, %v90_v14 }
  0xe4   :  { %237 = vmatmul.mubr.msk.bf16.vlgmr.msra.gmra.mrb[0].mxu1 %vm129_vm2, %v92_v16 }
 0x1b7   :  { %v167_v22 = vpop.f32.mrb[0].mxu1 }
 0x1b8   :  { %v168_v23 = vadd.f32 %v167_v22, %v104_v21  ;;  %v238_v24 = vpop.f32.mrb[1].mxu1 }
 0x1b9   :  { %v170_v25 = vpop.f32.mrb[2].mxu1 }
 0x1ba   :  { %v239_v26 = vpop.f32.mrb[3].mxu1  ;;  %v173_v27 = vadd.f32 %v168_v23, %v21_v3 }
 0x1bc   :  { %v174_v28 = vsel %vm46_vm1, %v173_v27, 0.0 }
 0x1bd   :  { %175 = vadd.xlane.f32.xlu0 %v174_v28 }
 0x24a   :  { %v176_v29 = vpop.xlane.xlu0 %175 }
 0x24b   :  { %v178_v30 = vmul.f32 0.03125, %v176_v29 }
 0x24d   :  { %v179_v31 = vsub.f32 %v173_v27, %v178_v30 }
 0x24f   :  { %v180_v32 = vmul.f32 %v179_v31, %v179_v31 }
 0x251   :  { %v181_v33 = vsel %vm46_vm1, %v180_v32, 0.0 }
 0x252   :  { %182 = vadd.xlane.f32.xlu0 %v181_v33 }
 0x2df   :  { %v183_v34 = vpop.xlane.xlu0 %182 }
 0x2e0   :  { %v184_v35 = vmul.f32 0.03125, %v183_v34 }
 0x2e2   :  { %v185_v36 = vadd.f32 1e-05, %v184_v35 }
 0x2e4   :  { %248 = vrsqrt.f32 %v185_v36 }
 0x2ee   :  { %v249_v40 = vpop.eup %248 }
 0x2ef   :  { %v187_v42 = vmul.f32 %v249_v40, %v179_v31 }
 0x2f1   :  { %v192_v43 = vmul.f32 %v191_v39, %v187_v42 }
 0x2f3   :  { %v197_v44 = vadd.f32 %v196_v41, %v192_v43 }
 0x2f5   :  { %198 = vst.msk [vmem:[%s321_s5] sm:$0xff] %vm46_vm1, %v197_v44 }

// kernel: san_transformer_forward.19
= control target key start
LH: loop header
LB: loop body
LE: loop exit
PB: predicated region body
PF: predicated region fallthrough
CT: control target
= control target key end

     0   :  { %v109_v0 = vmov 0.0   ;;  %vm110_vm0 = vmmov 0   ;;  %vm40_vm1 = vcmask 261120   ;;  %vm84_vm2 = vcmask 23552   ;;  %s146_s1 = inlined_call_operand.vmem [shape: bf16[32,3], index: 1, kind: input, shape index: {}]   ;;  %s147_s0 = inlined_call_operand.vmem [shape: f32[8,32], index: 0, kind: input, shape index: {}]   ;;  %s148_s2 = inlined_call_operand.vmem [shape: f32[1,3], index: 2, kind: input, shape index: {}]   ;;  %s149_s3 = inlined_call_operand.vmem [shape: f32[8,3], index: 3, kind: output, shape index: {}]  }
   0x1   :  { %97 = vmatprep.subr.bf16.mxu0 %v109_v0  ;;  %v107_v1 = vld [vmem:[%s146_s1] sm:$0xff]   ;;  %101 = vmatprep.mubr.msk.bf16.mxu0 %vm110_vm0, %v109_v0  ;;  %v108_v2 = vld [vmem:[%s146_s1 + $0x8] sm:$0xff]  }
   0x2   :  { %98 = vmatpush3.bf16.msra.mxu0 %v107_v1  ;;  %v15_v3 = vld [vmem:[%s147_s0] sm:$0xff] }
   0x3   :  { %99 = vmatprep.subr.bf16.mxu0 %v109_v0  ;;  %v16_v4 = vpack.c.bf16 %v15_v3, %v15_v3  ;;  %v90_v5 = vld [vmem:[%s148_s2] ss:$0 sm:$0xff] }
   0x6   :  { %100 = vmatpush3.bf16.msra.mxu0 %v108_v2 }
   0x9   :  { %102 = vmatmul.mubr.msk.bf16.vlgmr.msra.gmra.mrb[0].mxu0 %vm40_vm1, %v16_v4 }
  0xdc   :  { %v78_v6 = vpop.f32.mrb[0].mxu0 }
  0xdd   :  { %v79_v7 = vadd.f32 %v90_v5, %v78_v6  ;;  %v103_v8 = vpop.f32.mrb[1].mxu0 }
  0xde   :  { %v81_v9 = vpop.f32.mrb[2].mxu0 }
  0xdf   :  { %85 = vst.msk [vmem:[%s149_s3] sm:$0xff] %vm84_vm2, %v79_v7  ;;  %v104_v10 = vpop.f32.mrb[3].mxu0 }

// kernel: san_transformer_forward.14
= control target key start
LH: loop header
LB: loop body
LE: loop exit
PB: predicated region body
PF: predicated region fallthrough
CT: control target
= control target key end

     0   :  { %vm46_vm0 = vcmask 261120   ;;  %v3616_v1 = vmov 0.0   ;;  %v53_v11 = vlaneseq  ;;  %vm2708_vm1 = vmmov 0   ;;  %s2713_s29 = smov 16   ;;  %s2714_s30 = smov 24   ;;  %s3600_s5 = inlined_call_operand.vmem [shape: bf16[8,32,8], index: 5, kind: input, shape index: {}]   ;;  %s3601_s6 = inlined_call_operand.vmem [shape: bf16[32,32], index: 6, kind: input, shape index: {}]   ;;  %s3602_s0 = inlined_call_operand.vmem [shape: f32[8,32], index: 0, kind: input, shape index: {}]   ;;  %s3603_s3 = inlined_call_operand.vmem [shape: f32[4,8,8], index: 3, kind: input, shape index: {}]   ;;  %s3604_s2 = inlined_call_operand.vmem [shape: f32[4,8,8], index: 2, kind: input, shape index: {}]   ;;  %s3605_s7 = inlined_call_operand.vmem [shape: bf16[8,8], index: 7, kind: input, shape index: {}]   ;;  %s3606_s1 = inlined_call_operand.vmem [shape: f32[32,8], index: 1, kind: input, shape index: {}]   ;;  %s3607_s8 = inlined_call_operand.vmem [shape: f32[1,8], index: 8, kind: input, shape index: {}]   ;;  %s3608_s4 = inlined_call_operand.vmem [shape: bf16[4,8,8], index: 4, kind: input, shape index: {}]   ;;  %s3609_s10 = inlined_call_operand.vmem [shape: bf16[32,32], index: 10, kind: input, shape index: {}]   ;;  %s3610_s11 = inlined_call_operand.vmem [shape: f32[3,32], index: 11, kind: input, shape index: {}]   ;;  %s3611_s9 = inlined_call_operand.vmem [shape: f32[8,32], index: 9, kind: input, shape index: {}]   ;;  %s3612_s12 = inlined_call_operand.vmem [shape: f32[8,32], index: 12, kind: output, shape index: {}]  }
   0x1   :  { %v2611_v0 = vld [vmem:[%s3600_s5] sm:$0xff]   ;;  %47 = vst.msk [vmem:[#allocation2] sm:$0xff] %vm46_vm0, %v3616_v1  ;;  %v2612_v2 = vld [vmem:[%s3600_s5 + $0x10] sm:$0xff]   ;;  %v2613_v3 = vld [vmem:[%s3600_s5 + $0x8] sm:$0xff]   ;;  %vm625_vm2 = vcmask 64512   ;;  %vm1233_vm4 = vcmask 1043456  }
   0x2   :  { %2481 = vmatprep.subr.bf16.mxu0 %v2611_v0  ;;  %2489 = vmatprep.subr.bf16.mxu1 %v2612_v2  ;;  %v2614_v4 = vld [vmem:[%s3600_s5 + $0x18] sm:$0xff]   ;;  %v2798_v5 = vld [vmem:[%s3601_s6] sm:$0xff]   ;;  %v2803_v6 = vld [vmem:[%s3601_s6 + $0x8] sm:$0xff]   ;;  %v2834_v14 = vshrl.u32 %v53_v11, 7  ;;  %vm1166_vm5 = vcmask 1041409   ;;  %vm1169_vm6 = vcmask 1042434  }
   0x3   :  { %2482 = vmatpush3.bf16.msra.mxu0 %v2611_v0  ;;  %2490 = vmatpush3.bf16.msra.mxu1 %v2612_v2  ;;  %v2617_v7 = vld [vmem:[%s3600_s5 + $0x20] sm:$0xff]   ;;  %v2618_v8 = vld [vmem:[%s3600_s5 + $0x30] sm:$0xff]   ;;  %v2619_v9 = vld [vmem:[%s3600_s5 + $0x28] sm:$0xff]   ;;  %vm1172_vm7 = vcmask 1043459   ;;  %vm1175_vm8 = vcmask 1044484   ;;  %vm1178_vm9 = vcmask 1045509  }
   0x4   :  { %2483 = vmatprep.subr.bf16.mxu0 %v2613_v3  ;;  %2491 = vmatprep.subr.bf16.mxu1 %v2614_v4  ;;  %v2620_v10 = vld [vmem:[%s3600_s5 + $0x38] sm:$0xff]   ;;  %v2621_v12 = vld [vmem:[%s3600_s5 + $0x40] sm:$0xff]   ;;  %v2622_v13 = vld [vmem:[%s3600_s5 + $0x50] sm:$0xff]   ;;  %3626 = vst [vmem:[#allocation4_spill] sm:$0xff] %v2834_v14  ;;  %v3614_v17 = vsub.s32 1, %v2834_v14  ;;  %v3615_v22 = vsub.s32 0, %v2834_v14 }
   0x5   :  { %2485 = vmatprep.mubr.msk.bf16.mxu0 %vm46_vm0, %v2798_v5  ;;  %2493 = vmatprep.mubr.msk.bf16.mxu1 %vm46_vm0, %v2798_v5  ;;  %v2623_v15 = vld [vmem:[%s3600_s5 + $0x48] sm:$0xff]   ;;  %v2624_v16 = vld [vmem:[%s3600_s5 + $0x58] sm:$0xff]   ;;  %v2625_v18 = vld [vmem:[%s3600_s5 + $0x60] sm:$0xff]   ;;  %v3613_v23 = vsub.s32 2, %v2834_v14  ;;  %v950_v28 = vsub.s32 3, %v2834_v14  ;;  %v957_v32 = vsub.s32 4, %v2834_v14 }
   0x6   :  { %v2855_v19 = vld [vmem:[%s3602_s0] sm:$0xff]  ;;  %v2626_v20 = vld [vmem:[%s3600_s5 + $0x70] sm:$0xff]   ;;  %v2627_v24 = vld [vmem:[%s3600_s5 + $0x68] sm:$0xff]   ;;  %v964_v33 = vsub.s32 5, %v2834_v14  ;;  %v971_v37 = vsub.s32 6, %v2834_v14  ;;  %v978_v41 = vsub.s32 7, %v2834_v14 }
   0x7   :  { %2484 = vmatpush3.bf16.msra.mxu0 %v2613_v3  ;;  %2492 = vmatpush3.bf16.msra.mxu1 %v2614_v4  ;;  %v2865_v21 = vrot.slane %v2855_v19, %v3614_v17  ;;  %v2628_v25 = vld [vmem:[%s3600_s5 + $0x78] sm:$0xff]   ;;  %v2884_v26 = vrot.slane %v2855_v19, %v3615_v22  ;;  %v2891_v27 = vrot.slane %v2855_v19, %v3613_v23  ;;  %v623_v29 = vld [vmem:[%s3603_s3 + $0x10] sm:$0xff]  ;;  %v621_v30 = vld [vmem:[%s3603_s3] sm:$0xff]  ;;  %vm1181_vm10 = vcmask 1046534  }
   0x8   :  { %2497 = vmatprep.subr.bf16.mxu0 %v2617_v7  ;;  %2505 = vmatprep.subr.bf16.mxu1 %v2618_v8  ;;  %v951_v31 = vrot.slane %v2855_v19, %v950_v28  ;;  %v958_v34 = vrot.slane %v2855_v19, %v957_v32  ;;  %v619_v35 = vld [vmem:[%s3604_s2 + $0x10] sm:$0xff]  ;;  %v965_v36 = vrot.slane %v2855_v19, %v964_v33  ;;  %v617_v38 = vld [vmem:[%s3604_s2] sm:$0xff]  ;;  %v622_v39 = vld [vmem:[%s3603_s3 + $0x8] sm:$0xff]  ;;  %vm1184_vm11 = vcmask 1047559  }
   0x9   :  { %1283 = vbcast.lane.b32.xlu1 %v2865_v21, 264  ;;  %939 = vbcast.lane.b32.xlu0 %v2865_v21, 256  ;;  %v972_v40 = vrot.slane %v2855_v19, %v971_v37  ;;  %v618_v42 = vld [vmem:[%s3604_s2 + $0x8] sm:$0xff]  ;;  %v624_v43 = vld [vmem:[%s3603_s3 + $0x18] sm:$0xff]  ;;  %v979_v44 = vrot.slane %v2855_v19, %v978_v41  ;;  %v2345_v19 = vld [vmem:[%s3607_s8] ss:$0 sm:$0xff] }
   0xa   :  { %2486 = vmatmul.mubr.msk.bf16.vlgmr.msra.gmra.mrb[0].mxu0 %vm46_vm0, %v2803_v6  ;;  %2494 = vmatmul.mubr.msk.bf16.vlgmr.msra.gmra.mrb[0].mxu1 %vm46_vm0, %v2803_v6  ;;  %v620_v45 = vld [vmem:[%s3604_s2 + $0x18] sm:$0xff]  ;;  %vm48_vm12 = vcmask 31744   ;;  %vm2187_vm13 = vcmask 7168   ;;  %vm2189_vm14 = vcmask 15360   ;;  %vm2191_vm15 = vcmask 23552  }
   0xb   :  { %2498 = vmatpush3.bf16.msra.mxu0 %v2617_v7  ;;  %2506 = vmatpush3.bf16.msra.mxu1 %v2618_v8 }
   0xc   :  { %2499 = vmatprep.subr.bf16.mxu0 %v2619_v9  ;;  %2507 = vmatprep.subr.bf16.mxu1 %v2620_v10 }
   0xd   :  { %2501 = vmatprep.mubr.msk.bf16.mxu0 %vm46_vm0, %v2798_v5  ;;  %2509 = vmatprep.mubr.msk.bf16.mxu1 %vm46_vm0, %v2798_v5 }
   0xe   :  { %932 = vbcast.lane.b32.xlu1 %v2884_v26, 256  ;;  %946 = vbcast.lane.b32.xlu0 %v2891_v27, 256 }
   0xf   :  { %2500 = vmatpush3.bf16.msra.mxu0 %v2619_v9  ;;  %2508 = vmatpush3.bf16.msra.mxu1 %v2620_v10  ;;  %v50_v9 = vld [vmem:[%s3605_s7] sm:$0xf] }
  0x10   :  { %2513 = vmatprep.subr.bf16.mxu0 %v2621_v12  ;;  %2521 = vmatprep.subr.bf16.mxu1 %v2622_v13 }
  0x12   :  { %2502 = vmatmul.mubr.msk.bf16.vlgmr.msra.gmra.mrb[4].mxu0 %vm46_vm0, %v2803_v6  ;;  %2510 = vmatmul.mubr.msk.bf16.vlgmr.msra.gmra.mrb[4].mxu1 %vm46_vm0, %v2803_v6 }
  0x13   :  { %2514 = vmatpush3.bf16.msra.mxu0 %v2621_v12  ;;  %2522 = vmatpush3.bf16.msra.mxu1 %v2622_v13  ;;  %v2970_v12 = vunpack.c.l.bf16 %v50_v9  ;;  %v59_v13 = vand.u32 127, %v53_v11 }
  0x14   :  { %2515 = vmatprep.subr.bf16.mxu0 %v2623_v15  ;;  %2523 = vmatprep.subr.bf16.mxu1 %v2624_v16 }
  0x15   :  { %2517 = vmatprep.mubr.msk.bf16.mxu0 %vm46_vm0, %v2798_v5  ;;  %2525 = vmatprep.mubr.msk.bf16.mxu1 %vm46_vm0, %v2798_v5  ;;  %vm62_vm3 = vcmp.eq.s32.totalorder %v2834_v14, %v59_v13 }
  0x16   :  { %1287 = vbcast.lane.b32.xlu1 %v2891_v27, 264  ;;  %953 = vbcast.lane.b32.xlu0 %v951_v31, 256 }
  0x17   :  { %2516 = vmatpush3.bf16.msra.mxu0 %v2623_v15  ;;  %2524 = vmatpush3.bf16.msra.mxu1 %v2624_v16  ;;  %v924_v15 = vld [vmem:[%s3606_s1 + $0x8] sm:$0xff]  ;;  %v923_v16 = vld [vmem:[%s3606_s1] sm:$0xff] }
  0x18   :  { %2529 = vmatprep.subr.bf16.mxu0 %v2625_v18  ;;  %2537 = vmatprep.subr.bf16.mxu1 %v2626_v20 }
  0x1a   :  { %2518 = vmatmul.mubr.msk.bf16.vlgmr.msra.gmra.mrb[8].mxu0 %vm46_vm0, %v2803_v6  ;;  %2526 = vmatmul.mubr.msk.bf16.vlgmr.msra.gmra.mrb[8].mxu1 %vm46_vm0, %v2803_v6 }
  0x1b   :  { %2530 = vmatpush3.bf16.msra.mxu0 %v2625_v18  ;;  %2538 = vmatpush3.bf16.msra.mxu1 %v2626_v20  ;;  %v2983_v20 = vrot.slane %v2970_v12, 1 }
  0x1c   :  { %2531 = vmatprep.subr.bf16.mxu0 %v2627_v24  ;;  %2539 = vmatprep.subr.bf16.mxu1 %v2628_v25 }
  0x1d   :  { %2533 = vmatprep.mubr.msk.bf16.mxu0 %vm46_vm0, %v2798_v5  ;;  %2541 = vmatprep.mubr.msk.bf16.mxu1 %vm46_vm0, %v2798_v5 }
  0x1e   :  { %1279 = vbcast.lane.b32.xlu1 %v2884_v26, 264  ;;  %960 = vbcast.lane.b32.xlu0 %v958_v34, 256 }
  0x1f   :  { %2532 = vmatpush3.bf16.msra.mxu0 %v2627_v24  ;;  %2540 = vmatpush3.bf16.msra.mxu1 %v2628_v25  ;;  %v2989_v25 = vrot.slane %v2970_v12, 2 }
  0x20   :  { %2555 = vmatprep.subr.mxu0 %v3616_v1  ;;  %2545 = vmatprep.subr.mxu1 %v3616_v1 }
  0x22   :  { %2534 = vmatmul.mubr.msk.bf16.vlgmr.msra.gmra.mrb[12].mxu0 %vm46_vm0, %v2803_v6  ;;  %2542 = vmatmul.mubr.msk.bf16.vlgmr.msra.gmra.mrb[12].mxu1 %vm46_vm0, %v2803_v6 }
  0x23   :  { %2556 = vmatpush3.msra.mxu0 %v623_v29  ;;  %2546 = vmatpush3.msra.mxu1 %v621_v30  ;;  %v925_v30 = vld [vmem:[%s3606_s1 + $0x10] sm:$0xff] }
  0x24   :  { %2547 = vmatprep.mubr.msk.f32.mxu1 %vm2708_vm1, %v3616_v1  ;;  %2557 = vmatprep.mubr.msk.f32.mxu0 %vm2708_vm1, %v3616_v1 }
  0x25   :  { %2550 = vmatprep.subr.mxu1 %v3616_v1  ;;  %2565 = vmatprep.subr.bf16.mxu0 %v3616_v1 }
  0x26   :  { %967 = vbcast.lane.b32.xlu1 %v965_v36, 256  ;;  %1291 = vbcast.lane.b32.xlu0 %v951_v31, 264 }
  0x2a   :  { %2558 = vmatmul.mubr.msk.f32.vlgmr.msra.gmra.mrb[16].mxu0 %vm625_vm2, %v619_v35  ;;  %2548 = vmatmul.mubr.msk.f32.vlgmr.msra.gmra.mrb[16].mxu1 %vm625_vm2, %v617_v38  ;;  %v926_v35 = vld [vmem:[%s3606_s1 + $0x18] sm:$0xff] }
  0x2b   :  { %2551 = vmatpush3.msra.mxu1 %v622_v39  ;;  %2552 = vmatprep.mubr.msk.f32.mxu1 %vm2708_vm1, %v3616_v1 }
  0x2c   :  { %2560 = vmatprep.subr.mxu1 %v3616_v1  ;;  %2567 = vmatprep.mubr.msk.bf16.mxu0 %vm2708_vm1, %v3616_v1 }
  0x2d   :  { %974 = vbcast.lane.b32.xlu1 %v972_v40, 256  ;;  %1295 = vbcast.lane.b32.xlu0 %v958_v34, 264 }
  0x2e   :  { %2553 = vmatmul.mubr.msk.f32.vlgmr.msra.gmra.mrb[18].mxu1 %vm625_vm2, %v618_v42 }
  0x2f   :  { %2561 = vmatpush3.msra.mxu1 %v624_v43  ;;  %2562 = vmatprep.mubr.msk.f32.mxu1 %vm2708_vm1, %v3616_v1 }
  0x30   :  { %2571 = vmatprep.subr.bf16.mxu1 %v3616_v1 }
  0x31   :  { %981 = vbcast.lane.b32.xlu1 %v979_v44, 256  ;;  %1299 = vbcast.lane.b32.xlu0 %v965_v36, 264 }
  0x32   :  { %2563 = vmatmul.mubr.msk.f32.vlgmr.msra.gmra.mrb[20].mxu1 %vm625_vm2, %v620_v45 }
  0x33   :  { %2573 = vmatprep.mubr.msk.bf16.mxu1 %vm2708_vm1, %v3616_v1 }
  0x35   :  { %1307 = vbcast.lane.b32.xlu1 %v979_v44, 264  ;;  %1303 = vbcast.lane.b32.xlu0 %v972_v40, 264 }
  0x39   :  { %1590 = vbcast.lane.b32.xlu1 %v2891_v27, 272  ;;  %1586 = vbcast.lane.b32.xlu0 %v2865_v21, 272 }
  0x3d   :  { %1582 = vbcast.lane.b32.xlu1 %v2884_v26, 272  ;;  %1889 = vbcast.lane.b32.xlu0 %v2865_v21, 280 }
  0x41   :  { %1893 = vbcast.lane.b32.xlu1 %v2891_v27, 280  ;;  %1594 = vbcast.lane.b32.xlu0 %v951_v31, 272 }
  0x45   :  { %1885 = vbcast.lane.b32.xlu1 %v2884_v26, 280  ;;  %1598 = vbcast.lane.b32.xlu0 %v958_v34, 272 }
  0x49   :  { %1602 = vbcast.lane.b32.xlu1 %v965_v36, 272  ;;  %1897 = vbcast.lane.b32.xlu0 %v951_v31, 280  ;;  %v72_v31 = vsub.f32 %v2345_v19, %v2970_v12 }
  0x4d   :  { %1606 = vbcast.lane.b32.xlu1 %v972_v40, 272  ;;  %1901 = vbcast.lane.b32.xlu0 %v958_v34, 280 }
  0x51   :  { %1610 = vbcast.lane.b32.xlu1 %v979_v44, 272  ;;  %1905 = vbcast.lane.b32.xlu0 %v965_v36, 280  ;;  %v2344_v36 = vsel %vm62_vm3, 1.0, %v3616_v1  ;;  %vm2212_vm3 = vcmask 195584  }
  0x55   :  { %1913 = vbcast.lane.b32.xlu1 %v979_v44, 280  ;;  %1909 = vbcast.lane.b32.xlu0 %v972_v40, 280 }
  0x7b   :  { %v1284_v46 = vpop.permute.xlu1 %1283  ;;  %v940_v47 = vpop.permute.xlu0 %939 }
  0x7c   :  { %v2986_v21 = vmul.f32 %v1284_v46, %v924_v15  ;;  %v984_v11 = vmul.f32 %v940_v47, %v923_v16 }
  0x80   :  { %v933_v48 = vpop.permute.xlu1 %932  ;;  %v947_v49 = vpop.permute.xlu0 %946 }
  0x81   :  { %v983_v24 = vmul.f32 %v933_v48, %v923_v16  ;;  %v2991_v27 = vmul.f32 %v947_v49, %v923_v16  ;;  %v3027_v49 = vsub.f32 %v72_v31, %v2344_v36 }
  0x88   :  { %v1288_v50 = vpop.permute.xlu1 %1287  ;;  %v954_v51 = vpop.permute.xlu0 %953 }
  0x89   :  { %v2993_v28 = vmul.f32 %v1288_v50, %v924_v15  ;;  %v2995_v29 = vmul.f32 %v954_v51, %v923_v16 }
  0x90   :  { %v1280_v52 = vpop.permute.xlu1 %1279  ;;  %v961_v53 = vpop.permute.xlu0 %960 }
  0x91   :  { %v3001_v32 = vmul.f32 %v1280_v52, %v924_v15  ;;  %v3003_v33 = vmul.f32 %v961_v53, %v923_v16 }
  0x98   :  { %v968_v54 = vpop.permute.xlu1 %967  ;;  %v1292_v55 = vpop.permute.xlu0 %1291 }
  0x99   :  { %v3005_v34 = vmul.f32 %v968_v54, %v923_v16  ;;  %v3011_v37 = vmul.f32 %v1292_v55, %v924_v15 }
  0x9f   :  { %v975_v56 = vpop.permute.xlu1 %974  ;;  %v1296_v57 = vpop.permute.xlu0 %1295 }
  0xa0   :  { %v3013_v38 = vmul.f32 %v975_v56, %v923_v16  ;;  %v3015_v39 = vmul.f32 %v1296_v57, %v924_v15 }
  0xa3   :  { %v982_v58 = vpop.permute.xlu1 %981  ;;  %v1300_v59 = vpop.permute.xlu0 %1299 }
  0xa4   :  { %v3017_v40 = vmul.f32 %v982_v58, %v923_v16  ;;  %v3019_v42 = vmul.f32 %v1300_v59, %v924_v15 }
  0xa7   :  { %v1308_v60 = vpop.permute.xlu1 %1307  ;;  %v1304_v61 = vpop.permute.xlu0 %1303 }
  0xa8   :  { %v3021_v43 = vmul.f32 %v1308_v60, %v924_v15  ;;  %v3023_v44 = vmul.f32 %v1304_v61, %v924_v15 }
  0xaa   :  { %3627 = vst [vmem:[#allocation5_spill] sm:$0xff] %v3021_v43  ;;  %3628 = vst [vmem:[#allocation6_spill] sm:$0xff] %v3023_v44 }
  0xab   :  { %v1591_v62 = vpop.permute.xlu1 %1590  ;;  %v1587_v63 = vpop.permute.xlu0 %1586 }
  0xac   :  { %v3025_v46 = vmul.f32 %v1591_v62, %v925_v30  ;;  %v1613_v47 = vmul.f32 %v1587_v63, %v925_v30 }
  0xaf   :  { %v1583_v0 = vpop.permute.xlu1 %1582  ;;  %v1890_v2 = vpop.permute.xlu0 %1889 }
  0xb0   :  { %v1612_v45 = vmul.f32 %v1583_v0, %v925_v30  ;;  %v1916_v48 = vmul.f32 %v1890_v2, %v926_v35 }
  0xb3   :  { %v1894_v3 = vpop.permute.xlu1 %1893  ;;  %v1595_v4 = vpop.permute.xlu0 %1594 }
  0xb4   :  { %v3029_v50 = vmul.f32 %v1894_v3, %v926_v35  ;;  %v3031_v51 = vmul.f32 %v1595_v4, %v925_v30  ;;  %v3048_v3 = vrot.slane %v2970_v12, 3 }
  0xb6   :  { %3629 = vst [vmem:[#allocation7_spill] sm:$0xff] %v3048_v3 }
  0xb7   :  { %v1886_v5 = vpop.permute.xlu1 %1885  ;;  %v1599_v6 = vpop.permute.xlu0 %1598 }
  0xb8   :  { %v1915_v52 = vmul.f32 %v1886_v5, %v926_v35  ;;  %v3033_v53 = vmul.f32 %v1599_v6, %v925_v30 }
  0xbb   :  { %v1603_v7 = vpop.permute.xlu1 %1602  ;;  %v1898_v8 = vpop.permute.xlu0 %1897 }
  0xbc   :  { %v3035_v56 = vmul.f32 %v1898_v8, %v926_v35  ;;  %v3039_v58 = vmul.f32 %v1603_v7, %v925_v30 }
  0xbf   :  { %v1607_v10 = vpop.permute.xlu1 %1606  ;;  %v1902_v18 = vpop.permute.xlu0 %1901 }
  0xc0   :  { %v3037_v57 = vmul.f32 %v1902_v18, %v926_v35  ;;  %v3041_v59 = vmul.f32 %v1607_v10, %v925_v30 }
  0xc3   :  { %v1611_v26 = vpop.permute.xlu1 %1610  ;;  %v1906_v41 = vpop.permute.xlu0 %1905 }
  0xc4   :  { %v3043_v0 = vmul.f32 %v1906_v41, %v926_v35  ;;  %v3045_v2 = vmul.f32 %v1611_v26, %v925_v30 }
  0xc7   :  { %v1914_v54 = vpop.permute.xlu1 %1913  ;;  %v1910_v60 = vpop.permute.xlu0 %1909 }
  0xc8   :  { %v3050_v9 = vmul.f32 %v1914_v54, %v926_v35  ;;  %v3054_v19 = vmul.f32 %v1910_v60, %v926_v35 }
  0xca   :  { %3630 = vst [vmem:[#allocation8_spill] sm:$0xff] %v3050_v9  ;;  %3631 = vst [vmem:[#allocation9_spill] sm:$0xff] %v3054_v19 }
  0xdd   :  { %v2487_v55 = vpop.f32.mrb[0].mxu0  ;;  %v2495_v62 = vpop.f32.mrb[0].mxu1 }
  0xde   :  { %v1620_v61 = vmul.f32 %v2487_v55, %v1612_v45  ;;  %v175_v63 = vpop.f32.mrb[1].mxu0  ;;  %v1621_v4 = vmul.f32 %v2495_v62, %v1613_v47  ;;  %v236_v6 = vpop.f32.mrb[1].mxu1 }
  0xdf   :  { %v991_v5 = vmul.f32 %v983_v24, %v175_v63  ;;  %v2488_v8 = vpop.f32.mrb[2].mxu0  ;;  %v992_v13 = vmul.f32 %v984_v11, %v236_v6  ;;  %v2496_v16 = vpop.f32.mrb[2].mxu1 }
  0xe0   :  { %v1628_v10 = vsel %vm625_vm2, %v1620_v61, 0.0  ;;  %v1923_v15 = vmul.f32 %v2488_v8, %v1915_v52  ;;  %v178_v18 = vpop.f32.mrb[3].mxu0  ;;  %v1635_v30 = vsel %vm625_vm2, %v1621_v4, 0.0  ;;  %v1924_v24 = vmul.f32 %v2496_v16, %v1916_v48  ;;  %v239_v36 = vpop.f32.mrb[3].mxu1 }
  0xe1   :  { %v1629_v26 = vrot.slane %v1628_v10, 4  ;;  %v999_v31 = vsel %vm625_vm2, %v991_v5, 0.0  ;;  %v1636_v41 = vrot.slane %v1635_v30, 4  ;;  %v1006_v47 = vsel %vm625_vm2, %v992_v13, 0.0 }
  0xe2   :  { %v1000_v45 = vrot.slane %v999_v31, 4  ;;  %v1931_v54 = vsel %vm625_vm2, %v1923_v15, 0.0  ;;  %v1007_v11 = vrot.slane %v1006_v47, 4  ;;  %v1938_v61 = vsel %vm625_vm2, %v1924_v24, 0.0 }
  0xe3   :  { %v1630_v55 = vadd.f32 %v1629_v26, %v1628_v10  ;;  %v1932_v52 = vrot.slane %v1931_v54, 4  ;;  %v1637_v35 = vadd.f32 %v1636_v41, %v1635_v30  ;;  %v1939_v62 = vrot.slane %v1938_v61, 4 }
  0xe4   :  { %v1001_v60 = vadd.f32 %v1000_v45, %v999_v31  ;;  %v1317_v63 = vmul.f32 %v3001_v32, %v178_v18  ;;  %v1008_v5 = vadd.f32 %v1007_v11, %v1006_v47  ;;  %v1318_v6 = vmul.f32 %v2986_v21, %v239_v36 }
  0xe5   :  { %v1631_v4 = vrot.slane %v1630_v55, 2  ;;  %v1933_v48 = vadd.f32 %v1932_v52, %v1931_v54  ;;  %v3063_v8 = vpop.f32.mrb[4].mxu0  ;;  %v1638_v13 = vrot.slane %v1637_v35, 2  ;;  %v1940_v15 = vadd.f32 %v1939_v62, %v1938_v61  ;;  %v3066_v26 = vpop.f32.mrb[4].mxu1 }
  0xe6   :  { %v1002_v16 = vrot.slane %v1001_v60, 2  ;;  %v1325_v10 = vsel %vm625_vm2, %v1317_v63, 0.0  ;;  %v3068_v24 = vpop.f32.mrb[5].mxu0  ;;  %v1009_v31 = vrot.slane %v1008_v5, 2  ;;  %v3070_v18 = vpop.f32.mrb[5].mxu1  ;;  %v1332_v54 = vsel %vm625_vm2, %v1318_v6, 0.0 }
  0xe7   :  { %v1632_v30 = vadd.f32 %v1631_v4, %v1630_v55  ;;  %v1934_v41 = vrot.slane %v1933_v48, 2  ;;  %v1326_v32 = vrot.slane %v1325_v10, 4  ;;  %v3072_v45 = vpop.f32.mrb[6].mxu0  ;;  %v1639_v21 = vadd.f32 %v1638_v13, %v1637_v35  ;;  %v3075_v11 = vpop.f32.mrb[6].mxu1 }
  0xe8   :  { %v1003_v36 = vadd.f32 %v1002_v16, %v1001_v60  ;;  %v1941_v47 = vrot.slane %v1940_v15, 2  ;;  %v3077_v52 = vpop.f32.mrb[7].mxu0  ;;  %v1010_v62 = vadd.f32 %v1009_v31, %v1008_v5  ;;  %v3079_v4 = vpop.f32.mrb[7].mxu1  ;;  %v1333_v1 = vrot.slane %v1332_v54, 4 }
  0xe9   :  { %v1633_v61 = vrot.slane %v1632_v30, 1  ;;  %v1935_v63 = vadd.f32 %v1934_v41, %v1933_v48  ;;  %v1327_v55 = vadd.f32 %v1326_v32, %v1325_v10  ;;  %v1640_v23 = vrot.slane %v1639_v21, 1 }
  0xea   :  { %v1004_v17 = vrot.slane %v1003_v36, 1  ;;  %v1942_v22 = vadd.f32 %v1941_v47, %v1940_v15  ;;  %v1011_v35 = vrot.slane %v1010_v62, 1  ;;  %v1334_v3 = vadd.f32 %v1333_v1, %v1332_v54 }
  0xeb   :  { %v1634_v7 = vadd.f32 %v1633_v61, %v1632_v30  ;;  %v1936_v60 = vrot.slane %v1935_v63, 1  ;;  %v1328_v13 = vrot.slane %v1327_v55, 2  ;;  %v1641_v16 = vadd.f32 %v1640_v23, %v1639_v21 }
  0xec   :  { %v1005_v6 = vadd.f32 %v1004_v17, %v1003_v36  ;;  %v1943_v14 = vrot.slane %v1942_v22, 1  ;;  %v1012_v44 = vadd.f32 %v1011_v35, %v1010_v62  ;;  %v1335_v32 = vrot.slane %v1334_v3, 2 }
  0xed   :  { %v1684_v43 = vmul.f32 0.35355338, %v1634_v7  ;;  %v1937_v9 = vadd.f32 %v1936_v60, %v1935_v63  ;;  %v1329_v5 = vadd.f32 %v1328_v13, %v1327_v55  ;;  %v3081_v48 = vpop.f32.mrb[8].mxu0  ;;  %v1685_v10 = vmul.f32 0.35355338, %v1641_v16  ;;  %v3083_v15 = vpop.f32.mrb[8].mxu1 }
  0xee   :  { %v1055_v31 = vmul.f32 0.35355338, %v1005_v6  ;;  %v1944_v41 = vadd.f32 %v1943_v14, %v1942_v22  ;;  %v1056_v47 = vmul.f32 0.35355338, %v1012_v44  ;;  %v1336_v1 = vadd.f32 %v1335_v32, %v1334_v3  ;;  %v3085_v7 = vpop.f32.mrb[9].mxu0  ;;  %v3087_v36 = vpop.f32.mrb[9].mxu1 }
  0xef   :  { %v2405_v30 = vclamps-f32 %v1684_v43, 5.0  ;;  %v1987_v61 = vmul.f32 0.35355338, %v1937_v9  ;;  %v1330_v19 = vrot.slane %v1329_v5, 1  ;;  %v2406_v23 = vclamps-f32 %v1685_v10, 5.0  ;;  %v3089_v14 = vpop.f32.mrb[10].mxu0 }
  0xf0   :  { %v2384_v17 = vclamps-f32 %v1055_v31, 5.0  ;;  %v1988_v21 = vmul.f32 0.35355338, %v1944_v41  ;;  %v2385_v62 = vclamps-f32 %v1056_v47, 5.0  ;;  %v3091_v22 = vpop.f32.mrb[10].mxu1  ;;  %v1337_v35 = vrot.slane %v1336_v1, 1 }
  0xf1   :  { %v1708_v54 = vmul.f32 1.442695, %v2405_v30  ;;  %v2416_v63 = vclamps-f32 %v1987_v61, 5.0  ;;  %v1331_v55 = vadd.f32 %v1330_v19, %v1329_v5  ;;  %v1710_v43 = vmul.f32 1.442695, %v2406_v23  ;;  %v3095_v31 = vpop.f32.mrb[11].mxu0 }
  0xf2   :  { %v1079_v44 = vmul.f32 1.442695, %v2384_v17  ;;  %v2417_v9 = vclamps-f32 %v1988_v21, 5.0  ;;  %v1081_v60 = vmul.f32 1.442695, %v2385_v62  ;;  %v1338_v6 = vadd.f32 %v1337_v35, %v1336_v1  ;;  %v3097_v19 = vpop.f32.mrb[11].mxu1 }
  0xf3   :  { %2631 = vpow2.f32 %v1708_v54  ;;  %v2011_v13 = vmul.f32 1.442695, %v2416_v63  ;;  %v1381_v3 = vmul.f32 0.35355338, %v1331_v55  ;;  %v1622_v10 = vmul.f32 %v3063_v8, %v3025_v46 }
  0xf4   :  { %2633 = vpow2.f32 %v1710_v43  ;;  %v2013_v16 = vmul.f32 1.442695, %v2417_v9  ;;  %v1623_v41 = vmul.f32 %v3066_v26, %v3031_v51  ;;  %v993_v32 = vmul.f32 %v2991_v27, %v3068_v24 }
  0xf5   :  { %2635 = vpow2.f32 %v1079_v44  ;;  %v2394_v5 = vclamps-f32 %v1381_v3, 5.0  ;;  %v3103_v30 = vpop.f32.mrb[12].mxu0  ;;  %v1382_v47 = vmul.f32 0.35355338, %v1338_v6  ;;  %v1642_v61 = vsel %vm625_vm2, %v1622_v10, 0.0  ;;  %v3108_v8 = vpop.f32.mrb[12].mxu1 }
  0xf6   :  { %2637 = vpow2.f32 %v1081_v60  ;;  %v994_v46 = vmul.f32 %v2995_v29, %v3070_v18  ;;  %v3110_v23 = vpop.f32.mrb[13].mxu0  ;;  %v1643_v21 = vrot.slane %v1642_v61, 4  ;;  %v1649_v51 = vsel %vm625_vm2, %v1623_v41, 0.0  ;;  %v3113_v26 = vpop.f32.mrb[13].mxu1 }
  0xf7   :  { %2639 = vpow2.f32 %v2011_v13  ;;  %v1405_v17 = vmul.f32 1.442695, %v2394_v5  ;;  %v3115_v27 = vpop.f32.mrb[14].mxu0  ;;  %v2395_v24 = vclamps-f32 %v1382_v47, 5.0  ;;  %v1650_v1 = vrot.slane %v1649_v51, 4  ;;  %v3118_v62 = vpop.f32.mrb[14].mxu1 }
  0xf8   :  { %2641 = vpow2.f32 %v2013_v16  ;;  %v1013_v54 = vsel %vm625_vm2, %v993_v32, 0.0  ;;  %v3120_v29 = vpop.f32.mrb[15].mxu0  ;;  %v1644_v18 = vadd.f32 %v1643_v21, %v1642_v61  ;;  %v1020_v55 = vsel %vm625_vm2, %v994_v46, 0.0  ;;  %v3123_v43 = vpop.f32.mrb[15].mxu1 }
  0xf9   :  { %v1014_v63 = vrot.slane %v1013_v54, 4  ;;  %v3126_v44 = vrot.slane %v2970_v12, 4  ;;  %v1407_v9 = vmul.f32 1.442695, %v2395_v24  ;;  %v1651_v35 = vadd.f32 %v1650_v1, %v1649_v51 }
  0xfa   :  { %v1021_v60 = vrot.slane %v1020_v55, 4  ;;  %v1925_v13 = vmul.f32 %v3072_v45, %v3029_v50  ;;  %2643 = vpow2.f32 %v1405_v17  ;;  %v1645_v3 = vrot.slane %v1644_v18, 2 }
  0xfb   :  { %3632 = vst [vmem:[#allocation10_spill] sm:$0xff] %v3126_v44  ;;  %v1015_v16 = vadd.f32 %v1014_v63, %v1013_v54  ;;  %v1926_v6 = vmul.f32 %v3075_v11, %v3035_v56  ;;  %2645 = vpow2.f32 %v1407_v9  ;;  %v1652_v10 = vrot.slane %v1651_v35, 2 }
  0xfc   :  { %v1022_v5 = vadd.f32 %v1021_v60, %v1020_v55  ;;  %v1945_v41 = vsel %vm625_vm2, %v1925_v13, 0.0  ;;  %v1646_v47 = vadd.f32 %v1645_v3, %v1644_v18  ;;  %v3136_v51 = vrot.slane %v2970_v12, 5 }
  0xfd   :  { %v2632_v32 = vpop.eup %2631  ;;  %v1016_v61 = vrot.slane %v1015_v16, 2  ;;  %v1946_v46 = vrot.slane %v1945_v41, 4  ;;  %v3133_v21 = vpop.f32.mrb[16].mxu0  ;;  %v1653_v45 = vadd.f32 %v1652_v10, %v1651_v35  ;;  %v3635_v24 = vmax.f32 %v3027_v49, 0.0 }
  0xfe   :  { %3633 = vst [vmem:[#allocation11_spill] sm:$0xff] %v3133_v21  ;;  %3634 = vst [vmem:[#allocation12_spill] sm:$0xff] %v3136_v51  ;;  %v2634_v50 = vpop.eup %2633  ;;  %v1023_v17 = vrot.slane %v1022_v5, 2  ;;  %v3142_v11 = vpop.f32.mrb[16].mxu1  ;;  %v3145_v54 = vrot.slane %v2970_v12, 6  ;;  %v1724_v63 = vmul.f32 %v2632_v32, %v2970_v12  ;;  %v1647_v55 = vrot.slane %v1646_v47, 1 }
  0xff   :  { %v3140_v56 = vmin.f32 %v3635_v24, 1.0  ;;  %3637 = vst [vmem:[#allocation14_spill] sm:$0xff] %v3142_v11  ;;  %v2559_v1 = vpop.f32.mrb[17].mxu0  ;;  %v2636_v18 = vpop.eup %2635  ;;  %v1017_v9 = vadd.f32 %v1016_v61, %v1015_v16  ;;  %v1952_v60 = vsel %vm625_vm2, %v1926_v6, 0.0  ;;  %v1725_v3 = vmul.f32 %v2634_v50, %v2983_v20 }
 0x100   :  { %3638 = vst [vmem:[#allocation15_spill] sm:$0xff] %v3145_v54  ;;  %v2549_v13 = vpop.f32.mrb[17].mxu1  ;;  %v2638_v35 = vpop.eup %2637  ;;  %v1654_v49 = vrot.slane %v1653_v45, 1  ;;  %v1024_v10 = vadd.f32 %v1023_v17, %v1022_v5  ;;  %v3151_v24 = vrot.slane %v2970_v12, 7  ;;  %v1947_v54 = vadd.f32 %v1946_v46, %v1945_v41 }
 0x101   :  { %3636 = vst [vmem:[#allocation13_spill] sm:$0xff] %v3140_v56  ;;  %v2640_v1 = vpop.eup %2639  ;;  %v1648_v56 = vadd.f32 %v1647_v55, %v1646_v47  ;;  %v1018_v51 = vrot.slane %v1017_v9, 1  ;;  %v1319_v32 = vmul.f32 %v2993_v28, %v3077_v52  ;;  %v1111_v16 = vmul.f32 %v2636_v18, %v2970_v12  ;;  %v3156_v21 = vpop.f32.mrb[18].mxu1 }
 0x102   :  { %3639 = vst [vmem:[#allocation16_spill] sm:$0xff] %v3151_v24  ;;  %v2642_v44 = vpop.eup %2641  ;;  %v1655_v6 = vadd.f32 %v1654_v49, %v1653_v45  ;;  %v1025_v61 = vrot.slane %v1024_v10, 1  ;;  %v1953_v13 = vrot.slane %v1952_v60, 4  ;;  %3640 = vst [vmem:[#allocation17_spill] sm:$0xff] %v3156_v21  ;;  %v3158_v50 = vmul.f32 0.90909094, %v1724_v63 }
 0x103   :  { %v1112_v5 = vmul.f32 %v2638_v35, %v2983_v20  ;;  %v1686_v17 = vmul.f32 0.35355338, %v1648_v56  ;;  %v1019_v24 = vadd.f32 %v1018_v51, %v1017_v9  ;;  %v2554_v47 = vpop.f32.mrb[19].mxu1  ;;  %v3161_v55 = vmul.f32 0.90909094, %v1725_v3 }
 0x104   :  { %3641 = vst [vmem:[#allocation18_spill] sm:$0xff] %v3158_v50  ;;  %v2027_v41 = vmul.f32 %v2640_v1, %v2970_v12  ;;  %v1687_v28 = vmul.f32 0.35355338, %v1655_v6  ;;  %v1026_v52 = vadd.f32 %v1025_v61, %v1024_v10  ;;  %v2644_v46 = vpop.eup %2643  ;;  %v2028_v45 = vmul.f32 %v2642_v44, %v2983_v20 }
 0x105   :  { %v2407_v18 = vclamps-f32 %v1686_v17, 5.0  ;;  %v1057_v49 = vmul.f32 0.35355338, %v1019_v24  ;;  %v1948_v11 = vrot.slane %v1947_v54, 2  ;;  %v2646_v21 = vpop.eup %2645  ;;  %v3165_v63 = vmul.f32 0.90909094, %v1111_v16 }
 0x106   :  { %v2408_v50 = vclamps-f32 %v1687_v28, 5.0  ;;  %v1058_v35 = vmul.f32 0.35355338, %v1026_v52  ;;  %v1954_v56 = vadd.f32 %v1953_v13, %v1952_v60  ;;  %v3167_v51 = vpop.f32.mrb[20].mxu1  ;;  %v3169_v9 = vmul.f32 0.90909094, %v1112_v5 }
 0x107   :  { %v1712_v3 = vmul.f32 1.442695, %v2407_v18  ;;  %v2386_v1 = vclamps-f32 %v1057_v49, 5.0  ;;  %v1949_v6 = vadd.f32 %v1948_v11, %v1947_v54  ;;  %v2564_v10 = vpop.f32.mrb[21].mxu1  ;;  %v3171_v61 = vmul.f32 0.90909094, %v2027_v41 }
 0x108   :  { %v2387_v44 = vclamps-f32 %v1058_v35, 5.0  ;;  %v1955_v17 = vrot.slane %v1954_v56, 2  ;;  %v1339_v24 = vsel %vm625_vm2, %v1319_v32, 0.0  ;;  %v3174_v47 = vmul.f32 0.90909094, %v2028_v45 }
 0x109   :  { %v1421_v16 = vmul.f32 %v2644_v46, %v2970_v12  ;;  %v1422_v60 = vmul.f32 %v2646_v21, %v2983_v20  ;;  %v1950_v13 = vrot.slane %v1949_v6, 1  ;;  %2647 = vpow2.f32 %v1712_v3 }
 0x10a   :  { %v1714_v5 = vmul.f32 1.442695, %v2408_v50  ;;  %v1956_v28 = vadd.f32 %v1955_v17, %v1954_v56  ;;  %v1340_v52 = vrot.slane %v1339_v24, 4  ;;  %v1083_v18 = vmul.f32 1.442695, %v2386_v1 }
 0x10b   :  { %v1951_v11 = vadd.f32 %v1950_v13, %v1949_v6  ;;  %v1320_v54 = vmul.f32 %v3011_v37, %v3079_v4  ;;  %v1624_v41 = vmul.f32 %v3081_v48, %v3033_v53  ;;  %v1085_v32 = vmul.f32 1.442695, %v2387_v44 }
 0x10c   :  { %v1957_v45 = vrot.slane %v1956_v28, 1  ;;  %v1341_v49 = vadd.f32 %v1340_v52, %v1339_v24  ;;  %v1625_v12 = vmul.f32 %v3083_v15, %v3039_v58  ;;  %v995_v46 = vmul.f32 %v3003_v33, %v3085_v7 }
 0x10d   :  { %v1989_v20 = vmul.f32 0.35355338, %v1951_v11  ;;  %v1346_v21 = vsel %vm625_vm2, %v1320_v54, 0.0  ;;  %v1656_v50 = vsel %vm625_vm2, %v1624_v41, 0.0  ;;  %v996_v58 = vmul.f32 %v3005_v34, %v3087_v36 }
 0x10e   :  { %v1958_v35 = vadd.f32 %v1957_v45, %v1956_v28  ;;  %v1342_v56 = vrot.slane %v1341_v49, 2  ;;  %v1347_v37 = vrot.slane %v1346_v21, 4  ;;  %v1657_v4 = vrot.slane %v1656_v50, 4 }
 0x10f   :  { %v2418_v3 = vclamps-f32 %v1989_v20, 5.0  ;;  %v1663_v53 = vsel %vm625_vm2, %v1625_v12, 0.0  ;;  %v1027_v48 = vsel %vm625_vm2, %v995_v46, 0.0  ;;  %2649 = vpow2.f32 %v1083_v18 }
 0x110   :  { %v1343_v15 = vadd.f32 %v1342_v56, %v1341_v49  ;;  %v1348_v1 = vadd.f32 %v1347_v37, %v1346_v21  ;;  %v1658_v6 = vadd.f32 %v1657_v4, %v1656_v50  ;;  %v1664_v44 = vrot.slane %v1663_v53, 4 }
 0x111   :  { %v2015_v10 = vmul.f32 1.442695, %v2418_v3  ;;  %v1028_v17 = vrot.slane %v1027_v48, 4  ;;  %v1034_v33 = vsel %vm625_vm2, %v996_v58, 0.0  ;;  %v1990_v7 = vmul.f32 0.35355338, %v1958_v35 }
 0x112   :  { %v1344_v24 = vrot.slane %v1343_v15, 1  ;;  %v1349_v13 = vrot.slane %v1348_v1, 2  ;;  %v1659_v28 = vrot.slane %v1658_v6, 2  ;;  %2651 = vpow2.f32 %v1714_v5 }
 0x113   :  { %v1665_v52 = vadd.f32 %v1664_v44, %v1663_v53  ;;  %v1029_v11 = vadd.f32 %v1028_v17, %v1027_v48  ;;  %v1035_v54 = vrot.slane %v1034_v33, 4  ;;  %v2648_v41 = vpop.eup %2647  ;;  %v3193_v45 = vmul.f32 0.90909094, %v1421_v16 }
 0x114   :  { %2653 = vpow2.f32 %v2015_v10  ;;  %v1345_v34 = vadd.f32 %v1344_v24, %v1343_v15  ;;  %v1350_v36 = vadd.f32 %v1349_v13, %v1348_v1  ;;  %v1660_v18 = vadd.f32 %v1659_v28, %v1658_v6 }
 0x115   :  { %v1666_v49 = vrot.slane %v1665_v52, 2  ;;  %v1030_v12 = vrot.slane %v1029_v11, 2  ;;  %v1036_v20 = vadd.f32 %v1035_v54, %v1034_v33  ;;  %v3195_v21 = vmul.f32 0.90909094, %v1422_v60 }
 0x116   :  { %2655 = vpow2.f32 %v1085_v32  ;;  %v2419_v50 = vclamps-f32 %v1990_v7, 5.0  ;;  %v1383_v46 = vmul.f32 0.35355338, %v1345_v34  ;;  %v1351_v35 = vrot.slane %v1350_v36, 1 }
 0x117   :  { %v1661_v5 = vrot.slane %v1660_v18, 1  ;;  %v1667_v56 = vadd.f32 %v1666_v49, %v1665_v52  ;;  %v1031_v37 = vadd.f32 %v1030_v12, %v1029_v11  ;;  %v1726_v4 = vmul.f32 %v2648_v41, %v2989_v25 }
 0x118   :  { %v2396_v16 = vclamps-f32 %v1383_v46, 5.0  ;;  %v1037_v3 = vrot.slane %v1036_v20, 2  ;;  %v1927_v53 = vmul.f32 %v3089_v14, %v3037_v57  ;;  %v1352_v48 = vadd.f32 %v1351_v35, %v1350_v36 }
 0x119   :  { %v1662_v58 = vadd.f32 %v1661_v5, %v1660_v18  ;;  %v1668_v15 = vrot.slane %v1667_v56, 1  ;;  %v1032_v1 = vrot.slane %v1031_v37, 1  ;;  %v2650_v60 = vpop.eup %2649  ;;  %v2017_v6 = vmul.f32 1.442695, %v2419_v50 }
 0x11a   :  { %v1038_v32 = vadd.f32 %v1037_v3, %v1036_v20  ;;  %v1959_v10 = vsel %vm625_vm2, %v1927_v53, 0.0  ;;  %v1928_v44 = vmul.f32 %v3091_v22, %v3043_v0  ;;  %v1384_v17 = vmul.f32 0.35355338, %v1352_v48 }
 0x11b   :  { %v1688_v33 = vmul.f32 0.35355338, %v1662_v58  ;;  %v1669_v7 = vadd.f32 %v1668_v15, %v1667_v56  ;;  %v1033_v24 = vadd.f32 %v1032_v1, %v1031_v37  ;;  %v1409_v13 = vmul.f32 1.442695, %v2396_v16 }
 0x11c   :  { %v1039_v28 = vrot.slane %v1038_v32, 1  ;;  %v1960_v52 = vrot.slane %v1959_v10, 4  ;;  %v1966_v57 = vsel %vm625_vm2, %v1928_v44, 0.0  ;;  %v3204_v14 = vpop.eup %2651  ;;  %v1113_v11 = vmul.f32 %v2650_v60, %v2989_v25 }
 0x11d   :  { %v2397_v54 = vclamps-f32 %v1384_v17, 5.0  ;;  %v1689_v41 = vmul.f32 0.35355338, %v1669_v7  ;;  %v1059_v34 = vmul.f32 0.35355338, %v1033_v24  ;;  %v2409_v18 = vclamps-f32 %v1688_v33, 5.0 }
 0x11e   :  { %v2654_v36 = vpop.eup %2653  ;;  %v1040_v49 = vadd.f32 %v1039_v28, %v1038_v32  ;;  %v1961_v0 = vadd.f32 %v1960_v52, %v1959_v10  ;;  %v1967_v22 = vrot.slane %v1966_v57, 4  ;;  %v3207_v12 = vmul.f32 0.90909094, %v1726_v4 }
 0x11f   :  { %2657 = vpow2.f32 %v2017_v6  ;;  %v1411_v20 = vmul.f32 1.442695, %v2397_v54  ;;  %v2410_v50 = vclamps-f32 %v1689_v41, 5.0  ;;  %v2388_v35 = vclamps-f32 %v1059_v34, 5.0 }
 0x120   :  { %v3209_v46 = vpop.eup %2655  ;;  %v1060_v5 = vmul.f32 0.35355338, %v1040_v49  ;;  %v1962_v56 = vrot.slane %v1961_v0, 2  ;;  %v1968_v37 = vadd.f32 %v1967_v22, %v1966_v57  ;;  %v3211_v16 = vmul.f32 0.90909094, %v1113_v11 }
 0x121   :  { %v3214_v3 = vmul.f32 %v2654_v36, %v2989_v25  ;;  %2659 = vpow2.f32 %v1409_v13  ;;  %v1321_v53 = vmul.f32 %v3015_v39, %v3095_v31  ;;  %v1716_v4 = vmul.f32 1.442695, %v2409_v18 }
 0x122   :  { %2661 = vpow2.f32 %v1411_v20  ;;  %v1963_v48 = vadd.f32 %v1962_v56, %v1961_v0  ;;  %v1969_v58 = vrot.slane %v1968_v37, 2  ;;  %v1718_v15 = vmul.f32 1.442695, %v2410_v50 }
 0x123   :  { %v1353_v1 = vsel %vm625_vm2, %v1321_v53, 0.0  ;;  %v1322_v60 = vmul.f32 %v3019_v42, %v3097_v19  ;;  %v1626_v6 = vmul.f32 %v3103_v30, %v3041_v59  ;;  %v1087_v32 = vmul.f32 1.442695, %v2388_v35 }
 0x124   :  { %v2389_v10 = vclamps-f32 %v1060_v5, 5.0  ;;  %v1964_v44 = vrot.slane %v1963_v48, 1  ;;  %v1970_v17 = vadd.f32 %v1969_v58, %v1968_v37  ;;  %v1354_v33 = vrot.slane %v1353_v1, 4 }
 0x125   :  { %v1360_v39 = vsel %vm625_vm2, %v1322_v60, 0.0  ;;  %v1670_v31 = vsel %vm625_vm2, %v1626_v6, 0.0  ;;  %v1627_v7 = vmul.f32 %v3108_v8, %v3045_v2  ;;  %2663 = vpow2.f32 %v1716_v4 }
 0x126   :  { %v1965_v24 = vadd.f32 %v1964_v44, %v1963_v48  ;;  %v1971_v13 = vrot.slane %v1970_v17, 1  ;;  %v1361_v28 = vrot.slane %v1360_v39, 4  ;;  %2665 = vpow2.f32 %v1718_v15 }
 0x127   :  { %v1355_v42 = vadd.f32 %v1354_v33, %v1353_v1  ;;  %v1671_v19 = vrot.slane %v1670_v31, 4  ;;  %v1677_v59 = vsel %vm625_vm2, %v1627_v7, 0.0  ;;  %v1089_v41 = vmul.f32 1.442695, %v2389_v10 }
 0x128   :  { %v1991_v30 = vmul.f32 0.35355338, %v1965_v24  ;;  %v1972_v52 = vadd.f32 %v1971_v13, %v1970_v17  ;;  %v1362_v57 = vadd.f32 %v1361_v28, %v1360_v39  ;;  %v1678_v11 = vrot.slane %v1677_v59, 4  ;;  %v3642_v39 = vld [vmem:[#allocation9_spill] sm:$0xff] }
 0x129   :  { %v3228_v54 = vpop.eup %2657  ;;  %v1356_v34 = vrot.slane %v1355_v42, 2  ;;  %v1672_v36 = vadd.f32 %v1671_v19, %v1670_v31  ;;  %v997_v2 = vmul.f32 %v3013_v38, %v3110_v23  ;;  %v998_v5 = vmul.f32 %v3017_v40, %v3113_v26 }
 0x12a   :  { %v2420_v8 = vclamps-f32 %v1991_v30, 5.0  ;;  %v1992_v18 = vmul.f32 0.35355338, %v1972_v52  ;;  %v1363_v49 = vrot.slane %v1362_v57, 2  ;;  %v1679_v0 = vadd.f32 %v1678_v11, %v1677_v59  ;;  %v3643_v52 = vld [vmem:[#allocation8_spill] sm:$0xff] }
 0x12b   :  { %v3232_v22 = vpop.eup %2659  ;;  %v1357_v20 = vadd.f32 %v1356_v34, %v1355_v42  ;;  %v1673_v50 = vrot.slane %v1672_v36, 2  ;;  %v1041_v35 = vsel %vm625_vm2, %v997_v2, 0.0  ;;  %2667 = vpow2.f32 %v1087_v32 }
 0x12c   :  { %v3237_v56 = vpop.eup %2661  ;;  %v2421_v37 = vclamps-f32 %v1992_v18, 5.0  ;;  %v1364_v53 = vadd.f32 %v1363_v49, %v1362_v57  ;;  %v1680_v4 = vrot.slane %v1679_v0, 2  ;;  %v1042_v48 = vrot.slane %v1041_v35, 4 }
 0x12d   :  { %v1358_v38 = vrot.slane %v1357_v20, 1  ;;  %v1674_v23 = vadd.f32 %v1673_v50, %v1672_v36  ;;  %v1048_v58 = vsel %vm625_vm2, %v998_v5, 0.0  ;;  %2669 = vpow2.f32 %v1089_v41 }
 0x12e   :  { %v3240_v15 = vmul.f32 1.442695, %v2420_v8  ;;  %v1365_v1 = vrot.slane %v1364_v53, 1  ;;  %v1681_v60 = vadd.f32 %v1680_v4, %v1679_v0  ;;  %v1043_v44 = vadd.f32 %v1042_v48, %v1041_v35 }
 0x12f   :  { %v1359_v6 = vadd.f32 %v1358_v38, %v1357_v20  ;;  %v1675_v10 = vrot.slane %v1674_v23, 1  ;;  %v1049_v40 = vrot.slane %v1048_v58, 4  ;;  %v3242_v26 = vpop.eup %2663  ;;  %v3244_v32 = vmul.f32 1.442695, %v2421_v37 }
 0x130   :  { %v1366_v17 = vadd.f32 %v1365_v1, %v1364_v53  ;;  %v1682_v33 = vrot.slane %v1681_v60, 1  ;;  %v1929_v31 = vmul.f32 %v3115_v27, %v3642_v39  ;;  %v3248_v7 = vpop.eup %2665  ;;  %v1044_v28 = vrot.slane %v1043_v44, 2  ;;  %v3645_v39 = vld [vmem:[#allocation5_spill] sm:$0xff] }
 0x131   :  { %v1385_v24 = vmul.f32 0.35355338, %v1359_v6  ;;  %v1676_v13 = vadd.f32 %v1675_v10, %v1674_v23  ;;  %v1050_v42 = vadd.f32 %v1049_v40, %v1048_v58  ;;  %v1930_v57 = vmul.f32 %v3118_v62, %v3643_v52 }
 0x132   :  { %v1386_v19 = vmul.f32 0.35355338, %v1366_v17  ;;  %v1683_v59 = vadd.f32 %v1682_v33, %v1681_v60  ;;  %v1973_v30 = vsel %vm625_vm2, %v1929_v31, 0.0  ;;  %v1045_v34 = vadd.f32 %v1044_v28, %v1043_v44  ;;  %v3644_v44 = vld [vmem:[#allocation6_spill] sm:$0xff] }
 0x133   :  { %v2398_v11 = vclamps-f32 %v1385_v24, 5.0  ;;  %v1690_v41 = vmul.f32 0.35355338, %v1676_v13  ;;  %v1051_v36 = vrot.slane %v1050_v42, 2  ;;  %v1974_v27 = vrot.slane %v1973_v30, 4 }
 0x134   :  { %v2399_v2 = vclamps-f32 %v1386_v19, 5.0  ;;  %v1691_v8 = vmul.f32 0.35355338, %v1683_v59  ;;  %v1980_v18 = vsel %vm625_vm2, %v1930_v57, 0.0  ;;  %v1046_v20 = vrot.slane %v1045_v34, 1 }
 0x135   :  { %v1413_v49 = vmul.f32 1.442695, %v2398_v11  ;;  %v2411_v0 = vclamps-f32 %v1690_v41, 5.0  ;;  %v1052_v50 = vadd.f32 %v1051_v36, %v1050_v42  ;;  %v3254_v35 = vpop.eup %2667  ;;  %v1975_v53 = vadd.f32 %v1974_v27, %v1973_v30  ;;  %v3646_v42 = vld [vmem:[#allocation14_spill] sm:$0xff] }
 0x136   :  { %v1415_v5 = vmul.f32 1.442695, %v2399_v2  ;;  %v2412_v37 = vclamps-f32 %v1691_v8, 5.0  ;;  %v1981_v4 = vrot.slane %v1980_v18, 4  ;;  %v1047_v38 = vadd.f32 %v1046_v20, %v1045_v34 }
 0x137   :  { %2671 = vpow2.f32 %v1413_v49  ;;  %v1720_v62 = vmul.f32 1.442695, %v2411_v0  ;;  %v1053_v23 = vrot.slane %v1052_v50, 1  ;;  %v3256_v48 = vpop.eup %2669  ;;  %v1976_v1 = vrot.slane %v1975_v53, 2 }
 0x138   :  { %2673 = vpow2.f32 %v1415_v5  ;;  %v1722_v58 = vmul.f32 1.442695, %v2412_v37  ;;  %v1982_v60 = vadd.f32 %v1981_v4, %v1980_v18  ;;  %v1061_v6 = vmul.f32 0.35355338, %v1047_v38 }
 0x139   :  { %2675 = vpow2.f32 %v1720_v62  ;;  %v1054_v10 = vadd.f32 %v1053_v23, %v1052_v50  ;;  %v1323_v40 = vmul.f32 %v3644_v44, %v3120_v29  ;;  %v1977_v17 = vadd.f32 %v1976_v1, %v1975_v53  ;;  %v3648_v62 = vld [vmem:[#allocation17_spill] sm:$0xff] }
 0x13a   :  { %2677 = vpow2.f32 %v1722_v58  ;;  %v1983_v33 = vrot.slane %v1982_v60, 2  ;;  %v1324_v31 = vmul.f32 %v3645_v39, %v3123_v43  ;;  %v2390_v24 = vclamps-f32 %v1061_v6, 5.0  ;;  %v3647_v43 = vld [vmem:[#allocation11_spill] sm:$0xff] }
 0x13b   :  { %v1062_v13 = vmul.f32 0.35355338, %v1054_v10  ;;  %v1367_v28 = vsel %vm625_vm2, %v1323_v40, 0.0  ;;  %v918_v19 = vmul.f32 0.35355338, %v3646_v42  ;;  %v1978_v59 = vrot.slane %v1977_v17, 1 }
 0x13c   :  { %v1984_v30 = vadd.f32 %v1983_v33, %v1982_v60  ;;  %v1368_v52 = vrot.slane %v1367_v28, 4  ;;  %v1374_v57 = vsel %vm625_vm2, %v1324_v31, 0.0  ;;  %v1091_v11 = vmul.f32 1.442695, %v2390_v24 }
 0x13d   :  { %v2391_v41 = vclamps-f32 %v1062_v13, 5.0  ;;  %v1375_v29 = vrot.slane %v1374_v57, 4  ;;  %v2392_v34 = vclamps-f32 %v918_v19, 5.0  ;;  %v1979_v36 = vadd.f32 %v1978_v59, %v1977_v17 }
 0x13e   :  { %v1985_v2 = vrot.slane %v1984_v30, 1  ;;  %v1369_v8 = vadd.f32 %v1368_v52, %v1367_v28  ;;  %v920_v27 = vmul.f32 0.35355338, %v3647_v43  ;;  %2679 = vpow2.f32 %v1091_v11  ;;  %v3649_v11 = vld [vmem:[#allocation7_spill] sm:$0xff] }
 0x13f   :  { %v1093_v18 = vmul.f32 1.442695, %v2391_v41  ;;  %v1376_v49 = vadd.f32 %v1375_v29, %v1374_v57  ;;  %v1129_v0 = vmul.f32 1.442695, %v2392_v34  ;;  %v1993_v20 = vmul.f32 0.35355338, %v1979_v36 }
 0x140   :  { %v1986_v50 = vadd.f32 %v1985_v2, %v1984_v30  ;;  %v1370_v5 = vrot.slane %v1369_v8, 2  ;;  %v2413_v37 = vclamps-f32 %v920_v27, 5.0  ;;  %v919_v38 = vmul.f32 0.35355338, %v3648_v62  ;;  %v3650_v34 = vld [vmem:[#allocation10_spill] sm:$0xff]  ;;  %v3652_v27 = vld [vmem:[#allocation15_spill] sm:$0xff] }
 0x141   :  { %v2672_v53 = vpop.eup %2671  ;;  %2681 = vpow2.f32 %v1093_v18  ;;  %v1377_v4 = vrot.slane %v1376_v49, 2  ;;  %v921_v23 = vmul.f32 0.35355338, %v3167_v51  ;;  %v2422_v1 = vclamps-f32 %v1993_v20, 5.0  ;;  %v1198_v51 = vld [vmem:[%s3608_s4] sm:$0xf] }
 0x142   :  { %v2674_v58 = vpop.eup %2673  ;;  %v1994_v60 = vmul.f32 0.35355338, %v1986_v50  ;;  %v1371_v6 = vadd.f32 %v1370_v5, %v1369_v8  ;;  %2683 = vpow2.f32 %v1129_v0  ;;  %v1742_v40 = vmul.f32 1.442695, %v2413_v37 }
 0x143   :  { %v3268_v10 = vpop.eup %2675  ;;  %v1378_v44 = vadd.f32 %v1377_v4, %v1376_v49  ;;  %v2402_v17 = vclamps-f32 %v919_v38, 5.0  ;;  %v2424_v33 = vclamps-f32 %v921_v23, 5.0  ;;  %2685 = vpow2.f32 %v3240_v15  ;;  %v3654_v4 = vld [vmem:[#allocation16_spill] sm:$0xff]  ;;  %v3655_v23 = vld [vmem:[#allocation13_spill] sm:$0xff] }
 0x144   :  { %v3270_v39 = vpop.eup %2677  ;;  %v2023_v31 = vmul.f32 1.442695, %v2422_v1  ;;  %v2423_v24 = vclamps-f32 %v1994_v60, 5.0  ;;  %v1372_v13 = vrot.slane %v1371_v6, 1  ;;  %2687 = vpow2.f32 %v1742_v40 }
 0x145   :  { %v1379_v28 = vrot.slane %v1378_v44, 1  ;;  %v1439_v42 = vmul.f32 1.442695, %v2402_v17  ;;  %v2045_v19 = vmul.f32 1.442695, %v2424_v33  ;;  %v1423_v30 = vmul.f32 %v3232_v22, %v2989_v25  ;;  %v3651_v25 = vld [vmem:[#allocation12_spill] sm:$0xff] }
 0x146   :  { %v3277_v59 = vmul.f32 0.90909094, %v3214_v3  ;;  %2689 = vpow2.f32 %v3244_v32  ;;  %v1373_v15 = vadd.f32 %v1372_v13, %v1371_v6  ;;  %v2025_v52 = vmul.f32 1.442695, %v2423_v24 }
 0x147   :  { %2691 = vpow2.f32 %v2023_v31  ;;  %v1380_v57 = vadd.f32 %v1379_v28, %v1378_v44  ;;  %v1114_v41 = vmul.f32 %v3209_v46, %v3649_v11  ;;  %v1115_v36 = vmul.f32 %v3254_v35, %v3650_v34 }
 0x148   :  { %v1387_v29 = vmul.f32 0.35355338, %v1373_v15  ;;  %2693 = vpow2.f32 %v1439_v42  ;;  %v1235_v3 = vsel %vm1233_vm4, %v1198_v51, 0  ;;  %v2680_v2 = vpop.eup %2679  ;;  %v1116_v22 = vmul.f32 %v3256_v48, %v3651_v25 }
 0x149   :  { %v1388_v8 = vmul.f32 0.35355338, %v1380_v57  ;;  %2695 = vpow2.f32 %v2045_v19  ;;  %2566 = vmatpush3.bf16.msra.mxu0 %v1235_v3  ;;  %v1424_v32 = vmul.f32 %v3237_v56, %v3649_v11  ;;  %v1117_v46 = vmul.f32 %v2680_v2, %v3652_v27 }
 0x14a   :  { %v2400_v43 = vclamps-f32 %v1387_v29, 5.0  ;;  %v1425_v18 = vmul.f32 %v2672_v53, %v3650_v34  ;;  %v1426_v49 = vmul.f32 %v2674_v58, %v3651_v25  ;;  %v3653_v35 = vmov 0.0  }
 0x14b   :  { %2577 = vmatprep.subr.bf16.mxu0 %v3653_v35  ;;  %v2682_v0 = vpop.eup %2681  ;;  %v3295_v20 = vmul.f32 0.90909094, %v1423_v30  ;;  %2697 = vpow2.f32 %v2025_v52  ;;  %v2401_v50 = vclamps-f32 %v1388_v8, 5.0  ;;  %v1122_v5 = vmul.f32 0.90909094, %v1114_v41  ;;  %49 = vst.msk [vmem:[#allocation3] sm:$0xff] %vm48_vm12, %v3653_v35 }
 0x14c   :  { %v2684_v48 = vpop.eup %2683  ;;  %v1417_v37 = vmul.f32 1.442695, %v2400_v43  ;;  %v1118_v62 = vmul.f32 %v2682_v0, %v3654_v4  ;;  %v1123_v56 = vmul.f32 0.90909094, %v1115_v36  ;;  %v1727_v38 = vmul.f32 %v3204_v14, %v3649_v11 }
 0x14d   :  { %v1419_v53 = vmul.f32 1.442695, %v2401_v50  ;;  %v1131_v58 = vmul.f32 %v2684_v48, %v3655_v23  ;;  %v1124_v1 = vmul.f32 0.90909094, %v1116_v22  ;;  %v3301_v60 = vmul.f32 0.90909094, %v1424_v32  ;;  %v3303_v6 = vpop.eup %2685 }
 0x14e   :  { %v1125_v44 = vmul.f32 0.90909094, %v1117_v46  ;;  %v3305_v40 = vmul.f32 0.90909094, %v1425_v18  ;;  %v3307_v17 = vmul.f32 0.90909094, %v1426_v49  ;;  %v1728_v33 = vmul.f32 %v3242_v26, %v3650_v34  ;;  %v2688_v31 = vpop.eup %2687 }
 0x14f   :  { %2699 = vpow2.f32 %v1417_v37  ;;  %v1132_v14 = vmul.f32 0.09090909, %v1131_v58  ;;  %v1126_v24 = vmul.f32 0.90909094, %v1118_v62  ;;  %v1729_v13 = vmul.f32 %v3248_v7, %v3651_v25 }
 0x150   :  { %v3313_v51 = vpop.eup %2689  ;;  %2701 = vpow2.f32 %v1419_v53  ;;  %v1730_v28 = vmul.f32 %v3268_v10, %v3652_v27  ;;  %v1731_v42 = vmul.f32 %v3270_v39, %v3654_v4  ;;  %v3319_v19 = vmul.f32 0.90909094, %v1727_v38 }
 0x151   :  { %v3321_v26 = vpop.eup %2691  ;;  %v1134_v30 = vrot.slane %v1132_v14, 1  ;;  %v1135_v15 = vrot.slane %v1132_v14, 2  ;;  %v1136_v52 = vrot.slane %v1132_v14, 3  ;;  %v1137_v57 = vrot.slane %v1132_v14, 4 }
 0x152   :  { %v2694_v7 = vpop.eup %2693  ;;  %v1744_v41 = vmul.f32 %v2688_v31, %v3655_v23  ;;  %v1138_v29 = vrot.slane %v1132_v14, 5  ;;  %v1139_v36 = vrot.slane %v1132_v14, 6  ;;  %v3324_v3 = vmul.f32 0.90909094, %v1728_v33 }
 0x153   :  { %v2696_v10 = vpop.eup %2695  ;;  %v1140_v2 = vrot.slane %v1132_v14, 7  ;;  %v1149_v39 = vadd.f32 %v1132_v14, %v3165_v63  ;;  %v1150_v8 = vadd.f32 %v1134_v30, %v3169_v9  ;;  %v1151_v22 = vadd.f32 %v1135_v15, %v3211_v16 }
 0x154   :  { %v1152_v32 = vadd.f32 %v1136_v52, %v1122_v5  ;;  %v1153_v43 = vadd.f32 %v1137_v57, %v1123_v56  ;;  %v3329_v46 = vmul.f32 0.90909094, %v1729_v13  ;;  %v3331_v18 = vmul.f32 0.90909094, %v1730_v28 }
 0x155   :  { %v3333_v49 = vpop.eup %2697  ;;  %v1154_v0 = vadd.f32 %v1138_v29, %v1124_v1  ;;  %v1155_v50 = vadd.f32 %v1139_v36, %v1125_v44  ;;  %v1156_v48 = vadd.f32 %v1140_v2, %v1126_v24  ;;  %v1165_v37 = vrot.slane %v1150_v8, 7 }
 0x156   :  { %v1441_v62 = vmul.f32 %v2694_v7, %v3655_v23  ;;  %v2047_v63 = vmul.f32 %v2696_v10, %v3655_v23  ;;  %v1168_v38 = vrot.slane %v1151_v22, 6  ;;  %v1171_v9 = vrot.slane %v1152_v32, 5 }
 0x157   :  { %v1167_v16 = vsel %vm1166_vm5, %v1165_v37, %v1149_v39  ;;  %v1174_v5 = vrot.slane %v1153_v43, 4  ;;  %v1177_v56 = vrot.slane %v1154_v0, 3  ;;  %v1180_v53 = vrot.slane %v1155_v50, 2 }
 0x158   :  { %v1170_v58 = vsel %vm1169_vm6, %v1168_v38, %v1167_v16  ;;  %v1183_v33 = vrot.slane %v1156_v48, 1  ;;  %v1191_v31 = vpack.c.bf16 %v1150_v8, %v1150_v8  ;;  %v1192_v14 = vpack.c.bf16 %v1151_v22, %v1151_v22 }
 0x159   :  { %v2700_v1 = vpop.eup %2699  ;;  %v1173_v44 = vsel %vm1172_vm7, %v1171_v9, %v1170_v58  ;;  %v1190_v24 = vpack.c.bf16 %v1149_v39, %v1149_v39  ;;  %v1193_v13 = vpack.c.bf16 %v1152_v32, %v1152_v32  ;;  %v1194_v28 = vpack.c.bf16 %v1153_v43, %v1153_v43 }
 0x15a   :  { %v2702_v30 = vpop.eup %2701  ;;  %v1176_v23 = vsel %vm1175_vm8, %v1174_v5, %v1173_v44  ;;  %v1195_v15 = vpack.c.bf16 %v1154_v0, %v1154_v0  ;;  %v1196_v52 = vpack.c.bf16 %v1155_v50, %v1155_v50  ;;  %v1197_v57 = vpack.c.bf16 %v1156_v48, %v1156_v48 }
 0x15b   :  { %v1179_v7 = vsel %vm1178_vm9, %v1177_v56, %v1176_v23  ;;  %v3342_v29 = vunpack.c.l.b16 %v1191_v31  ;;  %v3344_v36 = vunpack.c.l.b16 %v1192_v14  ;;  %v3346_v10 = vmul.f32 0.90909094, %v1731_v42 }
 0x15c   :  { %v3348_v2 = vmul.f32 0.09090909, %v1744_v41  ;;  %v1442_v8 = vmul.f32 0.09090909, %v1441_v62  ;;  %v3350_v39 = vmul.f32 0.09090909, %v2047_v63  ;;  %v1182_v22 = vsel %vm1181_vm10, %v1180_v53, %v1179_v7 }
 0x15d   :  { %v1185_v32 = vsel %vm1184_vm11, %v1183_v33, %v1182_v22  ;;  %v3354_v43 = vunpack.c.l.b16 %v1190_v24  ;;  %v3356_v0 = vunpack.c.l.b16 %v1193_v13  ;;  %v3358_v50 = vunpack.c.l.b16 %v1194_v28 }
 0x15e   :  { %v1187_v48 = vsel %vm625_vm2, %v1185_v32, 0.0  ;;  %v3361_v37 = vunpack.c.l.b16 %v1195_v15  ;;  %v3363_v42 = vunpack.c.l.b16 %v1196_v52  ;;  %v3365_v41 = vunpack.c.l.b16 %v1197_v57 }
 0x15f   :  { %v1215_v62 = vrot.slane %v3342_v29, 7  ;;  %v1217_v63 = vrot.slane %v3344_v36, 6  ;;  %1188 = vadd.xlane.f32.xlu0 %v1187_v48  ;;  %v1427_v38 = vmul.f32 %v2700_v1, %v3652_v27  ;;  %v1428_v9 = vmul.f32 %v2702_v30, %v3654_v4 }
 0x160   :  { %v1444_v16 = vrot.slane %v1442_v8, 1  ;;  %v1445_v5 = vrot.slane %v1442_v8, 2  ;;  %v1446_v56 = vrot.slane %v1442_v8, 3  ;;  %v1447_v53 = vrot.slane %v1442_v8, 4 }
 0x161   :  { %v1435_v58 = vmul.f32 0.90909094, %v1427_v38  ;;  %v1436_v33 = vmul.f32 0.90909094, %v1428_v9  ;;  %v1448_v31 = vrot.slane %v1442_v8, 5  ;;  %v1449_v14 = vrot.slane %v1442_v8, 6 }
 0x162   :  { %v1450_v44 = vrot.slane %v1442_v8, 7  ;;  %v1459_v24 = vadd.f32 %v1442_v8, %v3193_v45  ;;  %v1460_v13 = vadd.f32 %v1444_v16, %v3195_v21  ;;  %v1461_v28 = vadd.f32 %v1445_v5, %v3295_v20 }
 0x163   :  { %v1462_v23 = vadd.f32 %v1446_v56, %v3301_v60  ;;  %v1463_v1 = vadd.f32 %v1447_v53, %v3305_v40  ;;  %v1464_v30 = vadd.f32 %v1448_v31, %v3307_v17  ;;  %v1465_v15 = vadd.f32 %v1449_v14, %v1435_v58 }
 0x164   :  { %v1219_v52 = vrot.slane %v3356_v0, 5  ;;  %v1466_v57 = vadd.f32 %v1450_v44, %v1436_v33  ;;  %v1475_v7 = vrot.slane %v1460_v13, 7  ;;  %v1477_v22 = vrot.slane %v1461_v28, 6 }
 0x165   :  { %v1479_v48 = vrot.slane %v1462_v23, 5  ;;  %v1481_v45 = vrot.slane %v1463_v1, 4  ;;  %v1493_v8 = vpack.c.bf16 %v1459_v24, %v1459_v24  ;;  %v1483_v20 = vrot.slane %v1464_v30, 3 }
 0x166   :  { %v1476_v21 = vsel %vm1166_vm5, %v1475_v7, %v1459_v24  ;;  %v1494_v38 = vpack.c.bf16 %v1460_v13, %v1460_v13  ;;  %v1495_v60 = vpack.c.bf16 %v1461_v28, %v1461_v28  ;;  %v1485_v9 = vrot.slane %v1465_v15, 2 }
 0x167   :  { %v1478_v40 = vsel %vm1169_vm6, %v1477_v22, %v1476_v21  ;;  %v1496_v17 = vpack.c.bf16 %v1462_v23, %v1462_v23  ;;  %v1497_v16 = vpack.c.bf16 %v1463_v1, %v1463_v1  ;;  %v1498_v56 = vpack.c.bf16 %v1464_v30, %v1464_v30 }
 0x168   :  { %v1480_v5 = vsel %vm1172_vm7, %v1479_v48, %v1478_v40  ;;  %v1499_v53 = vpack.c.bf16 %v1465_v15, %v1465_v15  ;;  %v1500_v58 = vpack.c.bf16 %v1466_v57, %v1466_v57  ;;  %v3384_v14 = vunpack.c.l.b16 %v1494_v38 }
 0x169   :  { %v1482_v31 = vsel %vm1175_vm8, %v1481_v45, %v1480_v5  ;;  %v3386_v44 = vunpack.c.l.b16 %v1495_v60  ;;  %v1487_v23 = vrot.slane %v1466_v57, 1  ;;  %v3392_v30 = vunpack.c.l.b16 %v1493_v8 }
 0x16a   :  { %v1484_v28 = vsel %vm1178_vm9, %v1483_v20, %v1482_v31  ;;  %v3394_v15 = vunpack.c.l.b16 %v1496_v17  ;;  %v3396_v7 = vunpack.c.l.b16 %v1497_v16  ;;  %v3399_v48 = vunpack.c.l.b16 %v1498_v56  ;;  %v3656_v56 = vld [vmem:[#allocation18_spill] sm:$0xff] }
 0x16b   :  { %v1486_v1 = vsel %vm1181_vm10, %v1485_v9, %v1484_v28  ;;  %v3401_v45 = vunpack.c.l.b16 %v1499_v53  ;;  %v3403_v21 = vunpack.c.l.b16 %v1500_v58  ;;  %v1519_v57 = vrot.slane %v3384_v14, 7 }
 0x16c   :  { %v1488_v22 = vsel %vm1184_vm11, %v1487_v23, %v1486_v1  ;;  %v1521_v20 = vrot.slane %v3386_v44, 6  ;;  %v1747_v8 = vrot.slane %v3348_v2, 1  ;;  %v1748_v60 = vrot.slane %v3348_v2, 2 }
 0x16d   :  { %v1490_v38 = vsel %vm625_vm2, %v1488_v22, 0.0  ;;  %v1749_v40 = vrot.slane %v3348_v2, 3  ;;  %v1750_v9 = vrot.slane %v3348_v2, 4  ;;  %v1751_v17 = vrot.slane %v3348_v2, 5 }
 0x16e   :  { %1491 = vadd.xlane.f32.xlu1 %v1490_v38  ;;  %v1752_v16 = vrot.slane %v3348_v2, 6  ;;  %v1753_v5 = vrot.slane %v3348_v2, 7  ;;  %v1762_v53 = vadd.f32 %v3348_v2, %v3656_v56  ;;  %v1763_v58 = vadd.f32 %v1747_v8, %v3161_v55 }
 0x16f   :  { %v1764_v31 = vadd.f32 %v1748_v60, %v3207_v12  ;;  %v1765_v14 = vadd.f32 %v1749_v40, %v3319_v19  ;;  %v1766_v28 = vadd.f32 %v1750_v9, %v3324_v3  ;;  %v1767_v23 = vadd.f32 %v1751_v17, %v3329_v46 }
 0x170   :  { %v1523_v1 = vrot.slane %v3394_v15, 5  ;;  %v1768_v22 = vadd.f32 %v1752_v16, %v3331_v18  ;;  %v1769_v38 = vadd.f32 %v1753_v5, %v3346_v10  ;;  %v1778_v13 = vrot.slane %v1763_v58, 7 }
 0x171   :  { %v1780_v24 = vrot.slane %v1764_v31, 6  ;;  %v1782_v33 = vrot.slane %v1765_v14, 5  ;;  %v1784_v2 = vrot.slane %v1766_v28, 4  ;;  %v1796_v56 = vpack.c.bf16 %v1762_v53, %v1762_v53 }
 0x172   :  { %v1779_v55 = vsel %vm1166_vm5, %v1778_v13, %v1762_v53  ;;  %v1786_v12 = vrot.slane %v1767_v23, 3  ;;  %v1788_v8 = vrot.slane %v1768_v22, 2  ;;  %v1797_v19 = vpack.c.bf16 %v1763_v58, %v1763_v58 }
 0x173   :  { %v1781_v3 = vsel %vm1169_vm6, %v1780_v24, %v1779_v55  ;;  %v1790_v60 = vrot.slane %v1769_v38, 1  ;;  %v1798_v46 = vpack.c.bf16 %v1764_v31, %v1764_v31  ;;  %v1799_v40 = vpack.c.bf16 %v1765_v14, %v1765_v14 }
 0x174   :  { %v1783_v15 = vsel %vm1172_vm7, %v1782_v33, %v1781_v3  ;;  %v1800_v18 = vpack.c.bf16 %v1766_v28, %v1766_v28  ;;  %v1801_v9 = vpack.c.bf16 %v1767_v23, %v1767_v23  ;;  %v1802_v10 = vpack.c.bf16 %v1768_v22, %v1768_v22  ;;  %v2403_v23 = vld [vmem:[%s3608_s4 + $0x4] sm:$0xf] }
 0x175   :  { %v1785_v17 = vsel %vm1175_vm8, %v1784_v2, %v1783_v15  ;;  %v1803_v16 = vpack.c.bf16 %v1769_v38, %v1769_v38  ;;  %v3429_v5 = vunpack.c.l.b16 %v1797_v19  ;;  %v3431_v32 = vunpack.c.l.b16 %v1798_v46 }
 0x176   :  { %v1525_v13 = vrot.slane %v3396_v7, 4  ;;  %v1527_v53 = vrot.slane %v3399_v48, 3  ;;  %v1529_v24 = vrot.slane %v3401_v45, 2  ;;  %v1787_v58 = vsel %vm1178_vm9, %v1786_v12, %v1785_v17 }
 0x177   :  { %v1531_v33 = vrot.slane %v3403_v21, 1  ;;  %v1789_v31 = vsel %vm1181_vm10, %v1788_v8, %v1787_v58  ;;  %v3439_v14 = vunpack.c.l.b16 %v1796_v56  ;;  %v3441_v28 = vunpack.c.l.b16 %v1799_v40 }
 0x178   :  { %v1791_v7 = vsel %vm1184_vm11, %v1790_v60, %v1789_v31  ;;  %v3447_v22 = vunpack.c.l.b16 %v1800_v18  ;;  %v3449_v48 = vunpack.c.l.b16 %v1801_v9  ;;  %v3451_v45 = vunpack.c.l.b16 %v1802_v10 }
 0x179   :  { %v1793_v21 = vsel %vm625_vm2, %v1791_v7, 0.0  ;;  %v3454_v38 = vunpack.c.l.b16 %v1803_v16  ;;  %v1822_v2 = vrot.slane %v3429_v5, 7  ;;  %v1824_v56 = vrot.slane %v3431_v32, 6 }
 0x17a   :  { %1794 = vadd.xlane.f32.xlu0 %v1793_v21  ;;  %v1216_v55 = vsel %vm1166_vm5, %v1215_v62, %v3354_v43  ;;  %v1538_v12 = vsel %vm1233_vm4, %v2403_v23, 0  ;;  %v1520_v8 = vsel %vm1166_vm5, %v1519_v57, %v3392_v30  ;;  %v2030_v19 = vmul.f32 %v3228_v54, %v3649_v11 }
 0x17b   :  { %v1218_v3 = vsel %vm1169_vm6, %v1217_v63, %v1216_v55  ;;  %2572 = vmatpush3.bf16.msra.mxu1 %v1538_v12  ;;  %v1522_v60 = vsel %vm1169_vm6, %v1521_v20, %v1520_v8  ;;  %v2031_v29 = vmul.f32 %v3303_v6, %v3650_v34  ;;  %v2032_v43 = vmul.f32 %v3313_v51, %v3651_v25 }
 0x17c   :  { %v1220_v62 = vsel %vm1172_vm7, %v1219_v52, %v1218_v3  ;;  %v1524_v54 = vsel %vm1172_vm7, %v1523_v1, %v1522_v60  ;;  %v2033_v11 = vmul.f32 %v3321_v26, %v3652_v27  ;;  %v2034_v36 = vmul.f32 %v3333_v49, %v3654_v4  ;;  %2583 = vmatprep.subr.bf16.mxu1 %v3653_v35 }
 0x17d   :  { %v3657_v63 = vrot.slane %v3358_v50, 4  ;;  %v1526_v25 = vsel %vm1175_vm8, %v1525_v13, %v1524_v54  ;;  %v2038_v6 = vmul.f32 0.90909094, %v2030_v19  ;;  %v2039_v51 = vmul.f32 0.90909094, %v2031_v29 }
 0x17e   :  { %v3658_v0 = vrot.slane %v3361_v37, 3  ;;  %v1528_v44 = vsel %vm1178_vm9, %v1527_v53, %v1526_v25  ;;  %v2040_v27 = vmul.f32 0.90909094, %v2032_v43  ;;  %v2041_v26 = vmul.f32 0.90909094, %v2033_v11 }
 0x17f   :  { %v1222_v34 = vsel %vm1175_vm8, %v3657_v63, %v1220_v62  ;;  %v3659_v4 = vrot.slane %v3363_v42, 2  ;;  %v1530_v50 = vsel %vm1181_vm10, %v1529_v24, %v1528_v44  ;;  %v2042_v30 = vmul.f32 0.90909094, %v2034_v36  ;;  %v2414_v42 = vld [vmem:[%s3608_s4 + $0x8] sm:$0xf] }
 0x180   :  { %v1224_v52 = vsel %vm1178_vm9, %v3658_v0, %v1222_v34  ;;  %v2050_v57 = vrot.slane %v3350_v39, 1  ;;  %v3660_v20 = vrot.slane %v3365_v41, 1  ;;  %v1532_v37 = vsel %vm1184_vm11, %v1531_v33, %v1530_v50 }
 0x181   :  { %v1226_v49 = vsel %vm1181_vm10, %v3659_v4, %v1224_v52  ;;  %v2051_v46 = vrot.slane %v3350_v39, 2  ;;  %v2052_v40 = vrot.slane %v3350_v39, 3  ;;  %v1533_v18 = vpack.c.b16 %v1532_v37, %v1532_v37  ;;  %v2425_v4 = vld [vmem:[%s3608_s4 + $0xc] sm:$0xf]  ;;  %s2711_s4 = smov 8  }
 0x182   :  { %v1228_v1 = vsel %vm1184_vm11, %v3660_v20, %v1226_v49  ;;  %v2053_v9 = vrot.slane %v3350_v39, 4  ;;  %v2054_v10 = vrot.slane %v3350_v39, 5  ;;  %v2055_v41 = vrot.slane %v3350_v39, 6 }
 0x183   :  { %v1229_v15 = vpack.c.b16 %v1228_v1, %v1228_v1  ;;  %v2056_v17 = vrot.slane %v3350_v39, 7  ;;  %v2065_v16 = vadd.f32 %v3350_v39, %v3171_v61  ;;  %v2066_v13 = vadd.f32 %v2050_v57, %v3174_v47  ;;  %2574 = vmatmul.mubr.msk.bf16.vlgmr.msra.gmra.mrb[24].mxu1 %vm625_vm2, %v1533_v18 }
 0x184   :  { %v2067_v53 = vadd.f32 %v2051_v46, %v3277_v59  ;;  %v2068_v24 = vadd.f32 %v2052_v40, %v2038_v6  ;;  %v2069_v58 = vadd.f32 %v2053_v9, %v2039_v51  ;;  %v1841_v33 = vsel %vm1233_vm4, %v2414_v42, 0  ;;  %2585 = vmatprep.mubr.msk.bf16.mxu1 %vm2708_vm1, %v3653_v35 }
 0x185   :  { %2568 = vmatmul.mubr.msk.bf16.vlgmr.msra.gmra.mrb[20].mxu0 %vm625_vm2, %v1229_v15  ;;  %v2070_v31 = vadd.f32 %v2054_v10, %v2040_v27  ;;  %v2071_v23 = vadd.f32 %v2055_v41, %v2041_v26  ;;  %v2072_v7 = vadd.f32 %v2056_v17, %v2042_v30  ;;  %v2081_v21 = vrot.slane %v2066_v13, 7 }
 0x186   :  { %2578 = vmatpush3.bf16.msra.mxu0 %v1841_v33  ;;  %2579 = vmatprep.mubr.msk.bf16.mxu0 %vm2708_vm1, %v3653_v35  ;;  %v1826_v61 = vrot.slane %v3441_v28, 5  ;;  %v1828_v47 = vrot.slane %v3447_v22, 4  ;;  %v2083_v39 = vrot.slane %v2067_v53, 6  ;;  %v2085_v55 = vrot.slane %v2068_v24, 5 }
 0x187   :  { %2589 = vmatprep.subr.bf16.mxu0 %v3653_v35  ;;  %v2082_v59 = vsel %vm1166_vm5, %v2081_v21, %v2065_v16  ;;  %v2087_v12 = vrot.slane %v2069_v58, 4  ;;  %v2089_v8 = vrot.slane %v2070_v31, 3  ;;  %v2099_v19 = vpack.c.bf16 %v2065_v16, %v2065_v16 }
 0x188   :  { %v2084_v3 = vsel %vm1169_vm6, %v2083_v39, %v2082_v59  ;;  %v2100_v60 = vpack.c.bf16 %v2066_v13, %v2066_v13  ;;  %v2101_v29 = vpack.c.bf16 %v2067_v53, %v2067_v53  ;;  %v2102_v43 = vpack.c.bf16 %v2068_v24, %v2068_v24 }
 0x189   :  { %v2086_v28 = vsel %vm1172_vm7, %v2085_v55, %v2084_v3  ;;  %v2091_v22 = vrot.slane %v2071_v23, 2  ;;  %v2103_v62 = vpack.c.bf16 %v2069_v58, %v2069_v58  ;;  %v2104_v54 = vpack.c.bf16 %v2070_v31, %v2070_v31  ;;  %v2186_v55 = vld [vmem:[#allocation3] sm:$0xff] }
 0x18a   :  { %v2088_v11 = vsel %vm1175_vm8, %v2087_v12, %v2086_v28  ;;  %v2105_v36 = vpack.c.bf16 %v2071_v23, %v2071_v23  ;;  %v2106_v63 = vpack.c.bf16 %v2072_v7, %v2072_v7  ;;  %v2118_v34 = vunpack.c.l.b16 %v2100_v60 }
 0x18b   :  { %v2090_v25 = vsel %vm1178_vm9, %v2089_v8, %v2088_v11  ;;  %v2093_v6 = vrot.slane %v2072_v7, 1  ;;  %v2119_v51 = vunpack.c.l.b16 %v2101_v29  ;;  %v2120_v0 = vunpack.c.l.b16 %v2102_v43 }
 0x18c   :  { %v1830_v52 = vrot.slane %v3449_v48, 3  ;;  %v2092_v44 = vsel %vm1181_vm10, %v2091_v22, %v2090_v25  ;;  %v2117_v27 = vunpack.c.l.b16 %v2099_v19  ;;  %v2121_v26 = vunpack.c.l.b16 %v2103_v62 }
 0x18d   :  { %v2094_v49 = vsel %vm1184_vm11, %v2093_v6, %v2092_v44  ;;  %v2122_v50 = vunpack.c.l.b16 %v2104_v54  ;;  %v2125_v30 = vrot.slane %v2118_v34, 7  ;;  %v2127_v57 = vrot.slane %v2119_v51, 6 }
 0x18e   :  { %v1832_v20 = vrot.slane %v3451_v45, 2  ;;  %v2096_v1 = vsel %vm625_vm2, %v2094_v49, 0.0  ;;  %v2123_v37 = vunpack.c.l.b16 %v2105_v36  ;;  %v2124_v46 = vunpack.c.l.b16 %v2106_v63  ;;  %v2629_v49 = vld [vmem:[%s3609_s10] sm:$0xff]  }
 0x18f   :  { %v2129_v48 = vrot.slane %v2120_v0, 5  ;;  %2097 = vadd.xlane.f32.xlu0 %v2096_v1  ;;  %v1823_v40 = vsel %vm1166_vm5, %v1822_v2, %v3439_v14  ;;  %v2144_v42 = vsel %vm1233_vm4, %v2425_v4, 0  ;;  %v2126_v15 = vsel %vm1166_vm5, %v2125_v30, %v2117_v27 }
 0x190   :  { %v1834_v18 = vrot.slane %v3454_v38, 1  ;;  %v2131_v9 = vrot.slane %v2121_v26, 4  ;;  %v1825_v45 = vsel %vm1169_vm6, %v1824_v56, %v1823_v40  ;;  %2584 = vmatpush3.bf16.msra.mxu1 %v2144_v42  ;;  %v2128_v10 = vsel %vm1169_vm6, %v2127_v57, %v2126_v15 }
 0x191   :  { %v2133_v41 = vrot.slane %v2122_v50, 3  ;;  %v1827_v17 = vsel %vm1172_vm7, %v1826_v61, %v1825_v45  ;;  %v2130_v5 = vsel %vm1172_vm7, %v2129_v48, %v2128_v10  ;;  %v2135_v14 = vrot.slane %v2123_v37, 2  ;;  %v2630_v50 = vld [vmem:[%s3609_s10 + $0x8] sm:$0xff]   ;;  %v2196_v37 = vld [vmem:[#allocation2] sm:$0xff] }
 0x192   :  { %v1829_v2 = vsel %vm1175_vm8, %v1828_v47, %v1827_v17  ;;  %v2132_v16 = vsel %vm1175_vm8, %v2131_v9, %v2130_v5  ;;  %v2137_v32 = vrot.slane %v2124_v46, 1  ;;  %v2709_v23 = vmov 0  }
 0x193   :  { %v1831_v38 = vsel %vm1178_vm9, %v1830_v52, %v1829_v2  ;;  %v2134_v56 = vsel %vm1178_vm9, %v2133_v41, %v2132_v16  ;;  %2606 = vset.pattern.permute.xlu1 %v2709_v23  ;;  %v2710_v7 = vmov 1   ;;  %v2712_v34 = vmov 2  }
 0x194   :  { %v1833_v13 = vsel %vm1181_vm10, %v1832_v20, %v1831_v38  ;;  %v2136_v53 = vsel %vm1181_vm10, %v2135_v14, %v2134_v56  ;;  %2607 = vset.pattern.permute.xlu0 %v2710_v7  ;;  %v2715_v4 = vmov 3   ;;  %v3661_v38 = vld [vmem:[#allocation4_spill] sm:$0xff] }
 0x195   :  { %v1835_v24 = vsel %vm1184_vm11, %v1834_v18, %v1833_v13  ;;  %v2138_v58 = vsel %vm1184_vm11, %v2137_v32, %v2136_v53  ;;  %v2248_v32 = vld [vmem:[%s3610_s11] sm:$0x7]  ;;  %v3662_v56 = vsub.s32 0, %v3661_v38 }
 0x196   :  { %v1836_v33 = vpack.c.b16 %v1835_v24, %v1835_v24  ;;  %v2139_v31 = vpack.c.b16 %v2138_v58, %v2138_v58  ;;  %v2313_v24 = vld [vmem:[%s3611_s9] sm:$0xff] }
 0x197   :  { %v2257_v13 = vrot.slane %v2248_v32, %v3662_v56 }
 0x198   :  { %2580 = vmatmul.mubr.msk.bf16.vlgmr.msra.gmra.mrb[24].mxu0 %vm625_vm2, %v1836_v33  ;;  %2586 = vmatmul.mubr.msk.bf16.vlgmr.msra.gmra.mrb[28].mxu1 %vm625_vm2, %v2139_v31 }
 0x199   :  { %2593 = vmatprep.mubr.msk.bf16.mxu0 %vm2708_vm1, %v3653_v35  ;;  %2590 = vmatpush3.bf16.msra.mxu0 %v2629_v49  ;;  %vm2210_vm1 = vcmask 130048  }
 0x19a   :  { %2591 = vmatprep.subr.bf16.mxu0 %v3653_v35 }
 0x19d   :  { %2592 = vmatpush3.bf16.msra.mxu0 %v2630_v50 }
 0x1ec   :  { %v1189_v21 = vpop.xlane.xlu0 %1188 }
 0x1fb   :  { %v1492_v61 = vpop.xlane.xlu1 %1491 }
 0x1fc   :  { %v2188_v39 = vsel %vm2187_vm13, %v1189_v21, %v1492_v61 }
 0x207   :  { %v1795_v47 = vpop.xlane.xlu0 %1794 }
 0x208   :  { %v2190_v59 = vsel %vm2189_vm14, %v2188_v39, %v1795_v47 }
 0x21c   :  { %v2098_v12 = vpop.xlane.xlu0 %2097 }
 0x21d   :  { %v2192_v8 = vsel %vm2191_vm15, %v2190_v59, %v2098_v12 }
 0x21e   :  { %v2193_v19 = vadd.f32 %v2192_v8, %v2186_v55 }
 0x220   :  { %2195 = vst.msk [vmem:[#allocation3] sm:$0xff] %vm48_vm12, %v2193_v19 }
 0x227   :  { %v2219_v3 = vld [vmem:[#allocation3] sm:$0xff] }
 0x228   :  { %v2220_v60 = vadd.f32 1e-06, %v2219_v3  ;;  %v3663_v3 = vsub.s32 1, %v3661_v38 }
 0x22a   :  { %2703 = vrcp.f32 %v2220_v60  ;;  %v2332_v60 = vrot.slane %v2248_v32, %v3663_v3 }
 0x234   :  { %v2704_v63 = vpop.eup %2703 }
 0x256   :  { %v1574_v43 = vpop.f32.mrb[24].mxu1 }
 0x257   :  { %v2575_v22 = vpop.f32.mrb[25].mxu1  ;;  %2198 = vrot.lane.b32.xlu1 %v1574_v43, %s2711_s4  ;;  %v3664_v43 = vsub.s32 2, %v3661_v38 }
 0x258   :  { %v1271_v29 = vpop.f32.mrb[20].mxu0  ;;  %v1577_v54 = vpop.f32.mrb[26].mxu1 }
 0x259   :  { %v2569_v28 = vpop.f32.mrb[21].mxu0  ;;  %v2576_v36 = vpop.f32.mrb[27].mxu1 }
 0x25a   :  { %v1274_v62 = vpop.f32.mrb[22].mxu0  ;;  %v2337_v28 = vrot.slane %v2248_v32, %v3664_v43 }
 0x25b   :  { %v2570_v11 = vpop.f32.mrb[23].mxu0  ;;  %2226 = vperm.xlu1 %2606, %v2704_v63  }
 0x25f   :  { %2608 = vset.pattern.permute.xlu1 %v2712_v34 }
 0x26b   :  { %v1877_v25 = vpop.f32.mrb[24].mxu0  ;;  %v2180_v6 = vpop.f32.mrb[28].mxu1 }
 0x26c   :  { %v2581_v51 = vpop.f32.mrb[25].mxu0  ;;  %2202 = vrot.lane.b32.xlu0 %v1877_v25, %s2713_s29  ;;  %v2587_v0 = vpop.f32.mrb[29].mxu1  ;;  %2206 = vrot.lane.b32.xlu1 %v2180_v6, %s2714_s30 }
 0x26d   :  { %v1880_v52 = vpop.f32.mrb[26].mxu0  ;;  %v2183_v44 = vpop.f32.mrb[30].mxu1 }
 0x26e   :  { %v2582_v27 = vpop.f32.mrb[27].mxu0  ;;  %v2588_v26 = vpop.f32.mrb[31].mxu1 }
 0x270   :  { %2231 = vperm.xlu0 %2607, %v2704_v63   ;;  %2236 = vperm.xlu1 %2608, %v2704_v63  }
 0x274   :  { %2609 = vset.pattern.permute.xlu1 %v2715_v4  ;;  %2610 = vset.pattern.permute.xlu0 %v2715_v4 }
 0x275   :  { %2241 = vperm.xlu1 %2609, %v2704_v63  }
 0x2c9   :  { %v2199_v30 = vpop.permute.xlu1 %2198 }
 0x2ca   :  { %v2209_v20 = vsel %vm625_vm2, %v1271_v29, %v2199_v30 }
 0x2da   :  { %v2227_v57 = vpop.permute.xlu1 %2226 }
 0x2de   :  { %v2203_v1 = vpop.permute.xlu0 %2202  ;;  %v2207_v48 = vpop.permute.xlu1 %2206 }
 0x2df   :  { %v2211_v46 = vsel %vm2210_vm1, %v2209_v20, %v2203_v1 }
 0x2e0   :  { %v2213_v40 = vsel %vm2212_vm3, %v2211_v46, %v2207_v48 }
 0x2e1   :  { %v2214_v42 = vadd.f32 %v2213_v40, %v2196_v37 }
 0x2e3   :  { %2215 = vst.msk [vmem:[#allocation2] sm:$0xff] %vm46_vm0, %v2214_v42 }
 0x2ea   :  { %v2223_v15 = vld [vmem:[#allocation2] sm:$0xff] }
 0x2eb   :  { %v2229_v18 = vmul.f32 %v2227_v57, %v2223_v15 }
 0x2ef   :  { %v2232_v35 = vpop.permute.xlu0 %2231  ;;  %v2237_v9 = vpop.permute.xlu1 %2236 }
 0x2f0   :  { %v2234_v45 = vmul.f32 %v2232_v35, %v2223_v15  ;;  %v2239_v10 = vmul.f32 %v2237_v9, %v2223_v15 }
 0x2f2   :  { %v2245_v41 = vsel %vm625_vm2, %v2229_v18, %v2234_v45 }
 0x2f3   :  { %v2246_v17 = vsel %vm2210_vm1, %v2245_v41, %v2239_v10 }
 0x2f4   :  { %v2242_v5 = vpop.permute.xlu1 %2241 }
 0x2f5   :  { %v2244_v14 = vmul.f32 %v2242_v5, %v2223_v15 }
 0x2f7   :  { %v2247_v2 = vsel %vm2212_vm3, %v2246_v17, %v2244_v14 }
 0x2f8   :  { %v2249_v16 = vpack.c.bf16 %v2247_v2, %v2247_v2 }
 0x2fa   :  { %2594 = vmatmul.mubr.msk.bf16.vlgmr.msra.gmra.mrb[28].mxu0 %vm46_vm0, %v2249_v16 }
 0x3cd   :  { %v2307_v53 = vpop.f32.mrb[28].mxu0 }
 0x3ce   :  { %v2308_v58 = vadd.f32 %v2307_v53, %v2257_v13  ;;  %v2595_v33 = vpop.f32.mrb[29].mxu0 }
 0x3cf   :  { %v2310_v31 = vpop.f32.mrb[30].mxu0 }
 0x3d0   :  { %v2596_v23 = vpop.f32.mrb[31].mxu0  ;;  %v2314_v7 = vadd.f32 %v2313_v24, %v2308_v58 }
 0x3d2   :  { %v2315_v21 = vsel %vm46_vm0, %v2314_v7, 0.0 }
 0x3d3   :  { %2316 = vadd.xlane.f32.xlu0 %v2315_v21 }
 0x460   :  { %v2317_v61 = vpop.xlane.xlu0 %2316 }
 0x461   :  { %v2319_v47 = vmul.f32 0.03125, %v2317_v61 }
 0x463   :  { %v2320_v39 = vsub.f32 %v2314_v7, %v2319_v47 }
 0x465   :  { %v2321_v55 = vmul.f32 %v2320_v39, %v2320_v39 }
 0x467   :  { %v2322_v59 = vsel %vm46_vm0, %v2321_v55, 0.0 }
 0x468   :  { %2323 = vadd.xlane.f32.xlu1 %v2322_v59 }
 0x4f5   :  { %v2324_v12 = vpop.xlane.xlu1 %2323 }
 0x4f6   :  { %v2325_v8 = vmul.f32 0.03125, %v2324_v12 }
 0x4f8   :  { %v2326_v19 = vadd.f32 1e-05, %v2325_v8 }
 0x4fa   :  { %2705 = vrsqrt.f32 %v2326_v19 }
 0x504   :  { %v2706_v29 = vpop.eup %2705 }
 0x505   :  { %v2328_v22 = vmul.f32 %v2706_v29, %v2320_v39 }
 0x507   :  { %v2333_v62 = vmul.f32 %v2332_v60, %v2328_v22 }
 0x509   :  { %v2338_v54 = vadd.f32 %v2337_v28, %v2333_v62 }
 0x50b   :  { %2339 = vst.msk [vmem:[%s3612_s12] sm:$0xff] %vm46_vm0, %v2338_v54 }

</bundles_post_ra>
